<compile_context>
chip_gen: v5e
topology: v5e:2x2
jax: 0.10.0
libtpu: 0.0.40
codegen_flags: <defaults>
</compile_context>

<pallas_src>
import functools

import jax
import jax.numpy as jnp
from jax.experimental import pallas as pl
from jax.experimental.pallas import tpu as pltpu


def _resnet_block_kernel(x_ref, t_ref, mask_ref,
                         w1_ref, b1_ref, g1_ref, be1_ref,
                         wm_ref, bm_ref,
                         w2_ref, b2_ref, g2_ref, be2_ref,
                         wr_ref, br_ref, mg_ref, mgt_ref,
                         o_ref, xext_ref, hext_ref,
                         *, W, N, PAD, groups, eps):
    """One batch element per grid step. All tensors are channel-first [C, N]."""
    f32 = jnp.float32
    cout = o_ref.shape[1]
    NE = hext_ref.shape[1]

    mask = mask_ref[...]              # [9, N]  per-tap spatial validity (1.0 / 0.0)
    mg = mg_ref[...]                  # [G, C]  one-hot channel->group
    mgt = mgt_ref[...]                # [C, G]

    def silu(v):
        return v * jax.nn.sigmoid(v)

    def im2col(ext_ref, img):
        """Zero-pad img [C, N] into ext_ref [C, NE]; gather the 9 shifted masked
        3x3 taps into a tap-major [9*C, N] matrix (all slices static & in-VMEM)."""
        c = img.shape[0]
        # only the pads need zeroing; the image slab is overwritten (all 128-aligned)
        ext_ref[:, :PAD] = jnp.zeros((c, PAD), f32)
        ext_ref[:, PAD + N:] = jnp.zeros((c, NE - PAD - N), f32)
        ext_ref[:, PAD:PAD + N] = img
        taps = []
        for t in range(9):
            sy, sx = t // 3 - 1, t % 3 - 1
            s = PAD + sy * W + sx
            taps.append(ext_ref[:, s:s + N] * mask[t:t + 1, :])
        return jnp.concatenate(taps, axis=0)                                 # [9*C, N]

    def group_norm(h, gamma, beta):
        # per-channel moments (lane reduce), group reduce / expand via one-hot matmuls
        cpg = cout // groups
        s1 = jnp.sum(h, axis=1, keepdims=True)                               # [C, 1]
        s2 = jnp.sum(h * h, axis=1, keepdims=True)                           # [C, 1]
        inv_cnt = 1.0 / float(cpg * N)
        gmean = jnp.dot(mg, s1, preferred_element_type=f32) * inv_cnt        # [G, 1]
        gmsq = jnp.dot(mg, s2, preferred_element_type=f32) * inv_cnt         # [G, 1]
        ginv = jax.lax.rsqrt(gmsq - gmean * gmean + eps)                     # [G, 1]
        mean_c = jnp.dot(mgt, gmean, preferred_element_type=f32)             # [C, 1]
        inv_c = jnp.dot(mgt, ginv, preferred_element_type=f32)               # [C, 1]
        return (h - mean_c) * inv_c * gamma + beta

    # ---- time-embedding MLP: SiLU -> Linear -> (scale, shift), each [C, 1] ----
    te = silu(t_ref[0])                                                      # [T, 1]
    ss = jnp.dot(wm_ref[...], te, preferred_element_type=f32) + bm_ref[...]  # [2C, 1]
    scale = ss[:cout, :]
    shift = ss[cout:, :]

    x = x_ref[0].astype(f32)                                                 # [Cin, N]

    # ---- block1: conv3x3 (in-kernel im2col) -> GN -> scale/shift -> SiLU ----
    xcol = im2col(xext_ref, x)                                               # [9*Cin, N]
    h = jnp.dot(w1_ref[...], xcol, preferred_element_type=f32) + b1_ref[...]
    h = group_norm(h, g1_ref[...], be1_ref[...])
    h = h * (scale + 1.0) + shift
    h = silu(h)

    # ---- block2: conv3x3 (in-kernel im2col of h) -> GN -> SiLU ----
    hcol = im2col(hext_ref, h)                                               # [9*Cout, N]
    h2 = jnp.dot(w2_ref[...], hcol, preferred_element_type=f32) + b2_ref[...]
    h2 = group_norm(h2, g2_ref[...], be2_ref[...])
    h2 = silu(h2)

    # ---- residual 1x1 conv directly on x ----
    res = jnp.dot(wr_ref[...], x, preferred_element_type=f32) + br_ref[...]

    o_ref[0] = (h2 + res).astype(o_ref.dtype)


def resnet_block_forward(x, time_emb, params, *, groups=8, eps=1e-5):
    """x: NCHW [B, Cin, H, W]; time_emb: [B, T]. Returns NCHW [B, Cout, H, W]."""
    B, Cin, H, W = x.shape
    N = H * W
    w1 = params["w1"]                       # [Cout, Cin, 3, 3]
    Cout = w1.shape[0]
    T = time_emb.shape[-1]
    f32 = jnp.float32
    assert N % 128 == 0, "flattened spatial dim must be a multiple of 128"
    assert Cout % groups == 0

    # lane-aligned (128) zero pad around the flattened image; must cover the largest
    # 3x3 tap shift (W + 1) so every shifted view stays inside the scratch buffer.
    PAD = max(128, ((W + 1 + 127) // 128) * 128)
    NE = N + 2 * PAD

    # ---------- wrapper-side layout prep (reshapes / tiny constants only) ----------
    xcf = x.reshape(B, Cin, N).astype(f32)                           # channel-first

    def conv_w_mat(w):                     # [O, I, 3, 3] -> [O, 9*I], tap-major rows
        o, c = w.shape[0], w.shape[1]
        return jnp.transpose(w, (0, 2, 3, 1)).reshape(o, 9 * c).astype(f32)

    w1_mat = conv_w_mat(w1)                                          # [Cout, 9*Cin]
    w2_mat = conv_w_mat(params["w2"])                                # [Cout, 9*Cout]

    col = lambda v: v.reshape(-1, 1).astype(f32)
    b1c, g1c, be1c = col(params["b1"]), col(params["g1"]), col(params["be1"])
    b2c, g2c, be2c = col(params["b2"]), col(params["g2"]), col(params["be2"])
    w_mlp = params["w_mlp"].astype(f32)                              # [2*Cout, T]
    bm_c = col(params["b_mlp"])                                      # [2*Cout, 1]

    if "w_res" in params:                                            # dim != dim_out
        wr = params["w_res"].reshape(Cout, Cin).astype(f32)
        brc = col(params["b_res"])
    else:                                                            # identity residual
        wr = jnp.eye(Cout, Cin, dtype=f32)
        brc = jnp.zeros((Cout, 1), f32)

    # per-tap spatial validity mask for the in-kernel 3x3 shifted views
    rr = jnp.arange(N, dtype=jnp.int32) // W
    cc = jnp.arange(N, dtype=jnp.int32) % W
    masks = []
    for dy in range(3):
        for dx in range(3):
            sy, sx = dy - 1, dx - 1
            ok = (rr + sy >= 0) & (rr + sy < H) & (cc + sx >= 0) & (cc + sx < W)
            masks.append(ok.astype(f32))
    mask = jnp.stack(masks, axis=0)                                  # [9, N]

    # one-hot group matrices for GroupNorm reductions on the MXU
    ch = jnp.arange(Cout, dtype=jnp.int32)
    gi = jnp.arange(groups, dtype=jnp.int32)
    mg = (ch[None, :] // (Cout // groups) == gi[:, None]).astype(f32)   # [G, Cout]
    mgt = jnp.transpose(mg)                                             # [Cout, G]

    temb = time_emb.astype(f32).reshape(B, T, 1)

    kernel = functools.partial(_resnet_block_kernel,
                               W=W, N=N, PAD=PAD, groups=groups, eps=eps)
    const = lambda b: (0, 0)

    out = pl.pallas_call(
        kernel,
        out_shape=jax.ShapeDtypeStruct((B, Cout, N), x.dtype),
        grid_spec=pltpu.PrefetchScalarGridSpec(
            num_scalar_prefetch=0,
            grid=(B,),
            in_specs=[
                pl.BlockSpec((1, Cin, N), lambda b: (b, 0, 0)),       # x (channel-first)
                pl.BlockSpec((1, T, 1), lambda b: (b, 0, 0)),         # time embedding
                pl.BlockSpec((9, N), const),                          # tap masks
                pl.BlockSpec((Cout, 9 * Cin), const),                 # conv1 weight
                pl.BlockSpec((Cout, 1), const),                       # conv1 bias
                pl.BlockSpec((Cout, 1), const),                       # gn1 gamma
                pl.BlockSpec((Cout, 1), const),                       # gn1 beta
                pl.BlockSpec((2 * Cout, T), const),                   # mlp weight
                pl.BlockSpec((2 * Cout, 1), const),                   # mlp bias
                pl.BlockSpec((Cout, 9 * Cout), const),                # conv2 weight
                pl.BlockSpec((Cout, 1), const),                       # conv2 bias
                pl.BlockSpec((Cout, 1), const),                       # gn2 gamma
                pl.BlockSpec((Cout, 1), const),                       # gn2 beta
                pl.BlockSpec((Cout, Cin), const),                     # res 1x1 weight
                pl.BlockSpec((Cout, 1), const),                       # res 1x1 bias
                pl.BlockSpec((groups, Cout), const),                  # group one-hot
                pl.BlockSpec((Cout, groups), const),                  # its transpose
            ],
            out_specs=pl.BlockSpec((1, Cout, N), lambda b: (b, 0, 0)),
            scratch_shapes=[pltpu.VMEM((Cin, NE), f32),               # padded x image
                            pltpu.VMEM((Cout, NE), f32)],             # padded h image
        ),
        compiler_params=pltpu.CompilerParams(
            dimension_semantics=("parallel",)),
    )(xcf, temb, mask, w1_mat, b1c, g1c, be1c, w_mlp, bm_c,
      w2_mat, b2c, g2c, be2c, wr, brc, mg, mgt)

    return out.reshape(B, Cout, H, W)


def resnet_block_reference(x, time_emb, params, *, groups=8, eps=1e-5):
    """Pure-JAX reference mirroring the PyTorch ResnetBlock forward."""
    hp = jax.lax.Precision.HIGHEST
    Cout = params["w1"].shape[0]

    def conv2d(v, w, b, pad):
        y = jax.lax.conv_general_dilated(
            v, w, window_strides=(1, 1), padding=[(pad, pad), (pad, pad)],
            dimension_numbers=("NCHW", "OIHW", "NCHW"), precision=hp)
        return y + b[None, :, None, None]

    def group_norm(v, gamma, beta):
        B, C, H, W = v.shape
        vg = v.reshape(B, groups, C // groups, H, W)
        mean = vg.mean(axis=(2, 3, 4), keepdims=True)
        var = vg.var(axis=(2, 3, 4), keepdims=True)
        vn = ((vg - mean) / jnp.sqrt(var + eps)).reshape(B, C, H, W)
        return vn * gamma[None, :, None, None] + beta[None, :, None, None]

    def silu(v):
        return v * jax.nn.sigmoid(v)

    temb = silu(time_emb) @ params["w_mlp"].T + params["b_mlp"]      # [B, 2*Cout]
    scale = temb[:, :Cout, None, None]
    shift = temb[:, Cout:, None, None]

    h = conv2d(x, params["w1"], params["b1"], 1)
    h = group_norm(h, params["g1"], params["be1"])
    h = h * (scale + 1.0) + shift
    h = silu(h)

    h = conv2d(h, params["w2"], params["b2"], 1)
    h = group_norm(h, params["g2"], params["be2"])
    h = silu(h)

    if "w_res" in params:
        res = conv2d(x, params["w_res"], params["b_res"], 0)
    else:
        res = x
    return h + res


if __name__ == "__main__":
    B, DIM, DIM_OUT, H, W = 2, 4, 32, 16, 16
    GROUPS, TIME_DIM = 8, 32

    keys = jax.random.split(jax.random.PRNGKey(0), 14)

    def uni(k, shape, fan_in):
        bound = 1.0 / (fan_in ** 0.5)
        return jax.random.uniform(k, shape, jnp.float32, -bound, bound)

    params = {
        "w1": uni(keys[0], (DIM_OUT, DIM, 3, 3), DIM * 9),
        "b1": uni(keys[1], (DIM_OUT,), DIM * 9),
        "g1": 1.0 + 0.1 * jax.random.normal(keys[2], (DIM_OUT,), jnp.float32),
        "be1": 0.1 * jax.random.normal(keys[3], (DIM_OUT,), jnp.float32),
        "w_mlp": uni(keys[4], (2 * DIM_OUT, TIME_DIM), TIME_DIM),
        "b_mlp": uni(keys[5], (2 * DIM_OUT,), TIME_DIM),
        "w2": uni(keys[6], (DIM_OUT, DIM_OUT, 3, 3), DIM_OUT * 9),
        "b2": uni(keys[7], (DIM_OUT,), DIM_OUT * 9),
        "g2": 1.0 + 0.1 * jax.random.normal(keys[8], (DIM_OUT,), jnp.float32),
        "be2": 0.1 * jax.random.normal(keys[9], (DIM_OUT,), jnp.float32),
        "w_res": uni(keys[10], (DIM_OUT, DIM, 1, 1), DIM),
        "b_res": uni(keys[11], (DIM_OUT,), DIM),
    }
    x = jax.random.normal(keys[12], (B, DIM, H, W), jnp.float32)
    t_emb = jax.random.normal(keys[13], (B, TIME_DIM), jnp.float32)

    out = resnet_block_forward(x, t_emb, params, groups=GROUPS)
    out = jax.block_until_ready(out)

    ref = resnet_block_reference(x, t_emb, params, groups=GROUPS)
    assert out.shape == (B, DIM_OUT, H, W)
    assert bool(jnp.all(jnp.isfinite(out)))
    max_diff = float(jnp.max(jnp.abs(out - ref)))
    assert bool(jnp.allclose(out, ref, atol=1e-2, rtol=1e-2)), f"max abs diff {max_diff}"

    print("KERNEL_OK")
</pallas_src>

<mosaic_0001>
module attributes {stable_mosaic.version = 11 : i64} {
  func.func @_resnet_block_kernel(%arg0: i32, %arg1: memref<1x4x256xf32, #tpu.memory_space<vmem>>, %arg2: memref<1x32x1xf32, #tpu.memory_space<vmem>>, %arg3: memref<9x256xf32, #tpu.memory_space<vmem>>, %arg4: memref<32x36xf32, #tpu.memory_space<vmem>>, %arg5: memref<32x1xf32, #tpu.memory_space<vmem>>, %arg6: memref<32x1xf32, #tpu.memory_space<vmem>>, %arg7: memref<32x1xf32, #tpu.memory_space<vmem>>, %arg8: memref<64x32xf32, #tpu.memory_space<vmem>>, %arg9: memref<64x1xf32, #tpu.memory_space<vmem>>, %arg10: memref<32x288xf32, #tpu.memory_space<vmem>>, %arg11: memref<32x1xf32, #tpu.memory_space<vmem>>, %arg12: memref<32x1xf32, #tpu.memory_space<vmem>>, %arg13: memref<32x1xf32, #tpu.memory_space<vmem>>, %arg14: memref<32x4xf32, #tpu.memory_space<vmem>>, %arg15: memref<32x1xf32, #tpu.memory_space<vmem>>, %arg16: memref<8x32xf32, #tpu.memory_space<vmem>>, %arg17: memref<32x8xf32, #tpu.memory_space<vmem>>, %arg18: memref<1x32x256xf32, #tpu.memory_space<vmem>>, %arg19: memref<4x512xf32, #tpu.memory_space<vmem>>, %arg20: memref<32x512xf32, #tpu.memory_space<vmem>>) attributes {dimension_semantics = [#tpu.dimension_semantics<parallel>], iteration_bounds = array<i64: 2>, scalar_prefetch = 0 : i64, scratch_operands = 2 : i64, tpu.core_type = #tpu.core_type<tc>, window_params = [{transform_indices = @transform_0, window_bounds = array<i64: 1, 4, 256>}, {transform_indices = @transform_1, window_bounds = array<i64: 1, 32, 1>}, {pipeline_mode = #tpu.pipeline_mode<synchronous>, transform_indices = @transform_2, window_bounds = array<i64: 9, 256>}, {pipeline_mode = #tpu.pipeline_mode<synchronous>, transform_indices = @transform_3, window_bounds = array<i64: 32, 36>}, {pipeline_mode = #tpu.pipeline_mode<synchronous>, transform_indices = @transform_4, window_bounds = array<i64: 32, 1>}, {pipeline_mode = #tpu.pipeline_mode<synchronous>, transform_indices = @transform_5, window_bounds = array<i64: 32, 1>}, {pipeline_mode = #tpu.pipeline_mode<synchronous>, transform_indices = @transform_6, window_bounds = array<i64: 32, 1>}, {pipeline_mode = #tpu.pipeline_mode<synchronous>, transform_indices = @transform_7, window_bounds = array<i64: 64, 32>}, {pipeline_mode = #tpu.pipeline_mode<synchronous>, transform_indices = @transform_8, window_bounds = array<i64: 64, 1>}, {pipeline_mode = #tpu.pipeline_mode<synchronous>, transform_indices = @transform_9, window_bounds = array<i64: 32, 288>}, {pipeline_mode = #tpu.pipeline_mode<synchronous>, transform_indices = @transform_10, window_bounds = array<i64: 32, 1>}, {pipeline_mode = #tpu.pipeline_mode<synchronous>, transform_indices = @transform_11, window_bounds = array<i64: 32, 1>}, {pipeline_mode = #tpu.pipeline_mode<synchronous>, transform_indices = @transform_12, window_bounds = array<i64: 32, 1>}, {pipeline_mode = #tpu.pipeline_mode<synchronous>, transform_indices = @transform_13, window_bounds = array<i64: 32, 4>}, {pipeline_mode = #tpu.pipeline_mode<synchronous>, transform_indices = @transform_14, window_bounds = array<i64: 32, 1>}, {pipeline_mode = #tpu.pipeline_mode<synchronous>, transform_indices = @transform_15, window_bounds = array<i64: 8, 32>}, {pipeline_mode = #tpu.pipeline_mode<synchronous>, transform_indices = @transform_16, window_bounds = array<i64: 32, 8>}, {transform_indices = @transform_17, window_bounds = array<i64: 1, 32, 256>}]} {
    %c0 = arith.constant 0 : index
    %c0_0 = arith.constant 0 : index
    %0 = vector.load %arg3[%c0, %c0_0] : memref<9x256xf32, #tpu.memory_space<vmem>>, vector<9x256xf32>
    %c0_1 = arith.constant 0 : index
    %c0_2 = arith.constant 0 : index
    %1 = vector.load %arg16[%c0_1, %c0_2] : memref<8x32xf32, #tpu.memory_space<vmem>>, vector<8x32xf32>
    %c0_3 = arith.constant 0 : index
    %c0_4 = arith.constant 0 : index
    %2 = vector.load %arg17[%c0_3, %c0_4] : memref<32x8xf32, #tpu.memory_space<vmem>>, vector<32x8xf32>
    %c0_5 = arith.constant 0 : index
    %c0_6 = arith.constant 0 : index
    %c0_7 = arith.constant 0 : index
    %3 = vector.load %arg2[%c0_5, %c0_6, %c0_7] : memref<1x32x1xf32, #tpu.memory_space<vmem>>, vector<1x32x1xf32>
    %4 = vector.shape_cast %3 : vector<1x32x1xf32> to vector<32x1xf32>
    %5 = arith.negf %4 : vector<32x1xf32>
    %6 = math.exp %5 : vector<32x1xf32>
    %cst = arith.constant 1.000000e+00 : f32
    %7 = vector.broadcast %cst : f32 to vector<32x1xf32>
    %8 = arith.addf %7, %6 : vector<32x1xf32>
    %9 = arith.divf %7, %8 : vector<32x1xf32>
    %10 = arith.mulf %4, %9 : vector<32x1xf32>
    %c0_8 = arith.constant 0 : index
    %c0_9 = arith.constant 0 : index
    %11 = vector.load %arg8[%c0_8, %c0_9] : memref<64x32xf32, #tpu.memory_space<vmem>>, vector<64x32xf32>
    %cst_10 = arith.constant dense<0.000000e+00> : vector<64x1xf32>
    %12 = tpu.matmul %11, %10, %cst_10 {dimension_numbers = #tpu.dot_dimension_numbers<[1], [0], [0], [1], [0, 0, 1, 1], [], []>} : vector<64x32xf32>, vector<32x1xf32>, vector<64x1xf32> -> vector<64x1xf32>
    %c0_11 = arith.constant 0 : index
    %c0_12 = arith.constant 0 : index
    %13 = vector.load %arg9[%c0_11, %c0_12] : memref<64x1xf32, #tpu.memory_space<vmem>>, vector<64x1xf32>
    %14 = arith.addf %12, %13 : vector<64x1xf32>
    %15 = vector.extract_strided_slice %14 {offsets = [0, 0], sizes = [32, 1], strides = [1, 1]} : vector<64x1xf32> to vector<32x1xf32>
    %16 = vector.extract_strided_slice %14 {offsets = [32, 0], sizes = [32, 1], strides = [1, 1]} : vector<64x1xf32> to vector<32x1xf32>
    %c0_13 = arith.constant 0 : index
    %c0_14 = arith.constant 0 : index
    %c0_15 = arith.constant 0 : index
    %17 = vector.load %arg1[%c0_13, %c0_14, %c0_15] : memref<1x4x256xf32, #tpu.memory_space<vmem>>, vector<1x4x256xf32>
    %18 = vector.shape_cast %17 : vector<1x4x256xf32> to vector<4x256xf32>
    %cst_16 = arith.constant 0.000000e+00 : f32
    %19 = vector.broadcast %cst_16 : f32 to vector<4x128xf32>
    %c0_17 = arith.constant 0 : index
    %c0_18 = arith.constant 0 : index
    %20 = vector.load %arg19[%c0_17, %c0_18] : memref<4x512xf32, #tpu.memory_space<vmem>>, vector<4x128xf32>
    tpu.vector_store %arg19[%c0_17, %c0_18], %19 {strides = array<i32>} : memref<4x512xf32, #tpu.memory_space<vmem>>, vector<4x128xf32>,
    %cst_19 = arith.constant 0.000000e+00 : f32
    %21 = vector.broadcast %cst_19 : f32 to vector<4x128xf32>
    %c0_20 = arith.constant 0 : index
    %c384 = arith.constant 384 : index
    %22 = vector.load %arg19[%c0_20, %c384] : memref<4x512xf32, #tpu.memory_space<vmem>>, vector<4x128xf32>
    tpu.vector_store %arg19[%c0_20, %c384], %21 {strides = array<i32>} : memref<4x512xf32, #tpu.memory_space<vmem>>, vector<4x128xf32>,
    %c0_21 = arith.constant 0 : index
    %c128 = arith.constant 128 : index
    %23 = vector.load %arg19[%c0_21, %c128] : memref<4x512xf32, #tpu.memory_space<vmem>>, vector<4x256xf32>
    tpu.vector_store %arg19[%c0_21, %c128], %18 {strides = array<i32>} : memref<4x512xf32, #tpu.memory_space<vmem>>, vector<4x256xf32>,
    %c0_22 = arith.constant 0 : index
    %c111 = arith.constant 111 : index
    %24 = vector.load %arg19[%c0_22, %c111] : memref<4x512xf32, #tpu.memory_space<vmem>>, vector<4x256xf32>
    %25 = vector.extract_strided_slice %0 {offsets = [0, 0], sizes = [1, 256], strides = [1, 1]} : vector<9x256xf32> to vector<1x256xf32>
    %26 = vector.broadcast %25 : vector<1x256xf32> to vector<4x256xf32>
    %27 = arith.mulf %24, %26 : vector<4x256xf32>
    %c0_23 = arith.constant 0 : index
    %c112 = arith.constant 112 : index
    %28 = vector.load %arg19[%c0_23, %c112] : memref<4x512xf32, #tpu.memory_space<vmem>>, vector<4x256xf32>
    %29 = vector.extract_strided_slice %0 {offsets = [1, 0], sizes = [1, 256], strides = [1, 1]} : vector<9x256xf32> to vector<1x256xf32>
    %30 = vector.broadcast %29 : vector<1x256xf32> to vector<4x256xf32>
    %31 = arith.mulf %28, %30 : vector<4x256xf32>
    %c0_24 = arith.constant 0 : index
    %c113 = arith.constant 113 : index
    %32 = vector.load %arg19[%c0_24, %c113] : memref<4x512xf32, #tpu.memory_space<vmem>>, vector<4x256xf32>
    %33 = vector.extract_strided_slice %0 {offsets = [2, 0], sizes = [1, 256], strides = [1, 1]} : vector<9x256xf32> to vector<1x256xf32>
    %34 = vector.broadcast %33 : vector<1x256xf32> to vector<4x256xf32>
    %35 = arith.mulf %32, %34 : vector<4x256xf32>
    %c0_25 = arith.constant 0 : index
    %c127 = arith.constant 127 : index
    %36 = vector.load %arg19[%c0_25, %c127] : memref<4x512xf32, #tpu.memory_space<vmem>>, vector<4x256xf32>
    %37 = vector.extract_strided_slice %0 {offsets = [3, 0], sizes = [1, 256], strides = [1, 1]} : vector<9x256xf32> to vector<1x256xf32>
    %38 = vector.broadcast %37 : vector<1x256xf32> to vector<4x256xf32>
    %39 = arith.mulf %36, %38 : vector<4x256xf32>
    %c0_26 = arith.constant 0 : index
    %c128_27 = arith.constant 128 : index
    %40 = vector.load %arg19[%c0_26, %c128_27] : memref<4x512xf32, #tpu.memory_space<vmem>>, vector<4x256xf32>
    %41 = vector.extract_strided_slice %0 {offsets = [4, 0], sizes = [1, 256], strides = [1, 1]} : vector<9x256xf32> to vector<1x256xf32>
    %42 = vector.broadcast %41 : vector<1x256xf32> to vector<4x256xf32>
    %43 = arith.mulf %40, %42 : vector<4x256xf32>
    %c0_28 = arith.constant 0 : index
    %c129 = arith.constant 129 : index
    %44 = vector.load %arg19[%c0_28, %c129] : memref<4x512xf32, #tpu.memory_space<vmem>>, vector<4x256xf32>
    %45 = vector.extract_strided_slice %0 {offsets = [5, 0], sizes = [1, 256], strides = [1, 1]} : vector<9x256xf32> to vector<1x256xf32>
    %46 = vector.broadcast %45 : vector<1x256xf32> to vector<4x256xf32>
    %47 = arith.mulf %44, %46 : vector<4x256xf32>
    %c0_29 = arith.constant 0 : index
    %c143 = arith.constant 143 : index
    %48 = vector.load %arg19[%c0_29, %c143] : memref<4x512xf32, #tpu.memory_space<vmem>>, vector<4x256xf32>
    %49 = vector.extract_strided_slice %0 {offsets = [6, 0], sizes = [1, 256], strides = [1, 1]} : vector<9x256xf32> to vector<1x256xf32>
    %50 = vector.broadcast %49 : vector<1x256xf32> to vector<4x256xf32>
    %51 = arith.mulf %48, %50 : vector<4x256xf32>
    %c0_30 = arith.constant 0 : index
    %c144 = arith.constant 144 : index
    %52 = vector.load %arg19[%c0_30, %c144] : memref<4x512xf32, #tpu.memory_space<vmem>>, vector<4x256xf32>
    %53 = vector.extract_strided_slice %0 {offsets = [7, 0], sizes = [1, 256], strides = [1, 1]} : vector<9x256xf32> to vector<1x256xf32>
    %54 = vector.broadcast %53 : vector<1x256xf32> to vector<4x256xf32>
    %55 = arith.mulf %52, %54 : vector<4x256xf32>
    %c0_31 = arith.constant 0 : index
    %c145 = arith.constant 145 : index
    %56 = vector.load %arg19[%c0_31, %c145] : memref<4x512xf32, #tpu.memory_space<vmem>>, vector<4x256xf32>
    %57 = vector.extract_strided_slice %0 {offsets = [8, 0], sizes = [1, 256], strides = [1, 1]} : vector<9x256xf32> to vector<1x256xf32>
    %58 = vector.broadcast %57 : vector<1x256xf32> to vector<4x256xf32>
    %59 = arith.mulf %56, %58 : vector<4x256xf32>
    %60 = tpu.concatenate %27, %31, %35, %39, %43, %47, %51, %55, %59 in 0 : vector<4x256xf32>, vector<4x256xf32>, vector<4x256xf32>, vector<4x256xf32>, vector<4x256xf32>, vector<4x256xf32>, vector<4x256xf32>, vector<4x256xf32>, vector<4x256xf32> -> vector<36x256xf32>
    %c0_32 = arith.constant 0 : index
    %c0_33 = arith.constant 0 : index
    %61 = vector.load %arg4[%c0_32, %c0_33] : memref<32x36xf32, #tpu.memory_space<vmem>>, vector<32x36xf32>
    %cst_34 = arith.constant dense<0.000000e+00> : vector<32x256xf32>
    %62 = tpu.matmul %61, %60, %cst_34 {dimension_numbers = #tpu.dot_dimension_numbers<[1], [0], [0], [1], [0, 0, 1, 1], [], []>} : vector<32x36xf32>, vector<36x256xf32>, vector<32x256xf32> -> vector<32x256xf32>
    %c0_35 = arith.constant 0 : index
    %c0_36 = arith.constant 0 : index
    %63 = vector.load %arg5[%c0_35, %c0_36] : memref<32x1xf32, #tpu.memory_space<vmem>>, vector<32x1xf32>
    %64 = vector.broadcast %63 : vector<32x1xf32> to vector<32x256xf32>
    %65 = arith.addf %62, %64 : vector<32x256xf32>
    %c0_37 = arith.constant 0 : index
    %c0_38 = arith.constant 0 : index
    %66 = vector.load %arg6[%c0_37, %c0_38] : memref<32x1xf32, #tpu.memory_space<vmem>>, vector<32x1xf32>
    %c0_39 = arith.constant 0 : index
    %c0_40 = arith.constant 0 : index
    %67 = vector.load %arg7[%c0_39, %c0_40] : memref<32x1xf32, #tpu.memory_space<vmem>>, vector<32x1xf32>
    %cst_41 = arith.constant dense<0.000000e+00> : vector<32xf32>
    %68 = vector.multi_reduction <add>, %65, %cst_41 [1] : vector<32x256xf32> to vector<32xf32>
    %69 = vector.shape_cast %68 : vector<32xf32> to vector<32x1xf32>
    %70 = arith.mulf %65, %65 : vector<32x256xf32>
    %cst_42 = arith.constant dense<0.000000e+00> : vector<32xf32>
    %71 = vector.multi_reduction <add>, %70, %cst_42 [1] : vector<32x256xf32> to vector<32xf32>
    %72 = vector.shape_cast %71 : vector<32xf32> to vector<32x1xf32>
    %cst_43 = arith.constant dense<0.000000e+00> : vector<8x1xf32>
    %73 = tpu.matmul %1, %69, %cst_43 {dimension_numbers = #tpu.dot_dimension_numbers<[1], [0], [0], [1], [0, 0, 1, 1], [], []>} : vector<8x32xf32>, vector<32x1xf32>, vector<8x1xf32> -> vector<8x1xf32>
    %cst_44 = arith.constant 9.765625E-4 : f32
    %74 = vector.broadcast %cst_44 : f32 to vector<8x1xf32>
    %75 = arith.mulf %73, %74 : vector<8x1xf32>
    %cst_45 = arith.constant dense<0.000000e+00> : vector<8x1xf32>
    %76 = tpu.matmul %1, %72, %cst_45 {dimension_numbers = #tpu.dot_dimension_numbers<[1], [0], [0], [1], [0, 0, 1, 1], [], []>} : vector<8x32xf32>, vector<32x1xf32>, vector<8x1xf32> -> vector<8x1xf32>
    %cst_46 = arith.constant 9.765625E-4 : f32
    %77 = vector.broadcast %cst_46 : f32 to vector<8x1xf32>
    %78 = arith.mulf %76, %77 : vector<8x1xf32>
    %79 = arith.mulf %75, %75 : vector<8x1xf32>
    %80 = arith.subf %78, %79 : vector<8x1xf32>
    %cst_47 = arith.constant 9.99999974E-6 : f32
    %81 = vector.broadcast %cst_47 : f32 to vector<8x1xf32>
    %82 = arith.addf %80, %81 : vector<8x1xf32>
    %83 = math.rsqrt %82 : vector<8x1xf32>
    %cst_48 = arith.constant dense<0.000000e+00> : vector<32x1xf32>
    %84 = tpu.matmul %2, %75, %cst_48 {dimension_numbers = #tpu.dot_dimension_numbers<[1], [0], [0], [1], [0, 0, 1, 1], [], []>} : vector<32x8xf32>, vector<8x1xf32>, vector<32x1xf32> -> vector<32x1xf32>
    %cst_49 = arith.constant dense<0.000000e+00> : vector<32x1xf32>
    %85 = tpu.matmul %2, %83, %cst_49 {dimension_numbers = #tpu.dot_dimension_numbers<[1], [0], [0], [1], [0, 0, 1, 1], [], []>} : vector<32x8xf32>, vector<8x1xf32>, vector<32x1xf32> -> vector<32x1xf32>
    %86 = vector.broadcast %84 : vector<32x1xf32> to vector<32x256xf32>
    %87 = arith.subf %65, %86 : vector<32x256xf32>
    %88 = vector.broadcast %85 : vector<32x1xf32> to vector<32x256xf32>
    %89 = arith.mulf %87, %88 : vector<32x256xf32>
    %90 = vector.broadcast %66 : vector<32x1xf32> to vector<32x256xf32>
    %91 = arith.mulf %89, %90 : vector<32x256xf32>
    %92 = vector.broadcast %67 : vector<32x1xf32> to vector<32x256xf32>
    %93 = arith.addf %91, %92 : vector<32x256xf32>
    %cst_50 = arith.constant 1.000000e+00 : f32
    %94 = vector.broadcast %cst_50 : f32 to vector<32x1xf32>
    %95 = arith.addf %15, %94 : vector<32x1xf32>
    %96 = vector.broadcast %95 : vector<32x1xf32> to vector<32x256xf32>
    %97 = arith.mulf %93, %96 : vector<32x256xf32>
    %98 = vector.broadcast %16 : vector<32x1xf32> to vector<32x256xf32>
    %99 = arith.addf %97, %98 : vector<32x256xf32>
    %100 = arith.negf %99 : vector<32x256xf32>
    %101 = math.exp %100 : vector<32x256xf32>
    %cst_51 = arith.constant 1.000000e+00 : f32
    %102 = vector.broadcast %cst_51 : f32 to vector<32x256xf32>
    %103 = arith.addf %102, %101 : vector<32x256xf32>
    %104 = arith.divf %102, %103 : vector<32x256xf32>
    %105 = arith.mulf %99, %104 : vector<32x256xf32>
    %cst_52 = arith.constant 0.000000e+00 : f32
    %106 = vector.broadcast %cst_52 : f32 to vector<32x128xf32>
    %c0_53 = arith.constant 0 : index
    %c0_54 = arith.constant 0 : index
    %107 = vector.load %arg20[%c0_53, %c0_54] : memref<32x512xf32, #tpu.memory_space<vmem>>, vector<32x128xf32>
    tpu.vector_store %arg20[%c0_53, %c0_54], %106 {strides = array<i32>} : memref<32x512xf32, #tpu.memory_space<vmem>>, vector<32x128xf32>,
    %cst_55 = arith.constant 0.000000e+00 : f32
    %108 = vector.broadcast %cst_55 : f32 to vector<32x128xf32>
    %c0_56 = arith.constant 0 : index
    %c384_57 = arith.constant 384 : index
    %109 = vector.load %arg20[%c0_56, %c384_57] : memref<32x512xf32, #tpu.memory_space<vmem>>, vector<32x128xf32>
    tpu.vector_store %arg20[%c0_56, %c384_57], %108 {strides = array<i32>} : memref<32x512xf32, #tpu.memory_space<vmem>>, vector<32x128xf32>,
    %c0_58 = arith.constant 0 : index
    %c128_59 = arith.constant 128 : index
    %110 = vector.load %arg20[%c0_58, %c128_59] : memref<32x512xf32, #tpu.memory_space<vmem>>, vector<32x256xf32>
    tpu.vector_store %arg20[%c0_58, %c128_59], %105 {strides = array<i32>} : memref<32x512xf32, #tpu.memory_space<vmem>>, vector<32x256xf32>,
    %c0_60 = arith.constant 0 : index
    %c111_61 = arith.constant 111 : index
    %111 = vector.load %arg20[%c0_60, %c111_61] : memref<32x512xf32, #tpu.memory_space<vmem>>, vector<32x256xf32>
    %112 = vector.extract_strided_slice %0 {offsets = [0, 0], sizes = [1, 256], strides = [1, 1]} : vector<9x256xf32> to vector<1x256xf32>
    %113 = vector.broadcast %112 : vector<1x256xf32> to vector<32x256xf32>
    %114 = arith.mulf %111, %113 : vector<32x256xf32>
    %c0_62 = arith.constant 0 : index
    %c112_63 = arith.constant 112 : index
    %115 = vector.load %arg20[%c0_62, %c112_63] : memref<32x512xf32, #tpu.memory_space<vmem>>, vector<32x256xf32>
    %116 = vector.extract_strided_slice %0 {offsets = [1, 0], sizes = [1, 256], strides = [1, 1]} : vector<9x256xf32> to vector<1x256xf32>
    %117 = vector.broadcast %116 : vector<1x256xf32> to vector<32x256xf32>
    %118 = arith.mulf %115, %117 : vector<32x256xf32>
    %c0_64 = arith.constant 0 : index
    %c113_65 = arith.constant 113 : index
    %119 = vector.load %arg20[%c0_64, %c113_65] : memref<32x512xf32, #tpu.memory_space<vmem>>, vector<32x256xf32>
    %120 = vector.extract_strided_slice %0 {offsets = [2, 0], sizes = [1, 256], strides = [1, 1]} : vector<9x256xf32> to vector<1x256xf32>
    %121 = vector.broadcast %120 : vector<1x256xf32> to vector<32x256xf32>
    %122 = arith.mulf %119, %121 : vector<32x256xf32>
    %c0_66 = arith.constant 0 : index
    %c127_67 = arith.constant 127 : index
    %123 = vector.load %arg20[%c0_66, %c127_67] : memref<32x512xf32, #tpu.memory_space<vmem>>, vector<32x256xf32>
    %124 = vector.extract_strided_slice %0 {offsets = [3, 0], sizes = [1, 256], strides = [1, 1]} : vector<9x256xf32> to vector<1x256xf32>
    %125 = vector.broadcast %124 : vector<1x256xf32> to vector<32x256xf32>
    %126 = arith.mulf %123, %125 : vector<32x256xf32>
    %c0_68 = arith.constant 0 : index
    %c128_69 = arith.constant 128 : index
    %127 = vector.load %arg20[%c0_68, %c128_69] : memref<32x512xf32, #tpu.memory_space<vmem>>, vector<32x256xf32>
    %128 = vector.extract_strided_slice %0 {offsets = [4, 0], sizes = [1, 256], strides = [1, 1]} : vector<9x256xf32> to vector<1x256xf32>
    %129 = vector.broadcast %128 : vector<1x256xf32> to vector<32x256xf32>
    %130 = arith.mulf %127, %129 : vector<32x256xf32>
    %c0_70 = arith.constant 0 : index
    %c129_71 = arith.constant 129 : index
    %131 = vector.load %arg20[%c0_70, %c129_71] : memref<32x512xf32, #tpu.memory_space<vmem>>, vector<32x256xf32>
    %132 = vector.extract_strided_slice %0 {offsets = [5, 0], sizes = [1, 256], strides = [1, 1]} : vector<9x256xf32> to vector<1x256xf32>
    %133 = vector.broadcast %132 : vector<1x256xf32> to vector<32x256xf32>
    %134 = arith.mulf %131, %133 : vector<32x256xf32>
    %c0_72 = arith.constant 0 : index
    %c143_73 = arith.constant 143 : index
    %135 = vector.load %arg20[%c0_72, %c143_73] : memref<32x512xf32, #tpu.memory_space<vmem>>, vector<32x256xf32>
    %136 = vector.extract_strided_slice %0 {offsets = [6, 0], sizes = [1, 256], strides = [1, 1]} : vector<9x256xf32> to vector<1x256xf32>
    %137 = vector.broadcast %136 : vector<1x256xf32> to vector<32x256xf32>
    %138 = arith.mulf %135, %137 : vector<32x256xf32>
    %c0_74 = arith.constant 0 : index
    %c144_75 = arith.constant 144 : index
    %139 = vector.load %arg20[%c0_74, %c144_75] : memref<32x512xf32, #tpu.memory_space<vmem>>, vector<32x256xf32>
    %140 = vector.extract_strided_slice %0 {offsets = [7, 0], sizes = [1, 256], strides = [1, 1]} : vector<9x256xf32> to vector<1x256xf32>
    %141 = vector.broadcast %140 : vector<1x256xf32> to vector<32x256xf32>
    %142 = arith.mulf %139, %141 : vector<32x256xf32>
    %c0_76 = arith.constant 0 : index
    %c145_77 = arith.constant 145 : index
    %143 = vector.load %arg20[%c0_76, %c145_77] : memref<32x512xf32, #tpu.memory_space<vmem>>, vector<32x256xf32>
    %144 = vector.extract_strided_slice %0 {offsets = [8, 0], sizes = [1, 256], strides = [1, 1]} : vector<9x256xf32> to vector<1x256xf32>
    %145 = vector.broadcast %144 : vector<1x256xf32> to vector<32x256xf32>
    %146 = arith.mulf %143, %145 : vector<32x256xf32>
    %147 = tpu.concatenate %114, %118, %122, %126, %130, %134, %138, %142, %146 in 0 : vector<32x256xf32>, vector<32x256xf32>, vector<32x256xf32>, vector<32x256xf32>, vector<32x256xf32>, vector<32x256xf32>, vector<32x256xf32>, vector<32x256xf32>, vector<32x256xf32> -> vector<288x256xf32>
    %c0_78 = arith.constant 0 : index
    %c0_79 = arith.constant 0 : index
    %148 = vector.load %arg10[%c0_78, %c0_79] : memref<32x288xf32, #tpu.memory_space<vmem>>, vector<32x288xf32>
    %cst_80 = arith.constant dense<0.000000e+00> : vector<32x256xf32>
    %149 = tpu.matmul %148, %147, %cst_80 {dimension_numbers = #tpu.dot_dimension_numbers<[1], [0], [0], [1], [0, 0, 1, 1], [], []>} : vector<32x288xf32>, vector<288x256xf32>, vector<32x256xf32> -> vector<32x256xf32>
    %c0_81 = arith.constant 0 : index
    %c0_82 = arith.constant 0 : index
    %150 = vector.load %arg11[%c0_81, %c0_82] : memref<32x1xf32, #tpu.memory_space<vmem>>, vector<32x1xf32>
    %151 = vector.broadcast %150 : vector<32x1xf32> to vector<32x256xf32>
    %152 = arith.addf %149, %151 : vector<32x256xf32>
    %c0_83 = arith.constant 0 : index
    %c0_84 = arith.constant 0 : index
    %153 = vector.load %arg12[%c0_83, %c0_84] : memref<32x1xf32, #tpu.memory_space<vmem>>, vector<32x1xf32>
    %c0_85 = arith.constant 0 : index
    %c0_86 = arith.constant 0 : index
    %154 = vector.load %arg13[%c0_85, %c0_86] : memref<32x1xf32, #tpu.memory_space<vmem>>, vector<32x1xf32>
    %cst_87 = arith.constant dense<0.000000e+00> : vector<32xf32>
    %155 = vector.multi_reduction <add>, %152, %cst_87 [1] : vector<32x256xf32> to vector<32xf32>
    %156 = vector.shape_cast %155 : vector<32xf32> to vector<32x1xf32>
    %157 = arith.mulf %152, %152 : vector<32x256xf32>
    %cst_88 = arith.constant dense<0.000000e+00> : vector<32xf32>
    %158 = vector.multi_reduction <add>, %157, %cst_88 [1] : vector<32x256xf32> to vector<32xf32>
    %159 = vector.shape_cast %158 : vector<32xf32> to vector<32x1xf32>
    %cst_89 = arith.constant dense<0.000000e+00> : vector<8x1xf32>
    %160 = tpu.matmul %1, %156, %cst_89 {dimension_numbers = #tpu.dot_dimension_numbers<[1], [0], [0], [1], [0, 0, 1, 1], [], []>} : vector<8x32xf32>, vector<32x1xf32>, vector<8x1xf32> -> vector<8x1xf32>
    %cst_90 = arith.constant 9.765625E-4 : f32
    %161 = vector.broadcast %cst_90 : f32 to vector<8x1xf32>
    %162 = arith.mulf %160, %161 : vector<8x1xf32>
    %cst_91 = arith.constant dense<0.000000e+00> : vector<8x1xf32>
    %163 = tpu.matmul %1, %159, %cst_91 {dimension_numbers = #tpu.dot_dimension_numbers<[1], [0], [0], [1], [0, 0, 1, 1], [], []>} : vector<8x32xf32>, vector<32x1xf32>, vector<8x1xf32> -> vector<8x1xf32>
    %cst_92 = arith.constant 9.765625E-4 : f32
    %164 = vector.broadcast %cst_92 : f32 to vector<8x1xf32>
    %165 = arith.mulf %163, %164 : vector<8x1xf32>
    %166 = arith.mulf %162, %162 : vector<8x1xf32>
    %167 = arith.subf %165, %166 : vector<8x1xf32>
    %cst_93 = arith.constant 9.99999974E-6 : f32
    %168 = vector.broadcast %cst_93 : f32 to vector<8x1xf32>
    %169 = arith.addf %167, %168 : vector<8x1xf32>
    %170 = math.rsqrt %169 : vector<8x1xf32>
    %cst_94 = arith.constant dense<0.000000e+00> : vector<32x1xf32>
    %171 = tpu.matmul %2, %162, %cst_94 {dimension_numbers = #tpu.dot_dimension_numbers<[1], [0], [0], [1], [0, 0, 1, 1], [], []>} : vector<32x8xf32>, vector<8x1xf32>, vector<32x1xf32> -> vector<32x1xf32>
    %cst_95 = arith.constant dense<0.000000e+00> : vector<32x1xf32>
    %172 = tpu.matmul %2, %170, %cst_95 {dimension_numbers = #tpu.dot_dimension_numbers<[1], [0], [0], [1], [0, 0, 1, 1], [], []>} : vector<32x8xf32>, vector<8x1xf32>, vector<32x1xf32> -> vector<32x1xf32>
    %173 = vector.broadcast %171 : vector<32x1xf32> to vector<32x256xf32>
    %174 = arith.subf %152, %173 : vector<32x256xf32>
    %175 = vector.broadcast %172 : vector<32x1xf32> to vector<32x256xf32>
    %176 = arith.mulf %174, %175 : vector<32x256xf32>
    %177 = vector.broadcast %153 : vector<32x1xf32> to vector<32x256xf32>
    %178 = arith.mulf %176, %177 : vector<32x256xf32>
    %179 = vector.broadcast %154 : vector<32x1xf32> to vector<32x256xf32>
    %180 = arith.addf %178, %179 : vector<32x256xf32>
    %181 = arith.negf %180 : vector<32x256xf32>
    %182 = math.exp %181 : vector<32x256xf32>
    %cst_96 = arith.constant 1.000000e+00 : f32
    %183 = vector.broadcast %cst_96 : f32 to vector<32x256xf32>
    %184 = arith.addf %183, %182 : vector<32x256xf32>
    %185 = arith.divf %183, %184 : vector<32x256xf32>
    %186 = arith.mulf %180, %185 : vector<32x256xf32>
    %c0_97 = arith.constant 0 : index
    %c0_98 = arith.constant 0 : index
    %187 = vector.load %arg14[%c0_97, %c0_98] : memref<32x4xf32, #tpu.memory_space<vmem>>, vector<32x4xf32>
    %cst_99 = arith.constant dense<0.000000e+00> : vector<32x256xf32>
    %188 = tpu.matmul %187, %18, %cst_99 {dimension_numbers = #tpu.dot_dimension_numbers<[1], [0], [0], [1], [0, 0, 1, 1], [], []>} : vector<32x4xf32>, vector<4x256xf32>, vector<32x256xf32> -> vector<32x256xf32>
    %c0_100 = arith.constant 0 : index
    %c0_101 = arith.constant 0 : index
    %189 = vector.load %arg15[%c0_100, %c0_101] : memref<32x1xf32, #tpu.memory_space<vmem>>, vector<32x1xf32>
    %190 = vector.broadcast %189 : vector<32x1xf32> to vector<32x256xf32>
    %191 = arith.addf %188, %190 : vector<32x256xf32>
    %192 = arith.addf %186, %191 : vector<32x256xf32>
    %c0_102 = arith.constant 0 : index
    %c0_103 = arith.constant 0 : index
    %c0_104 = arith.constant 0 : index
    %193 = vector.load %arg18[%c0_102, %c0_103, %c0_104] : memref<1x32x256xf32, #tpu.memory_space<vmem>>, vector<1x32x256xf32>
    %194 = vector.shape_cast %193 : vector<1x32x256xf32> to vector<32x256xf32>
    %195 = vector.shape_cast %192 : vector<32x256xf32> to vector<1x32x256xf32>
    tpu.vector_store %arg18[%c0_102, %c0_103, %c0_104], %195 {strides = array<i32>} : memref<1x32x256xf32, #tpu.memory_space<vmem>>, vector<1x32x256xf32>,
    return
  }
  func.func @transform_0(%arg0: i32) -> (i32, i32, i32) {
    %c0_i32 = arith.constant 0 : i32
    %c0_i32_0 = arith.constant 0 : i32
    %c0_i32_1 = arith.constant 0 : i32
    return %arg0, %c0_i32, %c0_i32_0 : i32, i32, i32
  }
  func.func @transform_1(%arg0: i32) -> (i32, i32, i32) {
    %c0_i32 = arith.constant 0 : i32
    %c0_i32_0 = arith.constant 0 : i32
    %c0_i32_1 = arith.constant 0 : i32
    return %arg0, %c0_i32, %c0_i32_0 : i32, i32, i32
  }
  func.func @transform_2(%arg0: i32) -> (i32, i32) {
    %c0_i32 = arith.constant 0 : i32
    %c0_i32_0 = arith.constant 0 : i32
    %c0_i32_1 = arith.constant 0 : i32
    return %c0_i32, %c0_i32_0 : i32, i32
  }
  func.func @transform_3(%arg0: i32) -> (i32, i32) {
    %c0_i32 = arith.constant 0 : i32
    %c0_i32_0 = arith.constant 0 : i32
    %c0_i32_1 = arith.constant 0 : i32
    return %c0_i32, %c0_i32_0 : i32, i32
  }
  func.func @transform_4(%arg0: i32) -> (i32, i32) {
    %c0_i32 = arith.constant 0 : i32
    %c0_i32_0 = arith.constant 0 : i32
    %c0_i32_1 = arith.constant 0 : i32
    return %c0_i32, %c0_i32_0 : i32, i32
  }
  func.func @transform_5(%arg0: i32) -> (i32, i32) {
    %c0_i32 = arith.constant 0 : i32
    %c0_i32_0 = arith.constant 0 : i32
    %c0_i32_1 = arith.constant 0 : i32
    return %c0_i32, %c0_i32_0 : i32, i32
  }
  func.func @transform_6(%arg0: i32) -> (i32, i32) {
    %c0_i32 = arith.constant 0 : i32
    %c0_i32_0 = arith.constant 0 : i32
    %c0_i32_1 = arith.constant 0 : i32
    return %c0_i32, %c0_i32_0 : i32, i32
  }
  func.func @transform_7(%arg0: i32) -> (i32, i32) {
    %c0_i32 = arith.constant 0 : i32
    %c0_i32_0 = arith.constant 0 : i32
    %c0_i32_1 = arith.constant 0 : i32
    return %c0_i32, %c0_i32_0 : i32, i32
  }
  func.func @transform_8(%arg0: i32) -> (i32, i32) {
    %c0_i32 = arith.constant 0 : i32
    %c0_i32_0 = arith.constant 0 : i32
    %c0_i32_1 = arith.constant 0 : i32
    return %c0_i32, %c0_i32_0 : i32, i32
  }
  func.func @transform_9(%arg0: i32) -> (i32, i32) {
    %c0_i32 = arith.constant 0 : i32
    %c0_i32_0 = arith.constant 0 : i32
    %c0_i32_1 = arith.constant 0 : i32
    return %c0_i32, %c0_i32_0 : i32, i32
  }
  func.func @transform_10(%arg0: i32) -> (i32, i32) {
    %c0_i32 = arith.constant 0 : i32
    %c0_i32_0 = arith.constant 0 : i32
    %c0_i32_1 = arith.constant 0 : i32
    return %c0_i32, %c0_i32_0 : i32, i32
  }
  func.func @transform_11(%arg0: i32) -> (i32, i32) {
    %c0_i32 = arith.constant 0 : i32
    %c0_i32_0 = arith.constant 0 : i32
    %c0_i32_1 = arith.constant 0 : i32
    return %c0_i32, %c0_i32_0 : i32, i32
  }
  func.func @transform_12(%arg0: i32) -> (i32, i32) {
    %c0_i32 = arith.constant 0 : i32
    %c0_i32_0 = arith.constant 0 : i32
    %c0_i32_1 = arith.constant 0 : i32
    return %c0_i32, %c0_i32_0 : i32, i32
  }
  func.func @transform_13(%arg0: i32) -> (i32, i32) {
    %c0_i32 = arith.constant 0 : i32
    %c0_i32_0 = arith.constant 0 : i32
    %c0_i32_1 = arith.constant 0 : i32
    return %c0_i32, %c0_i32_0 : i32, i32
  }
  func.func @transform_14(%arg0: i32) -> (i32, i32) {
    %c0_i32 = arith.constant 0 : i32
    %c0_i32_0 = arith.constant 0 : i32
    %c0_i32_1 = arith.constant 0 : i32
    return %c0_i32, %c0_i32_0 : i32, i32
  }
  func.func @transform_15(%arg0: i32) -> (i32, i32) {
    %c0_i32 = arith.constant 0 : i32
    %c0_i32_0 = arith.constant 0 : i32
    %c0_i32_1 = arith.constant 0 : i32
    return %c0_i32, %c0_i32_0 : i32, i32
  }
  func.func @transform_16(%arg0: i32) -> (i32, i32) {
    %c0_i32 = arith.constant 0 : i32
    %c0_i32_0 = arith.constant 0 : i32
    %c0_i32_1 = arith.constant 0 : i32
    return %c0_i32, %c0_i32_0 : i32, i32
  }
  func.func @transform_17(%arg0: i32) -> (i32, i32, i32) {
    %c0_i32 = arith.constant 0 : i32
    %c0_i32_0 = arith.constant 0 : i32
    %c0_i32_1 = arith.constant 0 : i32
    return %arg0, %c0_i32, %c0_i32_0 : i32, i32, i32
  }
}

</mosaic_0001>

<bundles_post_ra>
// kernel: tpu_custom_call.1
= control target key start
LH: loop header
LB: loop body
LE: loop exit
PB: predicated region body
PF: predicated region fallthrough
CT: control target
= control target key end

     0   :  { %s6812_s0 = inlined_call_operand.vmem [shape: f32[2,4,256], index: 0, kind: input, shape index: {}]   ;;  %s6813_s1 = inlined_call_operand.vmem [shape: f32[2,32,1], index: 1, kind: input, shape index: {}]   ;;  %s6814_s2 = inlined_call_operand.vmem [shape: f32[9,256], index: 2, kind: input, shape index: {}]   ;;  %s6815_s3 = inlined_call_operand.vmem [shape: f32[32,36], index: 3, kind: input, shape index: {}]   ;;  %s6816_s4 = inlined_call_operand.vmem [shape: f32[32,1], index: 4, kind: input, shape index: {}]   ;;  %s6817_s5 = inlined_call_operand.vmem [shape: f32[32,1], index: 5, kind: input, shape index: {}]   ;;  %s6818_s6 = inlined_call_operand.vmem [shape: f32[32,1], index: 6, kind: input, shape index: {}]   ;;  %s6819_s7 = inlined_call_operand.vmem [shape: f32[64,32], index: 7, kind: input, shape index: {}]   ;;  %s6820_s8 = inlined_call_operand.vmem [shape: f32[64,1], index: 8, kind: input, shape index: {}]   ;;  %s6821_s9 = inlined_call_operand.vmem [shape: f32[32,288], index: 9, kind: input, shape index: {}]   ;;  %s6822_s10 = inlined_call_operand.vmem [shape: f32[32,1], index: 10, kind: input, shape index: {}]   ;;  %s6823_s11 = inlined_call_operand.vmem [shape: f32[32,1], index: 11, kind: input, shape index: {}]   ;;  %s6824_s12 = inlined_call_operand.vmem [shape: f32[32,1], index: 12, kind: input, shape index: {}]   ;;  %s6825_s13 = inlined_call_operand.vmem [shape: f32[32,4], index: 13, kind: input, shape index: {}]   ;;  %s6826_s14 = inlined_call_operand.vmem [shape: f32[32,1], index: 14, kind: input, shape index: {}]   ;;  %s6827_s15 = inlined_call_operand.vmem [shape: f32[8,32], index: 15, kind: input, shape index: {}]   ;;  %s6828_s16 = inlined_call_operand.vmem [shape: f32[32,8], index: 16, kind: input, shape index: {}]   ;;  %s6829_s17 = inlined_call_operand.hbm [shape: f32[2,32,256], index: 17, kind: output, shape index: {}]  }
   0x1   :  { %6900 = sst [smem:[#allocation19_spill]] %s6812_s0 }
   0x2   :  { %6901 = sst [smem:[#allocation20_spill]] %s6813_s1 }
   0x3   :  { %6902 = sst [smem:[#allocation21_spill]] %s6815_s3 }
   0x4   :  { %6903 = sst [smem:[#allocation22_spill]] %s6816_s4 }
   0x5   :  { %22 = vsyncpa [#allocation5], 0 }
   0x6   :  { %24 = vsyncpa [#allocation5 + $0x1], 0  ;;  %s4472_s24 = smov 0   ;;  %s4474_s25 = smov 0  }
   0x7   :  { %s4476_s26 = smov 0   ;;  %s4478_s27 = smov 0  }
   0x8 LB: > { %6904 = sst [smem:[#allocation7_spill]] %s4360_s26  ;;  %s4493_s28 = sadd.s32 4294967295, %s4364_s27   ;;  %s4364_s27 = sphi %s4478_s27, %s7042_s27   ;;  %s4360_s26 = sphi %s4476_s26, %s7044_s26   ;;  %s4356_s25 = sphi %s4474_s25, %s7046_s25   ;;  %s4352_s24 = sphi %s4472_s24, %s7045_s24  }
   0x9   : > { %s3494_s29 = sadd.s32 4294967294, %s4364_s27   ;;  %s4497_s0 = sadd.s32 1, %s4364_s27  }
   0xa   : > { %6905 = sst [smem:[#allocation8_spill]] %s4497_s0  ;;  %s404_s30 = sadd.s32 1, %s4360_s26 }
   0xb   : > { %s401_s18 = ssub.s32 %s4364_s27, %s4497_s0  ;;  %p414_p0 = scmp.ne.s32.totalorder %s4360_s26, %s4356_s25 }
   0xc   : > { %p402_p1 = scmp.eq.s32.totalorder %s401_s18, 0  ;;  %p415_p2 = scmp.eq.s32.totalorder %s4493_s28, 1 }
   0xd   : > { %p420_p3 = scmp.ne.s32.totalorder %s4356_s25, %s4352_s24  ;;  %p421_p4 = scmp.eq.s32.totalorder %s3494_s29, 1 }
   0xe   : > { %s4508_s19 = scalar_select %p402_p1, %s4360_s26, %s404_s30  }
   0xf   : > { %p4510_p5 = por %p415_p2, %p414_p0  ;;  %p4514_p6 = por %p421_p4, %p420_p3 }
  0x10   : > { %6906 = sst [smem:[#allocation9_spill]] %s4508_s19  ;;  %p3497_p7 = scmp.ge.s32.totalorder %s4364_s27, 1 }
  0x11   : > { %s6908_s20 = scalar_select %p4514_p6, 1, 0 }
  0x12   : > { %p500_p8 = scmp.lt.s32.totalorder %s4364_s27, 3 }
  0x13   : > { %6909 = sst [smem:[#allocation10_spill]] %s6908_s20 }
  0x14   : > { %p501_p9 = pnand %p3497_p7, %p500_p8 }
  0x16   : > { %504 = sbr.rel (%p501_p9) target bundleno = 2407 (0x967), region = 88 }
  0x1b   : > { %v4523_v0 = vld [vmem:[%s6814_s2] sm:$0xff]  ;;  %v4528_v1 = vld [vmem:[%s6814_s2 + $0x8] sm:$0xff]  ;;  %vm6864_vm0 = vcmask 1043456   ;;  %s6838_s30 = smov 111   ;;  %v4367_v14 = vmov 0.0   ;;  %s6830_s18 = smov 113  }
  0x1c   : > { %v748_v2 = vperm.slane %v4523_v0, 0  ;;  %v749_v3 = vperm.slane %v4528_v1, 0  ;;  %v779_v4 = vperm.slane %v4523_v0, 2  ;;  %v780_v5 = vperm.slane %v4528_v1, 2  ;;  %743 = vst [vmem:[#allocation2] sm:$0xf] %v4367_v14 }
  0x1d   : > { %v765_v7 = vperm.slane %v4528_v1, 1  ;;  %v795_v9 = vperm.slane %v4528_v1, 3  ;;  %v820_v12 = vperm.slane %v4523_v0, 5  ;;  %v821_v13 = vperm.slane %v4528_v1, 5  ;;  %744 = vst [vmem:[#allocation2 + $0xc] sm:$0xf] %v4367_v14 }
  0x1e   : > { %v752_v6 = vrot.slane %v749_v3, 4  ;;  %v783_v8 = vrot.slane %v780_v5, 4  ;;  %v764_v15 = vperm.slane %v4523_v0, 1  ;;  %v794_v17 = vperm.slane %v4523_v0, 3  ;;  %s6832_s21 = smov 1   ;;  %s6836_s29 = smov 112  }
  0x1f   : > { %v768_v16 = vrot.slane %v765_v7, 4  ;;  %v798_v18 = vrot.slane %v795_v9, 4  ;;  %v824_v19 = vrot.slane %v821_v13, 4  ;;  %v836_v20 = vperm.slane %v4528_v1, 6  ;;  %v4211_v25 = vld [vmem:[%s6814_s2 + $0x18] ss:$0 sm:$0xff] }
  0x20   : > { %v754_v10 = vsel %vm6864_vm0, %v748_v2, %v752_v6  ;;  %v784_v11 = vsel %vm6864_vm0, %v779_v4, %v783_v8  ;;  %v851_v23 = vperm.slane %v4528_v1, 7  ;;  %v835_v26 = vperm.slane %v4523_v0, 6  ;;  %v4584_v30 = vld [vmem:[%s6814_s2 + $0x10] ss:$0 sm:$0xff]  ;;  %s6865_s22 = smov 17   ;;  %p557_p10 = scmp.lt.s32.totalorder %s4493_s28, 1 }
  0x21   : > { %755 = vrot.lane.b32.xlu0 %v754_v10, %s6838_s30  ;;  %785 = vrot.lane.b32.xlu1 %v784_v11, %s6830_s18  ;;  %v825_v21 = vsel %vm6864_vm0, %v820_v12, %v824_v19  ;;  %v769_v22 = vsel %vm6864_vm0, %v764_v15, %v768_v16  ;;  %v799_v24 = vsel %vm6864_vm0, %v794_v17, %v798_v18  ;;  %v839_v27 = vrot.slane %v836_v20, 4  ;;  %s6834_s18 = smov 127   ;;  %s6910_s26 = sld [smem:[#allocation19_spill]] }
  0x22   : > { %826 = vrot.lane.b32.xlu2 %v825_v21, %s6832_s21  ;;  %v850_v28 = vperm.slane %v4523_v0, 7  ;;  %v854_v29 = vrot.slane %v851_v23, 4  ;;  %v869_v31 = vrot.slane %v4211_v25, 4  ;;  %s6855_s21 = smov 15   ;;  %vm758_vm1 = vcmask 908288   ;;  %s6845_s19 = smov 96  }
  0x23   : > { %v840_v32 = vsel %vm6864_vm0, %v835_v26, %v839_v27  ;;  %s4599_s23 = scalar_select %p557_p10, %s4493_s28, 1  ;;  %vm773_vm2 = vcmask 916480   ;;  %vm788_vm3 = vcmask 924672   ;;  %vm803_vm4 = vcmask 1039360  }
  0x24   : > { %v855_v33 = vsel %vm6864_vm0, %v850_v28, %v854_v29  ;;  %v870_v34 = vsel %vm6864_vm0, %v4584_v30, %v869_v31  ;;  %v4624_v61 = vperm.slane %v4528_v1, 4  ;;  %v4628_v6 = vperm.slane %v4523_v0, 4  ;;  %s6853_s30 = smov 95   ;;  %s6916_s4 = sld [smem:[#allocation22_spill]]  ;;  %v4296_v1 = vld [vmem:[%s6814_s2 + $0x18] ss:$0 sm:$0xff] }
  0x25   : > { %vm6863_vm5 = vcmask 7168   ;;  %vm844_vm6 = vcmask 121856   ;;  %vm859_vm7 = vcmask 130048   ;;  %vm874_vm8 = vcmask 138240   ;;  %s6919_s3 = sld [smem:[#allocation21_spill]] }
  0x26   : > { %6911 = vst [vmem:[#allocation11_spill] sm:$0xff] %v4624_v61  ;;  %v814_v8 = vrot.slane %v4624_v61, 4  ;;  %vm6858_vm9 = vcmask 900096   ;;  %vm6861_vm10 = vcmask 769024   ;;  %vm6859_vm11 = vcmask 785408  }
  0x27   : > { %vm6862_vm12 = vcmask 777216   ;;  %vm6860_vm13 = vcmask 1031168   ;;  %vm1142_vm14 = vcmask 293888  }
  0x28   : > { %v815_v19 = vsel %vm6864_vm0, %v4628_v6, %v814_v8 }
  0x29   : > { %770 = vrot.lane.b32.xlu0 %v769_v22, %s6836_s29  ;;  %800 = vrot.lane.b32.xlu1 %v799_v24, %s6834_s18  ;;  %s6847_s18 = smov 16   ;;  %s3584_s29 = sshll.u32 %s4599_s23, 3  ;;  %v819_v22 = vld [vmem:[#allocation2 + $0xc] sm:$0xf] }
  0x2a   : > { %841 = vrot.lane.b32.xlu2 %v840_v32, %s6855_s21  ;;  %s561_s0 = scalar_lea.vmem %s6910_s26, %s3584_s29  ;;  %s6843_s26 = smov 110  }
  0x2b   : > { %v4605_v35 = vld [vmem:[%s561_s0] sm:$0xff]  ;;  %s6912_s0 = smov 111   ;;  %s6849_s29 = smov 94  }
  0x2c   : > { %745 = vst [vmem:[#allocation2 + $0x4] sm:$0xff] %v4605_v35  ;;  %v817_v24 = vmul.f32 %v815_v19, %v4605_v35  ;;  %s6915_s21 = sld [smem:[#allocation20_spill]] }
  0x31   : > { %856 = vrot.lane.b32.xlu0 %v855_v33, %s6847_s18  ;;  %871 = vrot.lane.b32.xlu1 %v870_v34, %s6865_s22  ;;  %s6914_s18 = smov 127  }
  0x33   : > { %v747_v37 = vld [vmem:[#allocation2 + $0x8] sm:$0xf]  ;;  %v746_v38 = vld [vmem:[#allocation2] sm:$0xff] }
  0x7c   : > { %v827_v63 = vpop.permute.xlu2 %826 }
  0x7d   : > { %v828_v21 = vrot.slane %v827_v63, 4 }
  0x7f   : > { %v834_v25 = vmul.f32 %v828_v21, %v819_v22  ;;  %v830_v34 = vsel %vm6863_vm5, %v828_v21, %v827_v63 }
  0x84   : > { %v842_v27 = vpop.permute.xlu2 %841 }
  0x85   : > { %v843_v33 = vrot.slane %v842_v27, 4 }
  0x93   : > { %v756_v36 = vpop.permute.xlu0 %755  ;;  %v786_v43 = vpop.permute.xlu1 %785 }
  0x94   : > { %v757_v39 = vrot.slane %v756_v36, 4  ;;  %v787_v50 = vrot.slane %v786_v43, 4 }
  0x96   : > { %v759_v40 = vsel %vm758_vm1, %v757_v39, %v756_v36  ;;  %v763_v41 = vmul.f32 %v757_v39, %v747_v37  ;;  %v789_v53 = vsel %vm788_vm3, %v787_v50, %v786_v43  ;;  %v793_v55 = vmul.f32 %v787_v50, %v747_v37 }
  0x97   : > { %v762_v42 = vmul.f32 %v759_v40, %v746_v38  ;;  %v792_v56 = vmul.f32 %v789_v53, %v746_v38  ;;  %v849_v36 = vmul.f32 %v843_v33, %v819_v22 }
  0x98   : > { %884 = vst [vmem:[#allocation1 + $0x10] ss:$2 sm:$0xff] %v763_v41 }
  0x99   : > { %882 = vst [vmem:[#allocation1] ss:$2 sm:$0xff] %v762_v42 }
  0x9b   : > { %v771_v44 = vpop.permute.xlu0 %770  ;;  %v801_v54 = vpop.permute.xlu1 %800 }
  0x9c   : > { %v772_v45 = vrot.slane %v771_v44, 4  ;;  %v802_v57 = vrot.slane %v801_v54, 4 }
  0x9e   : > { %v774_v46 = vsel %vm773_vm2, %v772_v45, %v771_v44  ;;  %v778_v47 = vmul.f32 %v772_v45, %v747_v37  ;;  %v804_v62 = vsel %vm803_vm4, %v802_v57, %v801_v54  ;;  %v808_v10 = vmul.f32 %v802_v57, %v747_v37 }
  0x9f   : > { %v777_v48 = vmul.f32 %v774_v46, %v746_v38  ;;  %v4610_v49 = vld.sshfl [vmem:[#allocation1 + $0x10] sm:$0xff pattern:$0x75316420]  ;;  %v807_v11 = vmul.f32 %v804_v62, %v746_v38  ;;  %v833_v37 = vmul.f32 %v830_v34, %v4605_v35  ;;  %v845_v44 = vsel %vm844_vm6, %v843_v33, %v842_v27 }
  0xa0   : > { %v4612_v51 = vld.sshfl [vmem:[#allocation1] sm:$0xff pattern:$0x75316420]  ;;  %v4614_v52 = vld.sshfl [vmem:[#allocation1 + $0x8] sm:$0xff pattern:$0x75316420]  ;;  %v848_v46 = vmul.f32 %v845_v44, %v4605_v35 }
  0xa1   : > { %894 = vst [vmem:[#allocation1 + $0x1] ss:$2 sm:$0xff] %v777_v48 }
  0xa2   : > { %896 = vst [vmem:[#allocation1 + $0x11] ss:$2 sm:$0xff] %v778_v47 }
  0xa3   : > { %v857_v38 = vpop.permute.xlu0 %856  ;;  %v872_v47 = vpop.permute.xlu1 %871 }
  0xa4   : > { %v858_v43 = vrot.slane %v857_v38, 4 }
  0xa6   : > { %v864_v45 = vmul.f32 %v858_v43, %v819_v22 }
  0xa8   : > { %v4617_v58 = vld.sshfl [vmem:[#allocation1] sm:$0xff pattern:$0x75316420]  ;;  %v4619_v59 = vld.sshfl [vmem:[#allocation1 + $0x8] sm:$0xff pattern:$0x75316420] }
  0xa9   : > { %v4621_v60 = vld.sshfl [vmem:[#allocation1 + $0x10] sm:$0xff pattern:$0x75316420]  ;;  %913 = vst [vmem:[#allocation1] ss:$2 sm:$0xff] %v792_v56  ;;  %v860_v56 = vsel %vm859_vm7, %v858_v43, %v857_v38 }
  0xaa   : > { %915 = vst [vmem:[#allocation1 + $0x10] ss:$2 sm:$0xff] %v793_v55  ;;  %v873_v55 = vrot.slane %v872_v47, 4  ;;  %v863_v62 = vmul.f32 %v860_v56, %v4605_v35  ;;  %v3672_v38 = vpack.i.bf16 %v4621_v60, %v4619_v59 }
  0xac   : > { %v879_v57 = vmul.f32 %v873_v55, %v819_v22 }
  0xb0   : > { %v4631_v14 = vld.sshfl [vmem:[#allocation1] sm:$0xff pattern:$0x75316420]  ;;  %v4633_v16 = vld.sshfl [vmem:[#allocation1 + $0x8] sm:$0xff pattern:$0x75316420] }
  0xb1   : > { %v4635_v18 = vld.sshfl [vmem:[#allocation1 + $0x10] sm:$0xff pattern:$0x75316420]  ;;  %934 = vst [vmem:[#allocation1 + $0x1] ss:$2 sm:$0xff] %v807_v11  ;;  %v875_v11 = vsel %vm874_vm8, %v873_v55, %v872_v47 }
  0xb2   : > { %936 = vst [vmem:[#allocation1 + $0x11] ss:$2 sm:$0xff] %v808_v10  ;;  %v878_v19 = vmul.f32 %v875_v11, %v4605_v35 }
  0xb8   : > { %v4640_v29 = vld.sshfl [vmem:[#allocation1] sm:$0xff pattern:$0x75316420]  ;;  %v4642_v31 = vld.sshfl [vmem:[#allocation1 + $0x8] sm:$0xff pattern:$0x75316420] }
  0xb9   : > { %952 = vst [vmem:[#allocation1] ss:$2 sm:$0xff] %v817_v24  ;;  %v4644_v32 = vld.sshfl [vmem:[#allocation1 + $0x10] sm:$0xff pattern:$0x75316420] }
  0xba   : > { %968 = vst [vmem:[#allocation1 + $0x11] ss:$2 sm:$0xff] %v834_v25 }
  0xc0   : > { %v953_v39 = vld.sshfl [vmem:[#allocation1] sm:$0xff pattern:$0x75316420]  ;;  %v954_v40 = vld.sshfl [vmem:[#allocation1 + $0x8] sm:$0xff pattern:$0x75316420] }
  0xc1   : > { %v971_v41 = vld.sshfl [vmem:[#allocation1 + $0x10] sm:$0xff pattern:$0x75316420]  ;;  %v3642_v42 = vpack.i.bf16 %v954_v40, %v953_v39  ;;  %966 = vst [vmem:[#allocation1 + $0x1] ss:$2 sm:$0xff] %v833_v37  ;;  %v3667_v37 = vpack.i.bf16 %v4644_v32, %v4642_v31 }
  0xc2   : > { %976 = vrot.lane.b32.xlu2 %v971_v41, %s6843_s26  ;;  %988 = vst [vmem:[#allocation1 + $0x10] ss:$2 sm:$0xff] %v849_v36  ;;  %v3662_v36 = vpack.i.bf16 %v4635_v18, %v4633_v16 }
  0xc3   : > { %3643 = vrot.lane.b32.xlu0 %v3642_v42, %s6912_s0 }
  0xc8   : > { %v969_v48 = vld.sshfl [vmem:[#allocation1] sm:$0xff pattern:$0x75316420]  ;;  %v970_v50 = vld.sshfl [vmem:[#allocation1 + $0x8] sm:$0xff pattern:$0x75316420] }
  0xc9   : > { %v991_v53 = vld.sshfl [vmem:[#allocation1 + $0x10] sm:$0xff pattern:$0x75316420]  ;;  %v3647_v54 = vpack.i.bf16 %v970_v50, %v969_v48  ;;  %986 = vst [vmem:[#allocation1] ss:$2 sm:$0xff] %v848_v46 }
  0xca   : > { %1009 = vst [vmem:[#allocation1 + $0x11] ss:$2 sm:$0xff] %v864_v45 }
  0xcb   : > { %996 = vrot.lane.b32.xlu0 %v991_v53, %s6845_s19  ;;  %3648 = vrot.lane.b32.xlu1 %v3647_v54, %s6843_s26  ;;  %s6851_s26 = smov 126  }
  0xd0   : > { %v989_v63 = vld.sshfl [vmem:[#allocation1] sm:$0xff pattern:$0x75316420]  ;;  %v990_v8 = vld.sshfl [vmem:[#allocation1 + $0x8] sm:$0xff pattern:$0x75316420] }
  0xd1   : > { %v1012_v10 = vld.sshfl [vmem:[#allocation1 + $0x10] sm:$0xff pattern:$0x75316420]  ;;  %1007 = vst [vmem:[#allocation1 + $0x1] ss:$2 sm:$0xff] %v863_v62  ;;  %v3652_v21 = vpack.i.bf16 %v990_v8, %v989_v63 }
  0xd2   : > { %1017 = vrot.lane.b32.xlu2 %v1012_v10, %s6853_s30  ;;  %1029 = vst [vmem:[#allocation1 + $0x10] ss:$2 sm:$0xff] %v879_v57 }
  0xd8   : > { %v1010_v24 = vld.sshfl [vmem:[#allocation1] sm:$0xff pattern:$0x75316420]  ;;  %v1011_v25 = vld.sshfl [vmem:[#allocation1 + $0x8] sm:$0xff pattern:$0x75316420] }
  0xd9   : > { %v1032_v27 = vld.sshfl [vmem:[#allocation1 + $0x10] sm:$0xff pattern:$0x75316420]  ;;  %1027 = vst [vmem:[#allocation1] ss:$2 sm:$0xff] %v878_v19  ;;  %v3657_v22 = vpack.i.bf16 %v1011_v25, %v1010_v24 }
  0xda   : > { %1037 = vrot.lane.b32.xlu1 %v1032_v27, %s6849_s29  ;;  %3653 = vrot.lane.b32.xlu2 %v3652_v21, %s6845_s19  ;;  %s6913_s19 = smov 112  }
  0xe0   : > { %v1031_v33 = vld.sshfl [vmem:[#allocation1 + $0x8] sm:$0xff pattern:$0x75316420]  ;;  %v1030_v34 = vld.sshfl [vmem:[#allocation1] sm:$0xff pattern:$0x75316420] }
  0xe1   : > { %1035 = vrot.lane.b32.xlu0 %v1031_v33, %s6849_s29  ;;  %3310 = vst [vmem:[#allocation1] ss:$2 sm:$0xff] %v4605_v35 }
  0xe2   : > { %3658 = vrot.lane.b32.xlu1 %v3657_v22, %s6853_s30  ;;  %1033 = vrot.lane.b32.xlu2 %v1030_v34, %s6849_s29  ;;  %s3585_s29 = sshll.u32 %s4599_s23, 5  ;;  %s6924_s30 = smov 1  }
  0xe3   : > { %s566_s20 = scalar_lea.vmem %s6915_s21, %s3585_s29  ;;  %s6925_s29 = smov 16  }
  0xe4   : > { %s6938_s21 = smov 126   ;;  %s6951_s23 = smov 94  }
  0xe9   : > { %3663 = vrot.lane.b32.xlu0 %v3662_v36, %s6851_s26 }
  0xea   : > { %3668 = vrot.lane.b32.xlu1 %v3667_v37, %s6913_s19  ;;  %3673 = vrot.lane.b32.xlu2 %v3672_v38, %s6914_s18 }
  0xf1   : > { %919 = vrot.lane.b32.xlu0 %v4631_v14, %s6851_s26  ;;  %s6922_s26 = smov 113  }
  0xf2   : > { %940 = vrot.lane.b32.xlu1 %v4640_v29, %s6913_s19  ;;  %900 = vrot.lane.b32.xlu2 %v4617_v58, %s6914_s18 }
 0x11c   : > { %v977_v35 = vpop.permute.xlu2 %976 }
 0x12c   : > { %v1018_v16 = vpop.permute.xlu2 %1017 }
 0x134   : > { %v4682_v59 = vpop.permute.xlu2 %3653 }
 0x135   : > { %v4680_v18 = vpop.permute.xlu0 %3643  ;;  %v3656_v53 = vunpack.i.h.bf16 %v4682_v59  ;;  %v3655_v54 = vunpack.i.l.bf16 %v4682_v59 }
 0x136   : > { %v3646_v60 = vunpack.i.h.bf16 %v4680_v18  ;;  %v3645_v31 = vunpack.i.l.bf16 %v4680_v18 }
 0x137   : > { %v999_v11 = vsel %vm6859_vm11, %v3655_v54, %v3656_v53 }
 0x138   : > { %v959_v58 = vsel %vm758_vm1, %v3645_v31, %v3646_v60 }
 0x13c   : > { %v1034_v44 = vpop.permute.xlu2 %1033 }
 0x13d   : > { %v4686_v32 = vpop.permute.xlu1 %3648  ;;  %v997_v45 = vpop.permute.xlu0 %996 }
 0x13e   : > { %v3651_v14 = vunpack.i.h.bf16 %v4686_v32  ;;  %v3650_v29 = vunpack.i.l.bf16 %v4686_v32  ;;  %v1000_v10 = vsel %vm6859_vm11, %v3656_v53, %v997_v45 }
 0x140   : > { %v979_v39 = vsel %vm6858_vm9, %v3650_v29, %v3651_v14  ;;  %v980_v40 = vsel %vm6858_vm9, %v3651_v14, %v977_v35 }
 0x141   : > { %v1049_v41 = vsel %vm6864_vm0, %v959_v58, %v979_v39  ;;  %v1050_v42 = vsel %vm6864_vm0, %v3646_v60, %v980_v40 }
 0x142   : > { %v3682_v43 = vpack.i.bf16 %v1050_v42, %v1049_v41 }
 0x144   : > { %3683 = vrot.lane.b32.xlu0 %v3682_v43, %s6865_s22  ;;  %v3674_v47 = vpop.permute.xlu2 %3673 }
 0x145   : > { %v3676_v48 = vunpack.i.h.bf16 %v3674_v47  ;;  %v3675_v50 = vunpack.i.l.bf16 %v3674_v47 }
 0x147   : > { %v907_v8 = vsel %vm803_vm4, %v3675_v50, %v3676_v48  ;;  %v1044_v22 = vsel %vm6864_vm0, %v4610_v49, %v3676_v48 }
 0x148   : > { %v1043_v27 = vsel %vm6864_vm0, %v4614_v52, %v907_v8 }
 0x149   : > { %v3692_v36 = vpack.i.bf16 %v1044_v22, %v1043_v27  ;;  %v4380_v27 = vmov 0  }
 0x14a   : > { %3708 = vset.pattern.permute.xlu1 %v4380_v27  ;;  %3707 = vset.pattern.permute.xlu0 %v4380_v27 }
 0x14b   : > { %3709 = vset.pattern.permute.xlu2 %v4380_v27 }
 0x14c   : > { %v1038_v46 = vpop.permute.xlu1 %1037  ;;  %v901_v49 = vpop.permute.xlu2 %900 }
 0x14d   : > { %v906_v40 = vsel %vm803_vm4, %v901_v49, %v3675_v50  ;;  %v1048_v50 = vsel %vm6864_vm0, %v3645_v31, %v3650_v29  ;;  %v4751_v29 = vld [vmem:[%s566_s20 + $0x10] sm:$0xff] }
 0x14e   : > { %v1042_v47 = vsel %vm6864_vm0, %v4612_v51, %v906_v40 }
 0x153   : > { %v1036_v55 = vpop.permute.xlu0 %1035 }
 0x154   : > { %v3659_v56 = vpop.permute.xlu1 %3658  ;;  %v1040_v57 = vsel %vm6861_vm10, %v1034_v44, %v1036_v55 }
 0x155   : > { %v3661_v62 = vunpack.i.h.bf16 %v3659_v56  ;;  %v3660_v63 = vunpack.i.l.bf16 %v3659_v56  ;;  %1120 = vrot.lane.b32.xlu0 %v1040_v57, %s6865_s22  ;;  %v1041_v56 = vsel %vm6861_vm10, %v1036_v55, %v1038_v46  ;;  %v4747_v46 = vld [vmem:[%s566_s20 + $0x18] sm:$0xff]  ;;  %v3505_v55 = vmul.f32 -1.442695, %v4751_v29 }
 0x156   : > { %v3506_v18 = vmul.f32 -1.442695, %v4747_v46 }
 0x157   : > { %v1020_v19 = vsel %vm6862_vm12, %v3660_v63, %v3661_v62  ;;  %v1021_v21 = vsel %vm6862_vm12, %v3661_v62, %v1018_v16 }
 0x158   : > { %v1052_v24 = vsel %vm6864_vm0, %v999_v11, %v1020_v19  ;;  %v1053_v25 = vsel %vm6864_vm0, %v1000_v10, %v1021_v21  ;;  %4212 = vpow2.f32 %v3506_v18  ;;  %v4758_v10 = vld [vmem:[%s566_s20] sm:$0xff]  ;;  %v1060_v21 = vld [vmem:[%s6916_s4 + $0x10] sm:$0xff] }
 0x159   : > { %v3687_v33 = vpack.i.bf16 %v1053_v25, %v1052_v24  ;;  %4214 = vpow2.f32 %v3505_v55  ;;  %v3503_v11 = vmul.f32 -1.442695, %v4758_v10 }
 0x15b   : > { %3688 = vrot.lane.b32.xlu2 %v3687_v33, %s6865_s22  ;;  %v3664_v34 = vpop.permute.xlu0 %3663 }
 0x15c   : > { %v3669_v37 = vpop.permute.xlu1 %3668  ;;  %v3666_v38 = vunpack.i.h.bf16 %v3664_v34  ;;  %v3665_v35 = vunpack.i.l.bf16 %v3664_v34 }
 0x15d   : > { %v3671_v16 = vunpack.i.h.bf16 %v3669_v37  ;;  %v3670_v59 = vunpack.i.l.bf16 %v3669_v37  ;;  %3693 = vrot.lane.b32.xlu0 %v3692_v36, %s6865_s22 }
 0x15e   : > { %v927_v60 = vsel %vm6860_vm13, %v3665_v35, %v3666_v38  ;;  %v4213_v19 = vpop.eup %4212 }
 0x15f   : > { %v947_v52 = vsel %vm773_vm2, %v3670_v59, %v3671_v16  ;;  %v1047_v14 = vsel %vm6864_vm0, %v3666_v38, %v3671_v16  ;;  %v595_v24 = vadd.f32 1.0, %v4213_v19  ;;  %v4215_v25 = vpop.eup %4214 }
 0x160   : > { %v1046_v58 = vsel %vm6864_vm0, %v927_v60, %v947_v52  ;;  %v594_v22 = vadd.f32 1.0, %v4215_v25 }
 0x161   : > { %v3677_v39 = vpack.i.bf16 %v1047_v14, %v1046_v58  ;;  %v1058_v14 = vld [vmem:[%s6916_s4] sm:$0xff]  ;;  %v652_v55 = vand.u32 2147483648, %v595_v24  ;;  %vm646_vm15 = vweird.f32 %v595_v24  ;;  %v650_v19 = vand.u32 2147483647, %v595_v24 }
 0x163   : > { %1118 = vrot.lane.b32.xlu2 %v1034_v44, %s6865_s22  ;;  %3678 = vrot.lane.b32.xlu1 %v3677_v39, %s6865_s22  ;;  %v920_v41 = vpop.permute.xlu0 %919  ;;  %v1051_v44 = vsel %vm6864_vm0, %v3655_v54, %v3660_v63  ;;  %v4755_v63 = vld [vmem:[%s566_s20 + $0x8] sm:$0xff]  ;;  %vm651_vm12 = vcmp.eq.f32.partialorder %v650_v19, 8.507059e+37 }
 0x164   : > { %v941_v42 = vpop.permute.xlu1 %940  ;;  %v926_v43 = vsel %vm6860_vm13, %v920_v41, %v3665_v35  ;;  %v3697_v57 = vpack.i.bf16 %v1048_v50, %v1051_v44  ;;  %v3504_v8 = vmul.f32 -1.442695, %v4755_v63  ;;  %vm631_vm13 = vweird.f32 %v594_v22 }
 0x165   : > { %v946_v45 = vsel %vm773_vm2, %v941_v42, %v3670_v59 }
 0x166   : > { %v1045_v48 = vsel %vm6864_vm0, %v926_v43, %v946_v45  ;;  %4216 = vpow2.f32 %v3504_v8 }
 0x167   : > { %v3702_v53 = vpack.i.bf16 %v1042_v47, %v1045_v48  ;;  %4218 = vpow2.f32 %v3503_v11 }
 0x168   : > { %4220 = vrcp.f32 %v595_v24 }
 0x169   : > { %4222 = vrcp.f32 %v594_v22 }
 0x16b   : > { %3703 = vrot.lane.b32.xlu2 %v3702_v53, %s6865_s22  ;;  %1122 = vrot.lane.b32.xlu1 %v1041_v56, %s6865_s22 }
 0x16c   : > { %v4217_v33 = vpop.eup %4216 }
 0x16d   : > { %v4764_v34 = vadd.f32 1.0, %v4217_v33  ;;  %v4219_v36 = vpop.eup %4218  ;;  %v635_v33 = vand.u32 2147483647, %v594_v22 }
 0x16e   : > { %v4221_v16 = vpop.eup %4220  ;;  %v4778_v49 = vadd.f32 1.0, %v4219_v36  ;;  %v637_v36 = vand.u32 2147483648, %v594_v22 }
 0x16f   : > { %4224 = vrcp.f32 %v4764_v34  ;;  %v642_v40 = vmul.f32 %v4221_v16, %v595_v24  ;;  %v4223_v41 = vpop.eup %4222  ;;  %vm647_vm9 = vweird.f32 %v4221_v16 }
 0x170   : > { %v627_v47 = vmul.f32 %v4223_v41, %v594_v22  ;;  %4226 = vrcp.f32 %v4778_v49  ;;  %vm648_vm11 = vmor %vm646_vm15, %vm647_vm9  ;;  %vm632_vm10 = vweird.f32 %v4223_v41  ;;  %vm636_vm9 = vcmp.eq.f32.partialorder %v635_v33, 8.507059e+37 }
 0x171   : > { %v643_v45 = vsub.f32 1.0, %v642_v40  ;;  %vm4803_vm5 = vmor %vm631_vm13, %vm632_vm10  ;;  %v638_v40 = vor.u32 1.1754944e-38, %v637_v36  ;;  %v620_v22 = vand.u32 2147483647, %v4764_v34  ;;  %v607_v19 = vand.u32 2147483648, %v4778_v49 }
 0x173   : > { %3698 = vrot.lane.b32.xlu1 %v3697_v57, %s6865_s22  ;;  %v644_v57 = vmul.f32 %v4221_v16, %v643_v45  ;;  %v622_v45 = vand.u32 2147483648, %v4764_v34  ;;  %vm621_vm13 = vcmp.eq.f32.partialorder %v620_v22, 8.507059e+37  ;;  %v608_v27 = vor.u32 1.1754944e-38, %v607_v19  ;;  %s6930_s22 = smov 110  }
 0x175   : > { %v4784_v48 = vpop.eup %4224  ;;  %v645_v11 = vadd.f32 %v4221_v16, %v644_v57 }
 0x176   : > { %v612_v8 = vmul.f32 %v4784_v48, %v4764_v34 }
 0x17b   : > { %1074 = vperm.xlu1 %3708, %v1060_v21   ;;  %v653_v21 = vor.u32 1.1754944e-38, %v652_v55  ;;  %v623_v55 = vor.u32 1.1754944e-38, %v622_v45 }
 0x183   : > { %1064 = vperm.xlu1 %3708, %v1058_v14  }
 0x1b5   : > { %v4739_v51 = vpop.permute.xlu2 %3688 }
 0x1b6   : > { %v4741_v62 = vpop.permute.xlu0 %3683  ;;  %v3691_v35 = vunpack.i.h.bf16 %v4739_v51  ;;  %v3690_v59 = vunpack.i.l.bf16 %v4739_v51  ;;  %v1059_v51 = vld [vmem:[%s6916_s4 + $0x8] sm:$0xff] }
 0x1b7   : > { %v3686_v60 = vunpack.i.h.bf16 %v4741_v62  ;;  %v3685_v52 = vunpack.i.l.bf16 %v4741_v62  ;;  %1069 = vperm.xlu2 %3709, %v1059_v51   ;;  %v1055_v62 = vld [vmem:[%s6919_s3 + $0x8] sm:$0xff] }
 0x1b8   : > { %v1131_v53 = vsel %vm874_vm8, %v3690_v59, %v3691_v35  ;;  %v4227_v35 = vpop.eup %4226 }
 0x1b9   : > { %v1129_v56 = vsel %vm874_vm8, %v3685_v52, %v3686_v60 }
 0x1bd   : > { %v1119_v54 = vpop.permute.xlu2 %1118 }
 0x1c7   : > { %v1121_v32 = vpop.permute.xlu0 %1120 }
 0x1c8   : > { %v1132_v31 = vsel %vm874_vm8, %v1119_v54, %v1121_v32  ;;  %v628_v54 = vsub.f32 1.0, %v627_v47 }
 0x1c9   : > { %3515 = vmatpush.msk.msra.mxu1 %vm6864_vm0, %v1132_v31 }
 0x1ca   : > { %v629_v25 = vmul.f32 %v4223_v41, %v628_v54 }
 0x1cc   : > { %v630_v14 = vadd.f32 %v4223_v41, %v629_v25 }
 0x1cf   : > { %v4768_v38 = vpop.permute.xlu0 %3693 }
 0x1d0   : > { %v3696_v58 = vunpack.i.h.bf16 %v4768_v38  ;;  %v3695_v39 = vunpack.i.l.bf16 %v4768_v38  ;;  %v1056_v38 = vld [vmem:[%s6919_s3 + $0x10] sm:$0xff] }
 0x1d2   : > { %v1125_v50 = vsel %vm874_vm8, %v3695_v39, %v3696_v58  ;;  %v613_v58 = vsub.f32 1.0, %v612_v8  ;;  %v605_v8 = vand.u32 2147483647, %v4778_v49 }
 0x1d4   : > { %vm606_vm15 = vcmp.eq.f32.partialorder %v605_v8, 8.507059e+37 }
 0x1d5   : > { %v4766_v37 = vpop.permute.xlu1 %3678 }
 0x1d6   : > { %v3681_v42 = vunpack.i.h.bf16 %v4766_v37  ;;  %v3680_v43 = vunpack.i.l.bf16 %v4766_v37  ;;  %v660_v37 = vld [vmem:[%s6819_s7] sm:$0xff] }
 0x1d8   : > { %v1127_v31 = vsel %vm874_vm8, %v3680_v43, %v3681_v42  ;;  %v614_v42 = vmul.f32 %v4784_v48, %v613_v58  ;;  %v664_v58 = vld [vmem:[%s6819_s7 + $0x20] sm:$0xff] }
 0x1dd   : > { %v1123_v44 = vpop.permute.xlu1 %1122 }
 0x1de   : > { %v1133_v18 = vsel %vm874_vm8, %v1121_v32, %v1123_v44  ;;  %v649_v32 = vsel %vm648_vm11, %v4221_v16, %v645_v11  ;;  %vm617_vm11 = vweird.f32 %v4784_v48  ;;  %v634_v16 = vsel %vm4803_vm5, %v4223_v41, %v630_v14 }
 0x1df   : > { %3520 = vmatpush.msk.msra.mxu2 %vm6864_vm0, %v1133_v18  ;;  %v654_v60 = vsel %vm651_vm12, %v653_v21, %v649_v32  ;;  %vm616_vm0 = vweird.f32 %v4764_v34  ;;  %v597_v41 = vmul.f32 %v4227_v35, %v4778_v49  ;;  %vm601_vm5 = vweird.f32 %v4778_v49 }
 0x1e0   : > { %v659_v24 = vmul.f32 %v654_v60, %v4747_v46  ;;  %v639_v46 = vsel %vm636_vm9, %v638_v40, %v634_v16  ;;  %vm4820_vm10 = vmor %vm616_vm0, %vm617_vm11  ;;  %vm602_vm12 = vweird.f32 %v4227_v35  ;;  %v615_v18 = vadd.f32 %v4784_v48, %v614_v42  ;;  %v666_v40 = vld [vmem:[%s6819_s7 + $0x30] sm:$0xff]  ;;  %v667_v16 = vld [vmem:[%s6819_s7 + $0x38] sm:$0xff] }
 0x1e1   : > { %1200 = vmatpush.msra.mxu2 %v1131_v53  ;;  %v1054_v53 = vld [vmem:[%s6919_s3] sm:$0xff]  ;;  %v658_v54 = vmul.f32 %v639_v46, %v4751_v29  ;;  %v598_v34 = vsub.f32 1.0, %v597_v41  ;;  %vm603_vm0 = vmor %vm601_vm5, %vm602_vm12  ;;  %vm676_vm9 = vcmask 261120  }
 0x1e2   : > { %713 = vmatpush.msra.mxu0 %v659_v24  ;;  %v619_v29 = vsel %vm4820_vm10, %v4784_v48, %v615_v18  ;;  %v665_v24 = vld [vmem:[%s6819_s7 + $0x28] sm:$0xff] }
 0x1e3   : > { %1201 = vmatpush.msra.mxu2 %v1129_v56  ;;  %v624_v21 = vsel %vm621_vm13, %v623_v55, %v619_v29  ;;  %v599_v25 = vmul.f32 %v4227_v35, %v598_v34 }
 0x1e4   : > { %714 = vmatpush.msra.mxu0 %v658_v54  ;;  %v657_v48 = vmul.f32 %v624_v21, %v4755_v63 }
 0x1e5   : > { %v3699_v47 = vpop.permute.xlu1 %3698  ;;  %1202 = vmatpush.msra.mxu2 %v1127_v31  ;;  %v3704_v31 = vpop.permute.xlu2 %3703  ;;  %v600_v33 = vadd.f32 %v4227_v35, %v599_v25 }
 0x1e6   : > { %v3701_v44 = vunpack.i.h.bf16 %v3699_v47  ;;  %v3700_v57 = vunpack.i.l.bf16 %v3699_v47  ;;  %v3706_v36 = vunpack.i.h.bf16 %v3704_v31  ;;  %715 = vmatpush.msra.mxu0 %v657_v48 }
 0x1e7   : > { %1203 = vmatpush.msra.mxu2 %v1125_v50  ;;  %v1061_v50 = vld [vmem:[%s6916_s4 + $0x18] sm:$0xff]  ;;  %v604_v63 = vsel %vm603_vm0, %v4227_v35, %v600_v33  ;;  %s6926_s4 = smov 17  }
 0x1e8   : > { %3521 = vmatmul.msk.f32.vlgmr.msra.gmra.mxu2 %vm1142_vm14, %v1054_v53  ;;  %v1130_v11 = vsel %vm874_vm8, %v3700_v57, %v3690_v59  ;;  %1079 = vperm.xlu0 %3707, %v1061_v50   ;;  %v3705_v59 = vunpack.i.l.bf16 %v3704_v31  ;;  %v1128_v32 = vsel %vm874_vm8, %v3701_v44, %v3685_v52  ;;  %v1124_v52 = vsel %vm874_vm8, %v3706_v36, %v3695_v39  ;;  %v1057_v39 = vld [vmem:[%s6919_s3 + $0x18] sm:$0xff]  ;;  %s6923_s3 = smov 15  }
 0x1e9   : > { %1171 = vmatpush.msra.mxu1 %v1130_v11  ;;  %v609_v49 = vsel %vm606_vm15, %v608_v27, %v604_v63  ;;  %v663_v35 = vld [vmem:[%s6819_s7 + $0x18] sm:$0xff] }
 0x1ea   : > { %v1126_v60 = vsel %vm874_vm8, %v3705_v59, %v3680_v43  ;;  %v656_v14 = vmul.f32 %v609_v49, %v4758_v10  ;;  %v661_v10 = vld [vmem:[%s6819_s7 + $0x8] sm:$0xff]  ;;  %v662_v43 = vld [vmem:[%s6819_s7 + $0x10] sm:$0xff] }
 0x1eb   : > { %1172 = vmatpush.msra.mxu1 %v1128_v32 }
 0x1ec   : > { %716 = vmatpush.msra.mxu0 %v656_v14 }
 0x1ed   : > { %1173 = vmatpush.msra.mxu1 %v1126_v60  ;;  %3507 = vmatmul.msk.f32.vlgmr.msra.gmra.mxu0 %vm676_vm9, %v660_v37  ;;  %v1075_v42 = vpop.permute.xlu1 %1074 }
 0x1ef   : > { %1174 = vmatpush.msra.mxu1 %v1124_v52 }
 0x1f0   : > { %3516 = vmatmul.msk.f32.vlgmr.msra.gmra.mxu1 %vm1142_vm14, %v1054_v53  ;;  %3522 = vmatmul.msk.f32.gmra.mxu2 %vm1142_vm14, %v1055_v62 }
 0x1f5   : > { %3508 = vmatmul.msk.f32.gmra.mxu0 %vm676_vm9, %v661_v10  ;;  %v1065_v22 = vpop.permute.xlu1 %1064 }
 0x1f8   : > { %3517 = vmatmul.msk.f32.gmra.mxu1 %vm1142_vm14, %v1055_v62  ;;  %3523 = vmatmul.msk.f32.gmra.mxu2 %vm1142_vm14, %v1056_v38 }
 0x1fd   : > { %3509 = vmatmul.msk.f32.gmra.mxu0 %vm676_vm9, %v662_v43 }
 0x200   : > { %3518 = vmatmul.msk.f32.gmra.mxu1 %vm1142_vm14, %v1056_v38  ;;  %3524 = vmatmul.msk.f32.gmra.mxu2 %vm1142_vm14, %v1057_v39 }
 0x205   : > { %3510 = vmatmul.msk.f32.gmra.mxu0 %vm676_vm9, %v663_v35  ;;  %v1219_v35 = vld [vmem:[%s6817_s5 + $0x10] sm:$0xff] }
 0x208   : > { %3519 = vmatmul.msk.f32.gmra.mxu1 %vm1142_vm14, %v1057_v39  ;;  %vm1315_vm14 = vcmask 64512  }
 0x20d   : > { %3511 = vmatmul.msk.f32.gmra.mxu0 %vm676_vm9, %v664_v58  ;;  %v1217_v58 = vld [vmem:[%s6817_s5] sm:$0xff] }
 0x211   : > { %v1070_v41 = vpop.permute.xlu2 %1069 }
 0x215   : > { %3512 = vmatmul.msk.f32.gmra.mxu0 %vm676_vm9, %v665_v24  ;;  %v668_v24 = vld [vmem:[%s6820_s8] sm:$0xff] }
 0x21d   : > { %3513 = vmatmul.msk.f32.gmra.mxu0 %vm676_vm9, %v666_v40  ;;  %v1222_v40 = vld [vmem:[%s6818_s6 + $0x8] sm:$0xff] }
 0x225   : > { %3514 = vmatmul.msk.f32.gmra.mxu0 %vm676_vm9, %v667_v16 }
 0x25a   : > { %v1080_v51 = vpop.permute.xlu0 %1079 }
 0x26a   : > { %v718_v55 = vpop.f32.mrf.mxu0 }
 0x26b   : > { %v1205_v45 = vpop.f32.mrf.mxu2 }
 0x26c   : > { %v4905_v47 = vadd.f32 %v1205_v45, %v1065_v22 }
 0x26d   : > { %v1176_v53 = vpop.f32.mrf.mxu1 }
 0x26e   : > { %v4907_v46 = vadd.f32 %v1176_v53, %v1065_v22  ;;  %v1238_v10 = vmul.f32 %v4905_v47, %v4905_v47  ;;  %v1220_v22 = vld [vmem:[%s6817_s5 + $0x18] sm:$0xff] }
 0x26f   : > { %v671_v53 = vld [vmem:[%s6820_s8 + $0x18] sm:$0xff] }
 0x270   : > { %v1225_v56 = vadd.f32 %v4905_v47, %v4907_v46  ;;  %v1237_v38 = vmul.f32 %v4907_v46, %v4907_v46 }
 0x272   : > { %1226 = vadd.xlane.f32.xlu2 %v1225_v56  ;;  %v721_v59 = vpop.f32.mrf.mxu0  ;;  %v1245_v43 = vadd.f32 %v1238_v10, %v1237_v38 }
 0x273   : > { %v1208_v44 = vpop.f32.mrf.mxu2 }
 0x274   : > { %v4911_v57 = vadd.f32 %v1208_v44, %v1070_v41 }
 0x275   : > { %v1179_v54 = vpop.f32.mrf.mxu1 }
 0x276   : > { %v4913_v18 = vadd.f32 %v1179_v54, %v1070_v41  ;;  %v1240_v11 = vmul.f32 %v4911_v57, %v4911_v57  ;;  %v669_v41 = vld [vmem:[%s6820_s8 + $0x8] sm:$0xff]  ;;  %v1223_v54 = vld [vmem:[%s6818_s6 + $0x10] sm:$0xff] }
 0x278   : > { %v1228_v31 = vadd.f32 %v4911_v57, %v4913_v18  ;;  %v1239_v8 = vmul.f32 %v4913_v18, %v4913_v18 }
 0x27a   : > { %1229 = vadd.xlane.f32.xlu1 %v1228_v31  ;;  %v1248_v25 = vadd.f32 %v1240_v11, %v1239_v8  ;;  %v724_v14 = vpop.f32.mrf.mxu0  ;;  %v722_v31 = vadd.f32 %v721_v59, %v669_v41  ;;  %v674_v11 = vld [vmem:[%s6820_s8 + $0x30] sm:$0xff] }
 0x27b   : > { %v1211_v34 = vpop.f32.mrf.mxu2  ;;  %v574_v41 = vld [vmem:[%s6828_s16 + $0x10] sm:$0xff] }
 0x27c   : > { %v4921_v19 = vadd.f32 %v1211_v34, %v1075_v42  ;;  %v1218_v34 = vld [vmem:[%s6817_s5 + $0x8] sm:$0xff]  ;;  %v1499_v8 = vadd.f32 1.0, %v722_v31 }
 0x27d   : > { %v1182_v29 = vpop.f32.mrf.mxu1 }
 0x27e   : > { %v4923_v50 = vadd.f32 %v1182_v29, %v1075_v42  ;;  %v1242_v60 = vmul.f32 %v4921_v19, %v4921_v19  ;;  %v719_v42 = vadd.f32 %v718_v55, %v668_v24  ;;  %v573_v24 = vld [vmem:[%s6828_s16 + $0x8] sm:$0xff] }
 0x280   : > { %v1231_v21 = vadd.f32 %v4921_v19, %v4923_v50  ;;  %v1241_v27 = vmul.f32 %v4923_v50, %v4923_v50  ;;  %v1498_v45 = vadd.f32 1.0, %v719_v42 }
 0x282   : > { %1232 = vadd.xlane.f32.xlu0 %v1231_v21  ;;  %1249 = vadd.xlane.f32.xlu1 %v1248_v25  ;;  %v1251_v62 = vadd.f32 %v1242_v60, %v1241_v27  ;;  %v727_v39 = vpop.f32.mrf.mxu0  ;;  %v672_v21 = vld [vmem:[%s6820_s8 + $0x20] sm:$0xff]  ;;  %v1224_v27 = vld [vmem:[%s6818_s6 + $0x18] sm:$0xff] }
 0x283   : > { %v1214_v32 = vpop.f32.mrf.mxu2  ;;  %v728_v44 = vadd.f32 %v727_v39, %v671_v53 }
 0x284   : > { %v4927_v48 = vadd.f32 %v1214_v32, %v1080_v51  ;;  %v670_v32 = vld [vmem:[%s6820_s8 + $0x10] sm:$0xff] }
 0x285   : > { %v1185_v33 = vpop.f32.mrf.mxu1  ;;  %v1501_v55 = vadd.f32 1.0, %v728_v44 }
 0x286   : > { %v4931_v36 = vadd.f32 %v1185_v33, %v1080_v51  ;;  %v1244_v49 = vmul.f32 %v4927_v48, %v4927_v48  ;;  %v1221_v51 = vld [vmem:[%s6818_s6] sm:$0xff]  ;;  %v675_v33 = vld [vmem:[%s6820_s8 + $0x38] sm:$0xff] }
 0x288   : > { %v1234_v63 = vadd.f32 %v4927_v48, %v4931_v36  ;;  %v1243_v52 = vmul.f32 %v4931_v36, %v4931_v36 }
 0x28a   : > { %1252 = vadd.xlane.f32.xlu0 %v1251_v62  ;;  %1235 = vadd.xlane.f32.xlu2 %v1234_v63  ;;  %v1254_v37 = vadd.f32 %v1244_v49, %v1243_v52  ;;  %v730_v16 = vpop.f32.mrf.mxu0  ;;  %v725_v62 = vadd.f32 %v724_v14, %v670_v32  ;;  %v673_v49 = vld [vmem:[%s6820_s8 + $0x28] sm:$0xff] }
 0x28b   : > { %v731_v59 = vadd.f32 %v730_v16, %v672_v21 }
 0x28c   : > { %v1500_v52 = vadd.f32 1.0, %v725_v62 }
 0x292   : > { %1255 = vadd.xlane.f32.xlu2 %v1254_v37  ;;  %v733_v56 = vpop.f32.mrf.mxu0 }
 0x293   : > { %v734_v37 = vadd.f32 %v733_v56, %v673_v49 }
 0x29a   : > { %1246 = vadd.xlane.f32.xlu2 %v1245_v43  ;;  %v736_v29 = vpop.f32.mrf.mxu0 }
 0x29b   : > { %1454 = vperm.xlu1 %3708, %v1219_v35   ;;  %v737_v25 = vadd.f32 %v736_v29, %v674_v11  ;;  %v572_v35 = vld [vmem:[%s6828_s16] sm:$0xff] }
 0x29e   : > { %1444 = vperm.xlu0 %3707, %v1217_v58  }
 0x2a2   : > { %v739_v60 = vpop.f32.mrf.mxu0 }
 0x2a3   : > { %1477 = vperm.xlu1 %3708, %v1222_v40   ;;  %v740_v63 = vadd.f32 %v739_v60, %v675_v33 }
 0x2a6   : > { %1459 = vperm.xlu0 %3707, %v1220_v22  }
 0x2ab   : > { %1504 = vperm.xlu1 %3708, %v1498_v45  }
 0x2ae   : > { %1482 = vperm.xlu0 %3707, %v1223_v54  }
 0x2b2   : > { %1449 = vperm.xlu2 %3709, %v1218_v34  }
 0x2b3   : > { %1519 = vperm.xlu1 %3708, %v1501_v55  }
 0x2b6   : > { %1509 = vperm.xlu0 %3707, %v1499_v8   ;;  %v575_v8 = vld [vmem:[%s6828_s16 + $0x18] sm:$0xff] }
 0x2ba   : > { %1472 = vperm.xlu2 %3709, %v1221_v51  }
 0x2bb   : > { %1542 = vperm.xlu1 %3708, %v737_v25  }
 0x2be   : > { %1532 = vperm.xlu0 %3707, %v731_v59  }
 0x2c2   : > { %1487 = vperm.xlu2 %3709, %v1224_v27  }
 0x2c3   : > { %1748 = vrot.lane.b32.xlu1 %v749_v3, %s6912_s0 }
 0x2c6   : > { %1547 = vperm.xlu0 %3707, %v740_v63  }
 0x2ca   : > { %1514 = vperm.xlu2 %3709, %v1500_v52  }
 0x2cb   : > { %1786 = vrot.lane.b32.xlu1 %v779_v4, %s6922_s26 }
 0x2ce   : > { %1766 = vrot.lane.b32.xlu0 %v764_v15, %s6913_s19 }
 0x2d2   : > { %1537 = vperm.xlu2 %3709, %v734_v37  }
 0x2d3   : > { %1808 = vrot.lane.b32.xlu1 %v795_v9, %s6914_s18 }
 0x2d6   : > { %1788 = vrot.lane.b32.xlu0 %v780_v5, %s6922_s26 }
 0x2da   : > { %1746 = vrot.lane.b32.xlu2 %v748_v2, %s6912_s0 }
 0x2db   : > { %1866 = vrot.lane.b32.xlu1 %v835_v26, %s6923_s3 }
 0x2de   : > { %1846 = vrot.lane.b32.xlu0 %v820_v12, %s6924_s30 }
 0x2e2   : > { %1768 = vrot.lane.b32.xlu2 %v765_v7, %s6913_s19  ;;  %v571_v7 = vld [vmem:[%s6827_s15] sm:$0xff] }
 0x2e3   : > { %1888 = vrot.lane.b32.xlu1 %v851_v23, %s6925_s29 }
 0x2e5   : > { %v1227_v2 = vpop.xlane.xlu2 %1226 }
 0x2e6   : > { %1868 = vrot.lane.b32.xlu0 %v836_v20, %s6923_s3  ;;  %s6928_s3 = smov 96  }
 0x2ea   : > { %1806 = vrot.lane.b32.xlu2 %v794_v17, %s6914_s18 }
 0x2ed   : > { %v1230_v5 = vpop.xlane.xlu1 %1229 }
 0x2ee   : > { %1906 = vrot.lane.b32.xlu0 %v4584_v30, %s6926_s4 }
 0x2f2   : > { %1848 = vrot.lane.b32.xlu2 %v821_v13, %s6924_s30  ;;  %s6929_s30 = smov 95  }
 0x2f5   : > { %v1233_v3 = vpop.xlane.xlu0 %1232  ;;  %v1250_v12 = vpop.xlane.xlu1 %1249 }
 0x2fa   : > { %1886 = vrot.lane.b32.xlu2 %v850_v28, %s6925_s29 }
 0x2fd   : > { %v1236_v4 = vpop.xlane.xlu2 %1235  ;;  %v1253_v9 = vpop.xlane.xlu0 %1252 }
 0x2fe   : > { %1272 = vmatpush.msra.mxu3 %v1236_v4 }
 0x300   : > { %1273 = vmatpush.msra.mxu3 %v1233_v3 }
 0x302   : > { %1274 = vmatpush.msra.mxu3 %v1230_v5  ;;  %1908 = vrot.lane.b32.xlu2 %v4296_v1, %s6926_s4 }
 0x304   : > { %1275 = vmatpush.msra.mxu3 %v1227_v2 }
 0x305   : > { %3525 = vmatmul.msk.f32.vlgmr.msra.gmra.mxu3 %vm676_vm9, %v571_v7  ;;  %v1256_v0 = vpop.xlane.xlu2 %1255 }
 0x306   : > { %1293 = vmatpush.msrb.mxu3 %v1256_v0 }
 0x308   : > { %1294 = vmatpush.msrb.mxu3 %v1253_v9 }
 0x30a   : > { %1295 = vmatpush.msrb.mxu3 %v1250_v12 }
 0x30d   : > { %v1247_v13 = vpop.xlane.xlu2 %1246  ;;  %v5048_v17 = vpop.permute.xlu1 %1454 }
 0x30e   : > { %1296 = vmatpush.msrb.mxu3 %v1247_v13 }
 0x30f   : > { %3526 = vmatmul.msk.f32.vlgmr.msrb.gmra.mxu3 %vm676_vm9, %v571_v7 }
 0x310   : > { %v5046_v15 = vpop.permute.xlu0 %1444 }
 0x315   : > { %v5052_v23 = vpop.permute.xlu2 %1449  ;;  %v5054_v26 = vpop.permute.xlu1 %1477 }
 0x318   : > { %v5050_v20 = vpop.permute.xlu0 %1459 }
 0x31d   : > { %v5058_v30 = vpop.permute.xlu2 %1472  ;;  %v5060_v14 = vpop.permute.xlu1 %1504 }
 0x320   : > { %v5056_v28 = vpop.permute.xlu0 %1482 }
 0x325   : > { %v5064_v39 = vpop.permute.xlu2 %1487  ;;  %v5070_v58 = vpop.permute.xlu1 %1519 }
 0x328   : > { %v5062_v38 = vpop.permute.xlu0 %1509 }
 0x32d   : > { %v5077_v42 = vpop.permute.xlu2 %1514  ;;  %v5083_v44 = vpop.permute.xlu1 %1542 }
 0x330   : > { %v5075_v40 = vpop.permute.xlu0 %1532 }
 0x335   : > { %v5088_v31 = vpop.permute.xlu2 %1537  ;;  %v5094_v21 = vpop.permute.xlu1 %1748 }
 0x336   : > { %6927 = vst [vmem:[#allocation12_spill] sm:$0xff] %v5094_v21 }
 0x338   : > { %v5085_v54 = vpop.permute.xlu0 %1547 }
 0x33d   : > { %v5098_v51 = vpop.permute.xlu2 %1746  ;;  %v5101_v33 = vpop.permute.xlu1 %1786 }
 0x340   : > { %v5096_v25 = vpop.permute.xlu0 %1766 }
 0x345   : > { %v5105_v62 = vpop.permute.xlu2 %1768  ;;  %v5108_v63 = vpop.permute.xlu1 %1808 }
 0x348   : > { %v5103_v60 = vpop.permute.xlu0 %1788 }
 0x34d   : > { %v5112_v49 = vpop.permute.xlu2 %1806  ;;  %v5115_v37 = vpop.permute.xlu1 %1866 }
 0x350   : > { %v5110_v52 = vpop.permute.xlu0 %1846 }
 0x355   : > { %v5120_v5 = vpop.permute.xlu2 %1848  ;;  %v5125_v1 = vpop.permute.xlu1 %1888 }
 0x356   : > { %v1856_v7 = vmul.f32 0.0, %v5120_v5  ;;  %v1896_v0 = vmul.f32 0.0, %v5125_v1 }
 0x358   : > { %v5117_v2 = vpop.permute.xlu0 %1868  ;;  %v3730_v9 = vpack.i.bf16 %v1856_v7, %v1856_v7  ;;  %v3715_v12 = vpack.i.bf16 %v1896_v0, %v1896_v0 }
 0x359   : > { %v1876_v3 = vmul.f32 0.0, %v5117_v2 }
 0x35a   : > { %3711 = vrot.lane.b32.xlu0 %v3715_v12, %s6929_s30  ;;  %3716 = vrot.lane.b32.xlu2 %v3715_v12, %s6929_s30 }
 0x35b   : > { %v3720_v4 = vpack.i.bf16 %v1876_v3, %v1876_v3 }
 0x35d   : > { %3721 = vrot.lane.b32.xlu1 %v3720_v4, %s6928_s3 }
 0x362   : > { %3726 = vrot.lane.b32.xlu0 %v3720_v4, %s6928_s3  ;;  %3736 = vrot.lane.b32.xlu2 %v3730_v9, %s6930_s22 }
 0x365   : > { %3731 = vrot.lane.b32.xlu1 %v3730_v9, %s6930_s22 }
 0x388   : > { %v1277_v10 = vpop.f32.mrf.mxu3 }
 0x389   : > { %v1280_v43 = vmul.f32 0.0009765625, %v1277_v10 }
 0x38b   : > { %1343 = vmatpush.msra.mxu3 %v1280_v43  ;;  %v1302_v22 = vmul.f32 %v1280_v43, %v1280_v43 }
 0x38c   : > { %3527 = vmatmul.msk.f32.vlgmr.msra.gmra.mxu3 %vm1315_vm14, %v572_v35 }
 0x392   : > { %v1298_v16 = vpop.f32.mrf.mxu3 }
 0x393   : > { %v1301_v45 = vmul.f32 0.0009765625, %v1298_v16 }
 0x394   : > { %3528 = vmatmul.msk.f32.gmra.mxu3 %vm1315_vm14, %v573_v24 }
 0x395   : > { %v1303_v53 = vsub.f32 %v1301_v45, %v1302_v22 }
 0x397   : > { %v1304_v56 = vadd.f32 1e-05, %v1303_v53  ;;  %v5133_v53 = vpop.permute.xlu2 %1886 }
 0x399   : > { %4228 = vrsqrt.f32 %v1304_v56  ;;  %vm1311_vm10 = vweird.f32 %v1304_v56 }
 0x39c   : > { %3529 = vmatmul.msk.f32.gmra.mxu3 %vm1315_vm14, %v574_v41 }
 0x39f   : > { %v4229_v55 = vpop.eup %4228 }
 0x3a0   : > { %v1306_v34 = vmul.f32 %v4229_v55, %v1304_v56  ;;  %vm1312_vm11 = vweird.f32 %v4229_v55  ;;  %v5135_v56 = vpop.permute.xlu2 %1908 }
 0x3a1   : > { %vm1313_vm5 = vmor %vm1311_vm10, %vm1312_vm11 }
 0x3a2   : > { %v1307_v11 = vmul.f32 %v4229_v55, %v1306_v34 }
 0x3a4   : > { %3530 = vmatmul.msk.f32.gmra.mxu3 %vm1315_vm14, %v575_v8  ;;  %v1308_v29 = vmul.f32 0.5, %v1307_v11 }
 0x3a6   : > { %v1309_v59 = vsub.f32 1.5, %v1308_v29 }
 0x3a8   : > { %v1310_v32 = vmul.f32 %v4229_v55, %v1309_v59 }
 0x3aa   : > { %v1314_v27 = vsel %vm1313_vm5, %v4229_v55, %v1310_v32 }
 0x3ab   : > { %1372 = vmatpush.msrb.mxu1 %v1314_v27 }
 0x3ac   : > { %3531 = vmatmul.msk.f32.vlgmr.msrb.gmra.mxu1 %vm1315_vm14, %v572_v35 }
 0x3b4   : > { %3532 = vmatmul.msk.f32.gmra.mxu1 %vm1315_vm14, %v573_v24  ;;  %v5139_v55 = vpop.permute.xlu2 %3716 }
 0x3b5   : > { %6931 = vst [vmem:[#allocation13_spill] sm:$0xff] %v5139_v55 }
 0x3bc   : > { %3533 = vmatmul.msk.f32.gmra.mxu1 %vm1315_vm14, %v574_v41  ;;  %v5137_v41 = vpop.permute.xlu0 %1906  ;;  %v5145_v11 = vpop.permute.xlu2 %3736 }
 0x3bd   : > { %6934 = vst [vmem:[#allocation16_spill] sm:$0xff] %v5145_v11 }
 0x3c4   : > { %3534 = vmatmul.msk.f32.gmra.mxu1 %vm1315_vm14, %v575_v8 }
 0x3cc   : > { %v5141_v34 = vpop.permute.xlu0 %3711 }
 0x3cd   : > { %6932 = vst [vmem:[#allocation14_spill] sm:$0xff] %v5141_v34 }
 0x3cf   : > { %v5143_v8 = vpop.permute.xlu1 %3721 }
 0x3d0   : > { %6933 = vst [vmem:[#allocation15_spill] sm:$0xff] %v5143_v8 }
 0x3d4   : > { %v5147_v29 = vpop.permute.xlu0 %3726 }
 0x3d5   : > { %6935 = vst [vmem:[#allocation17_spill] sm:$0xff] %v5147_v29 }
 0x3d7   : > { %v5149_v59 = vpop.permute.xlu1 %3731 }
 0x3d8   : > { %6936 = vst [vmem:[#allocation18_spill] sm:$0xff] %v5149_v59 }
 0x40f   : > { %v1345_v13 = vpop.f32.mrf.mxu3 }
 0x410   : > { %1388 = vperm.xlu0 %3707, %v1345_v13  }
 0x417   : > { %v1348_v10 = vpop.f32.mrf.mxu3 }
 0x418   : > { %1393 = vperm.xlu1 %3708, %v1348_v10  }
 0x41f   : > { %v1351_v43 = vpop.f32.mrf.mxu3 }
 0x420   : > { %1398 = vperm.xlu2 %3709, %v1351_v43  }
 0x427   : > { %v1354_v35 = vpop.f32.mrf.mxu3 }
 0x428   : > { %1403 = vperm.xlu0 %3707, %v1354_v35  }
 0x429   : > { %v1374_v24 = vpop.f32.mrf.mxu1 }
 0x42a   : > { %1416 = vperm.xlu1 %3708, %v1374_v24  }
 0x431   : > { %v1377_v16 = vpop.f32.mrf.mxu1 }
 0x432   : > { %1421 = vperm.xlu0 %3707, %v1377_v16  }
 0x439   : > { %v1380_v22 = vpop.f32.mrf.mxu1 }
 0x43a   : > { %1426 = vperm.xlu2 %3709, %v1380_v22  }
 0x441   : > { %v1383_v45 = vpop.f32.mrf.mxu1 }
 0x442   : > { %1431 = vperm.xlu1 %3708, %v1383_v45  }
 0x47a   : > { %v1399_v32 = vpop.permute.xlu2 %1398 }
 0x47b   : > { %v1411_v27 = vsub.f32 %v4921_v19, %v1399_v32  ;;  %v1410_v9 = vsub.f32 %v4923_v50, %v1399_v32 }
 0x482   : > { %v1389_v3 = vpop.permute.xlu0 %1388 }
 0x483   : > { %v1406_v10 = vsub.f32 %v4907_v46, %v1389_v3  ;;  %v1407_v43 = vsub.f32 %v4905_v47, %v1389_v3 }
 0x48a   : > { %v1394_v4 = vpop.permute.xlu1 %1393 }
 0x48b   : > { %v1409_v3 = vsub.f32 %v4911_v57, %v1394_v4 }
 0x494   : > { %v1427_v7 = vpop.permute.xlu2 %1426 }
 0x495   : > { %v1439_v0 = vmul.f32 %v1427_v7, %v1411_v27  ;;  %v1438_v12 = vmul.f32 %v1427_v7, %v1410_v9 }
 0x497   : > { %v1467_v13 = vmul.f32 %v5048_v17, %v1439_v0  ;;  %v1466_v35 = vmul.f32 %v5048_v17, %v1438_v12  ;;  %v1408_v17 = vsub.f32 %v4913_v18, %v1394_v4 }
 0x499   : > { %v1495_v24 = vadd.f32 %v5056_v28, %v1467_v13  ;;  %v1494_v32 = vadd.f32 %v5056_v28, %v1466_v35 }
 0x49a   : > { %v5158_v16 = vpop.permute.xlu0 %1403 }
 0x49b   : > { %v1527_v7 = vmul.f32 %v5077_v42, %v1495_v24  ;;  %v1526_v12 = vmul.f32 %v5077_v42, %v1494_v32 }
 0x49c   : > { %v1417_v19 = vpop.permute.xlu1 %1416 }
 0x49d   : > { %v1434_v22 = vmul.f32 %v1417_v19, %v1406_v10  ;;  %v1435_v45 = vmul.f32 %v1417_v19, %v1407_v43  ;;  %v5184_v42 = vadd.f32 %v5083_v44, %v1526_v12 }
 0x49f   : > { %v1462_v27 = vmul.f32 %v5046_v15, %v1434_v22  ;;  %v1463_v50 = vmul.f32 %v5046_v15, %v1435_v45  ;;  %v5172_v15 = vadd.f32 %v5083_v44, %v1527_v7  ;;  %v3539_v19 = vmul.f32 -1.442695, %v5184_v42 }
 0x4a1   : > { %v1490_v46 = vadd.f32 %v5058_v30, %v1462_v27  ;;  %v1491_v47 = vadd.f32 %v5058_v30, %v1463_v50  ;;  %v3540_v35 = vmul.f32 -1.442695, %v5172_v15 }
 0x4a3   : > { %v1522_v0 = vmul.f32 %v5060_v14, %v1490_v46  ;;  %v1523_v9 = vmul.f32 %v5060_v14, %v1491_v47 }
 0x4a4   : > { %v1422_v28 = vpop.permute.xlu0 %1421 }
 0x4a5   : > { %v5175_v13 = vadd.f32 %v5075_v40, %v1522_v0  ;;  %v5178_v10 = vadd.f32 %v5075_v40, %v1523_v9  ;;  %v1436_v30 = vmul.f32 %v1422_v28, %v1408_v17  ;;  %v1437_v18 = vmul.f32 %v1422_v28, %v1409_v3 }
 0x4a7   : > { %v3535_v57 = vmul.f32 -1.442695, %v5175_v13  ;;  %v1464_v4 = vmul.f32 %v5052_v23, %v1436_v30  ;;  %v1465_v14 = vmul.f32 %v5052_v23, %v1437_v18  ;;  %v3536_v43 = vmul.f32 -1.442695, %v5178_v10 }
 0x4a9   : > { %4230 = vpow2.f32 %v3535_v57  ;;  %v1492_v24 = vadd.f32 %v5054_v26, %v1464_v4  ;;  %v1493_v40 = vadd.f32 %v5054_v26, %v1465_v14 }
 0x4aa   : > { %4232 = vpow2.f32 %v3536_v43 }
 0x4ab   : > { %v1524_v22 = vmul.f32 %v5062_v38, %v1492_v24  ;;  %4234 = vpow2.f32 %v3540_v35  ;;  %v1525_v23 = vmul.f32 %v5062_v38, %v1493_v40  ;;  %v1412_v38 = vsub.f32 %v4931_v36, %v5158_v16 }
 0x4ac   : > { %4236 = vpow2.f32 %v3539_v19 }
 0x4ad   : > { %v5194_v44 = vadd.f32 %v5088_v31, %v1524_v22  ;;  %v5197_v27 = vadd.f32 %v5088_v31, %v1525_v23 }
 0x4af   : > { %v4231_v45 = vpop.eup %4230  ;;  %v3537_v32 = vmul.f32 -1.442695, %v5194_v44  ;;  %v3538_v47 = vmul.f32 -1.442695, %v5197_v27 }
 0x4b0   : > { %v1582_v50 = vadd.f32 1.0, %v4231_v45  ;;  %v4233_v26 = vpop.eup %4232 }
 0x4b1   : > { %v4235_v7 = vpop.eup %4234  ;;  %v1583_v46 = vadd.f32 1.0, %v4233_v26 }
 0x4b2   : > { %4238 = vrcp.f32 %v1582_v50  ;;  %v4237_v3 = vpop.eup %4236  ;;  %v5205_v31 = vadd.f32 1.0, %v4235_v7  ;;  %v1601_v57 = vand.u32 2147483648, %v1582_v50  ;;  %v1599_v19 = vand.u32 2147483647, %v1582_v50 }
 0x4b3   : > { %4240 = vpow2.f32 %v3537_v32  ;;  %v5208_v12 = vadd.f32 1.0, %v4237_v3  ;;  %vm1595_vm13 = vweird.f32 %v1582_v50  ;;  %v1616_v26 = vand.u32 2147483648, %v1583_v46 }
 0x4b4   : > { %v5201_v17 = vpop.permute.xlu1 %1431  ;;  %4242 = vrcp.f32 %v1583_v46  ;;  %v1602_v22 = vor.u32 1.1754944e-38, %v1601_v57  ;;  %v1614_v3 = vand.u32 2147483647, %v1583_v46  ;;  %vm1600_vm11 = vcmp.eq.f32.partialorder %v1599_v19, 8.507059e+37 }
 0x4b5   : > { %4244 = vpow2.f32 %v3538_v47  ;;  %v1440_v0 = vmul.f32 %v5201_v17, %v1412_v38  ;;  %vm1610_vm10 = vweird.f32 %v1583_v46 }
 0x4b6   : > { %4246 = vrcp.f32 %v5205_v31 }
 0x4b7   : > { %v1468_v30 = vmul.f32 %v5050_v20, %v1440_v0  ;;  %4248 = vrcp.f32 %v5208_v12 }
 0x4b8   : > { %v4239_v9 = vpop.eup %4238 }
 0x4b9   : > { %v1591_v28 = vmul.f32 %v4239_v9, %v1582_v50  ;;  %v4241_v18 = vpop.eup %4240  ;;  %v1496_v35 = vadd.f32 %v5064_v39, %v1468_v30  ;;  %vm1596_vm12 = vweird.f32 %v4239_v9 }
 0x4ba   : > { %v4243_v4 = vpop.eup %4242  ;;  %v5212_v36 = vadd.f32 1.0, %v4241_v18  ;;  %vm1597_vm0 = vmor %vm1595_vm13, %vm1596_vm12  ;;  %vm1615_vm12 = vcmp.eq.f32.partialorder %v1614_v3, 8.507059e+37  ;;  %v5274_v3 = vmul.f32 0.0, %v5101_v33  ;;  %vm1670_vm13 = vweird.f32 %v5205_v31 }
 0x4bb   : > { %v1592_v14 = vsub.f32 1.0, %v1591_v28  ;;  %v1606_v43 = vmul.f32 %v4243_v4, %v1583_v46  ;;  %v4245_v24 = vpop.eup %4244  ;;  %v1528_v7 = vmul.f32 %v5070_v58, %v1496_v35  ;;  %vm1611_vm15 = vweird.f32 %v4243_v4 }
 0x4bc   : > { %v5216_v45 = vadd.f32 1.0, %v4245_v24  ;;  %4250 = vrcp.f32 %v5212_v36  ;;  %v5220_v47 = vpop.eup %4246  ;;  %vm1612_vm5 = vmor %vm1610_vm10, %vm1611_vm15  ;;  %v5237_v46 = vsel %vm773_vm2, %v5096_v25, %v5105_v62 }
 0x4bd   : > { %v1593_v40 = vmul.f32 %v4239_v9, %v1592_v14  ;;  %v1607_v23 = vsub.f32 1.0, %v1606_v43  ;;  %v5224_v30 = vadd.f32 %v5085_v54, %v1528_v7  ;;  %v5226_v18 = vpop.eup %4248  ;;  %v1666_v57 = vmul.f32 %v5220_v47, %v5205_v31 }
 0x4be   : > { %4252 = vrcp.f32 %v5216_v45  ;;  %v1617_v14 = vor.u32 1.1754944e-38, %v1616_v26  ;;  %v1651_v26 = vmul.f32 %v5226_v18, %v5208_v12 }
 0x4bf   : > { %v1594_v32 = vadd.f32 %v4239_v9, %v1593_v40  ;;  %v1608_v38 = vmul.f32 %v4243_v4, %v1607_v23  ;;  %v5242_v40 = vmul.f32 0.0, %v5096_v25  ;;  %v5258_v25 = vsel %vm859_vm7, %v5133_v53, %v5125_v1 }
 0x4c0   : > { %v1667_v7 = vsub.f32 1.0, %v1666_v57  ;;  %vm6937_vm7 = vcmask 7168  }
 0x4c1   : > { %v1598_v0 = vsel %vm1597_vm0, %v4239_v9, %v1594_v32  ;;  %v1609_v28 = vadd.f32 %v4243_v4, %v1608_v38  ;;  %v3541_v9 = vmul.f32 -1.442695, %v5224_v30  ;;  %vm1656_vm0 = vweird.f32 %v5226_v18 }
 0x4c2   : > { %v1603_v50 = vsel %vm1600_vm11, %v1602_v22, %v1598_v0  ;;  %v5239_v24 = vpop.eup %4250  ;;  %v5277_v0 = vmul.f32 0.0, %v5098_v51 }
 0x4c3   : > { %v5231_v43 = vmul.f32 %v1603_v50, %v5175_v13  ;;  %v1613_v35 = vsel %vm1612_vm5, %v4243_v4, %v1609_v28  ;;  %v1413_v4 = vsub.f32 %v4927_v48, %v5158_v16  ;;  %4254 = vpow2.f32 %v3541_v9 }
 0x4c4   : > { %v1618_v19 = vsel %vm1615_vm12, %v1617_v14, %v1613_v35  ;;  %v5246_v13 = vpop.eup %4252  ;;  %v5266_v48 = vsel %vm758_vm1, %v5098_v51, %v5094_v21  ;;  %v1621_v50 = vmul.f32 %v5239_v24, %v5212_v36  ;;  %v5293_v51 = vsel %vm788_vm3, %v5101_v33, %v5103_v60 }
 0x4c5   : > { %v1775_v22 = vmul.f32 %v5237_v46, %v5231_v43  ;;  %v5251_v23 = vmul.f32 %v1618_v19, %v5178_v10  ;;  %v1894_v32 = vmul.f32 %v5133_v53, %v5231_v43  ;;  %v1441_v16 = vmul.f32 %v5201_v17, %v1413_v4 }
 0x4c6   : > { %v1636_v28 = vmul.f32 %v5246_v13, %v5216_v45  ;;  %v5287_v17 = vsel %vm803_vm4, %v5112_v49, %v5108_v63  ;;  %v5298_v35 = vsel %vm844_vm6, %v5115_v37, %v5117_v2  ;;  %v1652_v9 = vsub.f32 1.0, %v1651_v26 }
 0x4c7   : > { %v3740_v38 = vpack.i.bf16 %v1775_v22, %v5242_v40  ;;  %v1776_v10 = vmul.f32 %v5105_v62, %v5251_v23  ;;  %v1895_v1 = vmul.f32 %v5258_v25, %v5251_v23  ;;  %v1668_v19 = vmul.f32 %v5220_v47, %v1667_v7 }
 0x4c8   : > { %v1795_v22 = vmul.f32 %v5293_v51, %v5231_v43  ;;  %v5309_v33 = vmul.f32 0.0, %v5135_v56  ;;  %v1469_v2 = vmul.f32 %v5050_v20, %v1441_v16  ;;  %v1676_v26 = vand.u32 2147483648, %v5205_v31 }
 0x4c9   : > { %3741 = vrot.lane.b32.xlu1 %v3740_v38, %s6914_s18  ;;  %v3745_v57 = vpack.i.bf16 %v5242_v40, %v1776_v10  ;;  %v3765_v14 = vpack.i.bf16 %v1895_v1, %v1894_v32  ;;  %v4255_v4 = vpop.eup %4254  ;;  %v5306_v32 = vsel %vm6937_vm7, %v5110_v52, %v5120_v5  ;;  %v1661_v38 = vand.u32 2147483648, %v5208_v12 }
 0x4ca   : > { %v1622_v7 = vsub.f32 1.0, %v1621_v50  ;;  %v1637_v10 = vsub.f32 1.0, %v1636_v28  ;;  %v5316_v1 = vadd.f32 1.0, %v4255_v4  ;;  %vm1671_vm3 = vweird.f32 %v5220_v47 }
 0x4cb   : > { %3746 = vrot.lane.b32.xlu0 %v3745_v57, %s6914_s18  ;;  %3766 = vrot.lane.b32.xlu2 %v3765_v14, %s6929_s30  ;;  %v1796_v5 = vmul.f32 %v5103_v60, %v5251_v23  ;;  %v1854_v11 = vmul.f32 %v5110_v52, %v5231_v43  ;;  %v1855_v20 = vmul.f32 %v5306_v32, %v5251_v23  ;;  %v1659_v14 = vand.u32 2147483647, %v5208_v12  ;;  %vm5349_vm15 = vmor %vm1670_vm13, %vm1671_vm3 }
 0x4cc   : > { %v1653_v16 = vmul.f32 %v5226_v18, %v1652_v9  ;;  %v5327_v57 = vadd.f32 %v5220_v47, %v1668_v19  ;;  %4256 = vrcp.f32 %v5316_v1  ;;  %v3750_v50 = vpack.i.bf16 %v1795_v22, %v5274_v3 }
 0x4cd   : > { %v5334_v28 = vsel %vm874_vm8, %v5137_v41, %v5135_v56  ;;  %v1674_v4 = vand.u32 2147483647, %v5205_v31  ;;  %v1497_v59 = vadd.f32 %v5064_v39, %v1469_v2  ;;  %vm1655_vm6 = vweird.f32 %v5208_v12 }
 0x4ce   : > { %v5340_v9 = vor.u32 1.1754944e-38, %v1661_v38  ;;  %v1623_v19 = vmul.f32 %v5239_v24, %v1622_v7  ;;  %v1638_v22 = vmul.f32 %v5246_v13, %v1637_v10  ;;  %v1677_v39 = vor.u32 1.1754944e-38, %v1676_v26 }
 0x4cf   : > { %v3755_v38 = vpack.i.bf16 %v5274_v3, %v1796_v5  ;;  %v3775_v2 = vpack.i.bf16 %v1855_v20, %v1854_v11  ;;  %v5355_v31 = vadd.f32 %v5226_v18, %v1653_v16  ;;  %v1673_v7 = vsel %vm5349_vm15, %v5220_v47, %v5327_v57 }
 0x4d0   : > { %v1826_v10 = vmul.f32 %v5231_v43, %v4628_v6  ;;  %vm5365_vm11 = vcmp.eq.f32.partialorder %v1674_v4, 8.507059e+37  ;;  %vm1626_vm10 = vweird.f32 %v5239_v24  ;;  %v1631_v11 = vand.u32 2147483648, %v5212_v36 }
 0x4d1   : > { %3751 = vrot.lane.b32.xlu1 %v3750_v50, %s6938_s21  ;;  %v1827_v50 = vmul.f32 %v5251_v23, %v4624_v61  ;;  %v1646_v26 = vand.u32 2147483648, %v5216_v45  ;;  %v1529_v5 = vmul.f32 %v5070_v58, %v1497_v59  ;;  %v1624_v20 = vadd.f32 %v5239_v24, %v1623_v19 }
 0x4d2   : > { %v4257_v47 = vpop.eup %4256  ;;  %vm1625_vm5 = vweird.f32 %v5212_v36  ;;  %v1639_v16 = vadd.f32 %v5246_v13, %v1638_v22  ;;  %vm1641_vm12 = vweird.f32 %v5246_v13  ;;  %v1815_v4 = vmul.f32 %v5287_v17, %v5231_v43 }
 0x4d3   : > { %3756 = vrot.lane.b32.xlu0 %v3755_v38, %s6938_s21  ;;  %3776 = vrot.lane.b32.xlu2 %v3775_v2, %s6930_s22  ;;  %v1681_v57 = vmul.f32 %v4257_v47, %v5316_v1  ;;  %v1816_v58 = vmul.f32 %v5108_v63, %v5251_v23  ;;  %v1914_v59 = vmul.f32 %v5137_v41, %v5231_v43  ;;  %vm5386_vm7 = vcmp.eq.f32.partialorder %v1659_v14, 8.507059e+37  ;;  %vm5392_vm3 = vmor %vm1625_vm5, %vm1626_vm10 }
 0x4d4   : > { %v1629_v22 = vand.u32 2147483647, %v5212_v36  ;;  %vm1640_vm13 = vweird.f32 %v5216_v45  ;;  %v1644_v38 = vand.u32 2147483647, %v5216_v45  ;;  %v3780_v2 = vpack.i.bf16 %v1827_v50, %v1826_v10  ;;  %vm5419_vm10 = vmor %vm1655_vm6, %vm1656_vm0 }
 0x4d5   : > { %v1632_v34 = vor.u32 1.1754944e-38, %v1631_v11  ;;  %vm5399_vm15 = vmor %vm1640_vm13, %vm1641_vm12  ;;  %v1647_v14 = vor.u32 1.1754944e-38, %v1646_v26  ;;  %v5404_v21 = vadd.f32 %v5085_v54, %v1529_v5  ;;  %v1682_v55 = vsub.f32 1.0, %v1681_v57 }
 0x4d6   : > { %v1628_v61 = vsel %vm5392_vm3, %v5239_v24, %v1624_v20  ;;  %v1643_v36 = vsel %vm5399_vm15, %v5246_v13, %v1639_v16  ;;  %v1689_v45 = vand.u32 2147483647, %v5316_v1  ;;  %v1691_v10 = vand.u32 2147483648, %v5316_v1 }
 0x4d7   : > { %v1683_v50 = vmul.f32 %v4257_v47, %v1682_v55  ;;  %vm1686_vm5 = vweird.f32 %v4257_v47  ;;  %v3760_v24 = vpack.i.bf16 %v1816_v58, %v1815_v4  ;;  %v3785_v29 = vpack.i.bf16 %v1914_v59, %v5309_v33 }
 0x4d8   : > { %v1658_v13 = vsel %vm5419_vm10, %v5226_v18, %v5355_v31  ;;  %vm1630_vm12 = vcmp.eq.f32.partialorder %v1629_v22, 8.507059e+37  ;;  %vm1645_vm3 = vcmp.eq.f32.partialorder %v1644_v38, 8.507059e+37  ;;  %v1755_v11 = vmul.f32 %v5266_v48, %v5231_v43 }
 0x4d9   : > { %3781 = vrot.lane.b32.xlu1 %v3780_v2, %s6912_s0  ;;  %v1633_v12 = vsel %vm1630_vm12, %v1632_v34, %v1628_v61  ;;  %v1648_v26 = vsel %vm1645_vm3, %v1647_v14, %v1643_v36  ;;  %v1684_v5 = vadd.f32 %v4257_v47, %v1683_v50  ;;  %vm1685_vm6 = vweird.f32 %v5316_v1 }
 0x4da   : > { %v1678_v55 = vsel %vm5365_vm11, %v1677_v39, %v1673_v7  ;;  %v3542_v20 = vmul.f32 -1.442695, %v5404_v21  ;;  %vm1687_vm0 = vmor %vm1685_vm6, %vm1686_vm5  ;;  %vm1690_vm13 = vcmp.eq.f32.partialorder %v1689_v45, 8.507059e+37  ;;  %v1692_v18 = vor.u32 1.1754944e-38, %v1691_v10 }
 0x4db   : > { %3761 = vrot.lane.b32.xlu0 %v3760_v24, %s6913_s19  ;;  %3786 = vrot.lane.b32.xlu2 %v3785_v29, %s6951_s23  ;;  %v1688_v31 = vsel %vm1687_vm0, %v4257_v47, %v1684_v5  ;;  %v1874_v61 = vmul.f32 %v5115_v37, %v5231_v43  ;;  %v1875_v34 = vmul.f32 %v5298_v35, %v5251_v23  ;;  %v5489_v38 = vmul.f32 0.0, %v5112_v49 }
 0x4dc   : > { %v1915_v1 = vmul.f32 %v5334_v28, %v5251_v23  ;;  %v5444_v16 = vmul.f32 %v1633_v12, %v5194_v44  ;;  %v5447_v8 = vmul.f32 %v1648_v26, %v5197_v27  ;;  %v1693_v39 = vsel %vm1690_vm13, %v1692_v18, %v1688_v31 }
 0x4dd   : > { %v3795_v7 = vpack.i.bf16 %v1755_v11, %v5277_v0  ;;  %v1663_v47 = vsel %vm5386_vm7, %v5340_v9, %v1658_v13  ;;  %v5455_v43 = vmul.f32 %v1678_v55, %v5172_v15  ;;  %v5458_v57 = vmul.f32 %v1693_v39, %v5224_v30 }
 0x4de   : > { %v3770_v44 = vpack.i.bf16 %v1875_v34, %v1874_v61  ;;  %v3790_v4 = vpack.i.bf16 %v5309_v33, %v1915_v1  ;;  %v5462_v27 = vmul.f32 %v1663_v47, %v5184_v42  ;;  %4258 = vpow2.f32 %v3542_v20 }
 0x4df   : > { %v1877_v58 = vmul.f32 %v5115_v37, %v5444_v16  ;;  %v1878_v9 = vmul.f32 %v5298_v35, %v5447_v8  ;;  %v1818_v15 = vmul.f32 %v5287_v17, %v5444_v16  ;;  %v1778_v30 = vmul.f32 %v5237_v46, %v5444_v16 }
 0x4e0   : > { %v1779_v42 = vmul.f32 %v5105_v62, %v5447_v8  ;;  %v5478_v59 = vmul.f32 %v5334_v28, %v5455_v43  ;;  %v5482_v56 = vmul.f32 %v5293_v51, %v5458_v57  ;;  %v5486_v22 = vmul.f32 %v5266_v48, %v5462_v27 }
 0x4e1   : > { %3796 = vrot.lane.b32.xlu1 %v3795_v7, %s6926_s4  ;;  %v3825_v19 = vpack.i.bf16 %v1878_v9, %v1877_v58  ;;  %v3810_v10 = vpack.i.bf16 %v1818_v15, %v5489_v38  ;;  %v1781_v50 = vmul.f32 %v5237_v46, %v5462_v27  ;;  %v5505_v24 = vmul.f32 %v5266_v48, %v5458_v57 }
 0x4e2   : > { %v3895_v2 = vpack.i.bf16 %v5309_v33, %v5478_v59  ;;  %v3925_v14 = vpack.i.bf16 %v5482_v56, %v5274_v3  ;;  %v3900_v45 = vpack.i.bf16 %v5486_v22, %v5277_v0  ;;  %v3800_v54 = vpack.i.bf16 %v1779_v42, %v1778_v30 }
 0x4e3   : > { %3771 = vrot.lane.b32.xlu0 %v3770_v44, %s6928_s3  ;;  %3791 = vrot.lane.b32.xlu2 %v3790_v4, %s6951_s23  ;;  %v1857_v29 = vmul.f32 %v5110_v52, %v5444_v16  ;;  %v1858_v13 = vmul.f32 %v5306_v32, %v5447_v8  ;;  %v1798_v11 = vmul.f32 %v5293_v51, %v5444_v16  ;;  %vm6954_vm5 = vcmask 777216  }
 0x4e4   : > { %v4259_v36 = vpop.eup %4258  ;;  %v1799_v12 = vmul.f32 %v5103_v60, %v5447_v8  ;;  %v3850_v26 = vpack.i.bf16 %v1781_v50, %v5242_v40  ;;  %v3955_v5 = vpack.i.bf16 %v5505_v24, %v5277_v0  ;;  %v1900_v18 = vmul.f32 %v5133_v53, %v5462_v27  ;;  %vm6955_vm12 = vmmov %vm6954_vm5 }
 0x4e5   : > { %v1589_v49 = vadd.f32 1.0, %v4259_v36  ;;  %v3830_v55 = vpack.i.bf16 %v1858_v13, %v1857_v29  ;;  %v1901_v31 = vmul.f32 %v5258_v25, %v5455_v43  ;;  %v1917_v34 = vmul.f32 %v5137_v41, %v5444_v16 }
 0x4e6   : > { %v3805_v20 = vpack.i.bf16 %v1799_v12, %v1798_v11  ;;  %v1918_v1 = vmul.f32 %v5334_v28, %v5447_v8  ;;  %v1819_v39 = vmul.f32 %v5108_v63, %v5447_v8  ;;  %v1801_v58 = vmul.f32 %v5293_v51, %v5462_v27  ;;  %v6952_v12 = vld [vmem:[#allocation11_spill] sm:$0xff] }
 0x4e7   : > { %4260 = vrcp.f32 %v1589_v49  ;;  %v3865_v7 = vpack.i.bf16 %v1901_v31, %v1900_v18  ;;  %v1802_v9 = vmul.f32 %v5103_v60, %v5455_v43  ;;  %v1758_v30 = vmul.f32 %v5266_v48, %v5444_v16 }
 0x4e8   : > { %v3840_v44 = vpack.i.bf16 %v1918_v1, %v1917_v34  ;;  %v3815_v4 = vpack.i.bf16 %v5489_v38, %v1819_v39  ;;  %v1897_v42 = vmul.f32 %v5133_v53, %v5444_v16  ;;  %v1860_v50 = vmul.f32 %v5110_v52, %v5462_v27 }
 0x4e9   : > { %3826 = vrot.lane.b32.xlu1 %v3825_v19, %s6928_s3  ;;  %v1898_v19 = vmul.f32 %v5258_v25, %v5447_v8  ;;  %v3870_v36 = vpack.i.bf16 %v1802_v9, %v1801_v58  ;;  %v3845_v51 = vpack.i.bf16 %v1758_v30, %v5277_v0  ;;  %v1861_v29 = vmul.f32 %v5306_v32, %v5455_v43 }
 0x4ea   : > { %v1706_v13 = vand.u32 2147483648, %v1589_v49  ;;  %v1828_v11 = vmul.f32 %v5444_v16, %v4628_v6  ;;  %vm1700_vm7 = vweird.f32 %v1589_v49  ;;  %v1824_v16 = vmul.f32 %v5287_v17, %v5458_v57 }
 0x4eb   : > { %3811 = vrot.lane.b32.xlu0 %v3810_v10, %s6913_s19  ;;  %3801 = vrot.lane.b32.xlu2 %v3800_v54, %s6914_s18  ;;  %v3820_v54 = vpack.i.bf16 %v1898_v19, %v1897_v42  ;;  %v3880_v18 = vpack.i.bf16 %v1861_v29, %v1860_v50  ;;  %v1881_v42 = vmul.f32 %v5298_v35, %v5455_v43  ;;  %v6953_v29 = vld [vmem:[#allocation13_spill] sm:$0xff]  ;;  %vm6957_vm3 = vcmask 769024  }
 0x4ec   : > { %v1707_v34 = vor.u32 1.1754944e-38, %v1706_v13  ;;  %v1923_v22 = vmul.f32 %v5137_v41, %v5458_v57  ;;  %vm6958_vm6 = vcmask 1031168  }
 0x4ed   : > { %v4261_v61 = vpop.eup %4260  ;;  %vm6959_vm0 = vmmov %vm6958_vm6 }
 0x4ee   : > { %v1696_v47 = vmul.f32 %v4261_v61, %v1589_v49  ;;  %vm1701_vm11 = vweird.f32 %v4261_v61  ;;  %vm6960_vm13 = vmmov %vm6959_vm0 }
 0x4ef   : > { %vm1702_vm15 = vmor %vm1700_vm7, %vm1701_vm11  ;;  %vm6963_vm7 = vcmask 785408  }
 0x4f0   : > { %v1697_v15 = vsub.f32 1.0, %v1696_v47  ;;  %v1821_v47 = vmul.f32 %v5287_v17, %v5462_v27  ;;  %v1880_v17 = vmul.f32 %v5115_v37, %v5462_v27  ;;  %vm6961_vm11 = vmmov %vm6959_vm0 }
 0x4f1   : > { %3851 = vrot.lane.b32.xlu1 %v3850_v26, %s6914_s18  ;;  %v1829_v26 = vmul.f32 %v5447_v8, %v6952_v12 }
 0x4f2   : > { %v1698_v10 = vmul.f32 %v4261_v61, %v1697_v15  ;;  %v1903_v15 = vmul.f32 %v5133_v53, %v5458_v57 }
 0x4f3   : > { %3831 = vrot.lane.b32.xlu0 %v3830_v55, %s6930_s22  ;;  %3806 = vrot.lane.b32.xlu2 %v3805_v20, %s6938_s21  ;;  %v1782_v55 = vmul.f32 %v5105_v62, %v5455_v43  ;;  %v1704_v20 = vand.u32 2147483647, %v1589_v49  ;;  %v3835_v1 = vpack.i.bf16 %v1829_v26, %v1828_v11  ;;  %v1830_v49 = vmul.f32 %v5462_v27, %v4628_v6 }
 0x4f4   : > { %v1699_v48 = vadd.f32 %v4261_v61, %v1698_v10 }
 0x4f5   : > { %v3855_v39 = vpack.i.bf16 %v5242_v40, %v1782_v55  ;;  %vm1705_vm10 = vcmp.eq.f32.partialorder %v1704_v20, 8.507059e+37  ;;  %v1822_v40 = vmul.f32 %v5108_v63, %v5455_v43 }
 0x4f6   : > { %v1703_v31 = vsel %vm1702_vm15, %v4261_v61, %v1699_v48  ;;  %v1831_v61 = vmul.f32 %v5455_v43, %v6952_v12  ;;  %v3719_v48 = vunpack.i.h.bf16 %v6953_v29  ;;  %vm6964_vm15 = vmmov %vm6963_vm7 }
 0x4f7   : > { %v3860_v9 = vpack.i.bf16 %v1822_v40, %v1821_v47 }
 0x4f8   : > { %v3885_v58 = vpack.i.bf16 %v1831_v61, %v1830_v49 }
 0x4f9   : > { %3866 = vrot.lane.b32.xlu1 %v3865_v7, %s6929_s30  ;;  %v1708_v7 = vsel %vm1705_vm10, %v1707_v34, %v1703_v31  ;;  %vm6965_vm10 = vmmov %vm6963_vm7 }
 0x4fb   : > { %3841 = vrot.lane.b32.xlu0 %v3840_v44, %s6951_s23  ;;  %3816 = vrot.lane.b32.xlu2 %v3815_v4, %s6913_s19  ;;  %v5574_v44 = vmul.f32 %v1708_v7, %v5404_v21  ;;  %v3910_v4 = vpack.i.bf16 %v1824_v16, %v5489_v38  ;;  %v1920_v21 = vmul.f32 %v5137_v41, %v5462_v27 }
 0x4fd   : > { %v1904_v30 = vmul.f32 %v5258_v25, %v5574_v44  ;;  %v3890_v53 = vpack.i.bf16 %v1920_v21, %v5309_v33  ;;  %v1832_v25 = vmul.f32 %v5458_v57, %v4628_v6  ;;  %v1833_v27 = vmul.f32 %v5574_v44, %v6952_v12 }
 0x4fe   : > { %v1825_v56 = vmul.f32 %v5108_v63, %v5574_v44  ;;  %v1784_v6 = vmul.f32 %v5237_v46, %v5458_v57  ;;  %v1863_v46 = vmul.f32 %v5110_v52, %v5458_v57  ;;  %v1883_v52 = vmul.f32 %v5115_v37, %v5458_v57 }
 0x4ff   : > { %v3920_v19 = vpack.i.bf16 %v1904_v30, %v1903_v15 }
 0x500   : > { %v3915_v33 = vpack.i.bf16 %v5489_v38, %v1825_v56  ;;  %v1864_v38 = vmul.f32 %v5306_v32, %v5574_v44  ;;  %v1884_v32 = vmul.f32 %v5298_v35, %v5574_v44 }
 0x501   : > { %3871 = vrot.lane.b32.xlu1 %v3870_v36, %s6938_s21  ;;  %v3875_v36 = vpack.i.bf16 %v1881_v42, %v1880_v17 }
 0x502   : > { %v3935_v12 = vpack.i.bf16 %v1884_v32, %v1883_v52 }
 0x503   : > { %3846 = vrot.lane.b32.xlu0 %v3845_v51, %s6926_s4  ;;  %3821 = vrot.lane.b32.xlu2 %v3820_v54, %s6929_s30  ;;  %v3945_v51 = vpack.i.bf16 %v1833_v27, %v1832_v25  ;;  %v3940_v54 = vpack.i.bf16 %v1864_v38, %v1863_v46 }
 0x509   : > { %3881 = vrot.lane.b32.xlu1 %v3880_v18, %s6930_s22 }
 0x50b   : > { %3836 = vrot.lane.b32.xlu2 %v3835_v1, %s6912_s0  ;;  %3856 = vrot.lane.b32.xlu0 %v3855_v39, %s6914_s18 }
 0x511   : > { %3911 = vrot.lane.b32.xlu1 %v3910_v4, %s6913_s19 }
 0x513   : > { %3886 = vrot.lane.b32.xlu0 %v3885_v58, %s6912_s0  ;;  %3861 = vrot.lane.b32.xlu2 %v3860_v9, %s6913_s19 }
 0x519   : > { %3921 = vrot.lane.b32.xlu1 %v3920_v19, %s6929_s30 }
 0x51b   : > { %3891 = vrot.lane.b32.xlu0 %v3890_v53, %s6951_s23  ;;  %3876 = vrot.lane.b32.xlu2 %v3875_v36, %s6928_s3 }
 0x521   : > { %3926 = vrot.lane.b32.xlu1 %v3925_v14, %s6938_s21  ;;  %v1785_v14 = vmul.f32 %v5105_v62, %v5574_v44  ;;  %v1805_v62 = vmul.f32 %v5103_v60, %v5574_v44 }
 0x523   : > { %3896 = vrot.lane.b32.xlu0 %v3895_v2, %s6951_s23  ;;  %3901 = vrot.lane.b32.xlu2 %v3900_v45, %s6926_s4  ;;  %v3905_v59 = vpack.i.bf16 %v1785_v14, %v1784_v6  ;;  %v1924_v2 = vmul.f32 %v5334_v28, %v5574_v44  ;;  %v3930_v28 = vpack.i.bf16 %v5274_v3, %v1805_v62 }
 0x525   : > { %v3767_v10 = vpop.permute.xlu2 %3766  ;;  %v3950_v45 = vpack.i.bf16 %v1924_v2, %v1923_v22 }
 0x526   : > { %v3769_v41 = vunpack.i.h.bf16 %v3767_v10  ;;  %v3768_v50 = vunpack.i.l.bf16 %v3767_v10 }
 0x528   : > { %v5644_v13 = vsel %vm6954_vm5, %v3769_v41, %v3719_v48  ;;  %v2210_v3 = vsel %vm6955_vm12, %v3768_v50, %v3769_v41  ;;  %vm6966_vm5 = vcmask 900096  }
 0x529   : > { %3946 = vrot.lane.b32.xlu1 %v3945_v51, %s6912_s0  ;;  %v3965_v11 = vpack.i.bf16 %v2210_v3, %v3768_v50  ;;  %vm6967_vm12 = vmmov %vm6966_vm5 }
 0x52b   : > { %3916 = vrot.lane.b32.xlu0 %v3915_v33, %s6913_s19  ;;  %3906 = vrot.lane.b32.xlu2 %v3905_v59, %s6914_s18  ;;  %v6962_v59 = vld [vmem:[#allocation17_spill] sm:$0xff]  ;;  %s3586_s18 = sshll.u32 %s4493_s28, 6  ;;  %s4322_s28 = scalar_lea.hbm %s6829_s17, 128 }
 0x52c   : > { %v3729_v22 = vunpack.i.h.bf16 %v6962_v59  ;;  %s3416_s19 = scalar_lea.hbm %s6829_s17, %s3586_s18 }
 0x52d   : > { %v5624_v63 = vpop.permute.xlu2 %3776  ;;  %s3419_s26 = sshll.u32 %s3416_s19, 4  ;;  %s3420_s26 = int_to_ptr.hbm [resolvable:$true] %s3419_s26 }
 0x52e   : > { %v3779_v48 = vunpack.i.h.bf16 %v5624_v63  ;;  %v3778_v52 = vunpack.i.l.bf16 %v5624_v63  ;;  %s4316_s30 = sshra.s32 %s3420_s26, 4  ;;  %s4317_s30 = int_to_ptr.hbm [resolvable:$true] %s4316_s30 }
 0x52f   : > { %p4323_p0 = scmp.lt.s32.totalorder %s4317_s30, %s6829_s17 }
 0x531   : > { %3951 = vrot.lane.b32.xlu1 %v3950_v45, %s6951_s23 }
 0x533   : > { %3931 = vrot.lane.b32.xlu0 %v3930_v28, %s6938_s21  ;;  %3941 = vrot.lane.b32.xlu2 %v3940_v54, %s6930_s22  ;;  %s4318_s22 = scalar_lea.hbm %s4317_s30, 64 }
 0x534   : > { %p4319_p11 = scmp.ne.s32.totalorder %s4317_s30, %s4318_s22  ;;  %p4324_p1 = scmp.lt.s32.totalorder %s4322_s28, %s4318_s22 }
 0x535   : > { %v5637_v60 = vpop.permute.xlu2 %3786 }
 0x536   : > { %v3789_v20 = vunpack.i.h.bf16 %v5637_v60  ;;  %p4320_p12 = pnand %p4319_p11, %p4510_p5  ;;  %p4325_p2 = por %p4324_p1, %p4323_p0 }
 0x538   : > { %p4321_p13 = pneg %p4320_p12 }
 0x539   : > { %3956 = vrot.lane.b32.xlu1 %v3955_v5, %s6926_s4  ;;  %v6956_v5 = vld [vmem:[#allocation12_spill] sm:$0xff] }
 0x53a   : > { %v5663_v31 = vmul.f32 %v6956_v5, %v5447_v8  ;;  %v1762_v21 = vmul.f32 %v6956_v5, %v5455_v43  ;;  %p4326_p3 = pnand %p4325_p2, %p4321_p13 }
 0x53b   : > { %v3742_v26 = vpop.permute.xlu1 %3741  ;;  %3936 = vrot.lane.b32.xlu0 %v3935_v12, %s6928_s3  ;;  %3966 = vrot.lane.b32.xlu2 %v3965_v11, %s6926_s4 }
 0x53c   : > { %v3744_v37 = vunpack.i.h.bf16 %v3742_v26  ;;  %v3743_v57 = vunpack.i.l.bf16 %v3742_v26 }
 0x53d   : > { %v5653_v35 = vpop.permute.xlu0 %3746  ;;  %v5655_v55 = vpop.permute.xlu2 %3791 }
 0x53e   : > { %v6877_v18 = vunpack.i.l.bf16 %v5653_v35  ;;  %v6878_v0 = vunpack.i.l.bf16 %v5655_v55  ;;  %v1962_v24 = vsel %vm803_vm4, %v3743_v57, %v3744_v37 }
 0x540   : > { %v5670_v34 = vsel %vm6957_vm3, %v3789_v20, %v6878_v0  ;;  %v1963_v1 = vsel %vm803_vm4, %v3744_v37, %v6877_v18  ;;  %vm6969_vm3 = vcmask 777216  }
 0x541   : > { %v3980_v16 = vpack.i.bf16 %v1963_v1, %v1962_v24  ;;  %v2122_v24 = vsel %vm6966_vm5, %v3778_v52, %v3779_v48 }
 0x543   : > { %v3752_v7 = vpop.permute.xlu1 %3751  ;;  %3981 = vrot.lane.b32.xlu1 %v3980_v16, %s6926_s4 }
 0x544   : > { %v3754_v8 = vunpack.i.h.bf16 %v3752_v7  ;;  %v3753_v49 = vunpack.i.l.bf16 %v3752_v7  ;;  %v3985_v7 = vpack.i.bf16 %v2122_v24, %v3778_v52 }
 0x545   : > { %v5678_v61 = vpop.permute.xlu0 %3756  ;;  %v5680_v47 = vpop.permute.xlu2 %3801 }
 0x546   : > { %v3758_v40 = vunpack.i.l.bf16 %v5678_v61  ;;  %v2006_v4 = vsel %vm6958_vm6, %v3753_v49, %v3754_v8  ;;  %v3759_v36 = vunpack.i.h.bf16 %v5678_v61  ;;  %vm6970_vm6 = vmmov %vm6969_vm3 }
 0x548   : > { %v2007_v58 = vsel %vm6959_vm0, %v3754_v8, %v3758_v40  ;;  %vm6971_vm0 = vmmov %vm6969_vm3 }
 0x549   : > { %v3970_v9 = vpack.i.bf16 %v2007_v58, %v2006_v4 }
 0x54b   : > { %v3782_v15 = vpop.permute.xlu1 %3781  ;;  %3971 = vrot.lane.b32.xlu2 %v3970_v9, %s6926_s4 }
 0x54c   : > { %v3784_v30 = vunpack.i.h.bf16 %v3782_v15  ;;  %v3783_v32 = vunpack.i.l.bf16 %v3782_v15 }
 0x54d   : > { %v5690_v17 = vpop.permute.xlu0 %3761  ;;  %v5694_v19 = vpop.permute.xlu2 %3806 }
 0x54e   : > { %v5692_v42 = vpack.i.bf16 %v3784_v30, %v1762_v21  ;;  %v6880_v53 = vunpack.i.h.bf16 %v5694_v19  ;;  %v3808_v25 = vunpack.i.l.bf16 %v5694_v19  ;;  %v3764_v6 = vunpack.i.h.bf16 %v5690_v17 }
 0x54f   : > { %v3763_v14 = vunpack.i.l.bf16 %v5690_v17  ;;  %v2082_v1 = vsel %vm758_vm1, %v3783_v32, %v3784_v30  ;;  %v1765_v30 = vmul.f32 %v6956_v5, %v5574_v44 }
 0x550   : > { %v2008_v27 = vsel %vm6960_vm13, %v3759_v36, %v3808_v25  ;;  %v2009_v10 = vsel %vm6961_vm11, %v3808_v25, %v6880_v53  ;;  %v3990_v8 = vpack.i.bf16 %v2082_v1, %v3783_v32  ;;  %v3788_v32 = vunpack.i.l.bf16 %v5637_v60  ;;  %vm6972_vm13 = vmmov %vm6963_vm7 }
 0x551   : > { %v4005_v56 = vpack.i.bf16 %v2009_v10, %v2008_v27  ;;  %v2051_v41 = vsel %vm773_vm2, %v3763_v14, %v3764_v6  ;;  %vm6973_vm11 = vcmask 769024   ;;  %v3749_v60 = vunpack.i.h.bf16 %v5653_v35 }
 0x553   : > { %v5703_v43 = vpop.permute.xlu1 %3796  ;;  %4006 = vrot.lane.b32.xlu1 %v4005_v56, %s6926_s4 }
 0x555   : > { %v3772_v51 = vpop.permute.xlu0 %3771  ;;  %v5708_v33 = vpop.permute.xlu2 %3816 }
 0x556   : > { %v3774_v2 = vunpack.i.h.bf16 %v3772_v51  ;;  %v3773_v62 = vunpack.i.l.bf16 %v3772_v51  ;;  %v3819_v46 = vunpack.i.h.bf16 %v5708_v33  ;;  %v6879_v9 = vunpack.i.l.bf16 %v5708_v33 }
 0x558   : > { %v2166_v38 = vsel %vm6963_vm7, %v3773_v62, %v3774_v2  ;;  %v2050_v45 = vsel %vm773_vm2, %v3819_v46, %v3763_v14  ;;  %v5718_v28 = vsel %vm6964_vm15, %v3774_v2, %v3729_v22  ;;  %vm6974_vm7 = vmmov %vm6973_vm11 }
 0x559   : > { %v3975_v54 = vpack.i.bf16 %v2166_v38, %v3773_v62  ;;  %v3960_v50 = vpack.i.bf16 %v2051_v41, %v2050_v45  ;;  %v6968_v45 = vld [vmem:[#allocation14_spill] sm:$0xff]  ;;  %vm6976_vm15 = vmmov %vm6965_vm10 }
 0x55a   : > { %v3714_v41 = vunpack.i.h.bf16 %v6968_v45 }
 0x55b   : > { %v3827_v3 = vpop.permute.xlu1 %3826  ;;  %3961 = vrot.lane.b32.xlu0 %v3960_v50, %s6926_s4  ;;  %3976 = vrot.lane.b32.xlu2 %v3975_v54, %s6926_s4  ;;  %v3728_v54 = vunpack.i.l.bf16 %v6962_v59 }
 0x55c   : > { %v3829_v11 = vunpack.i.h.bf16 %v3827_v3  ;;  %v3828_v12 = vunpack.i.l.bf16 %v3827_v3 }
 0x55d   : > { %v3812_v26 = vpop.permute.xlu0 %3811  ;;  %v5725_v57 = vpop.permute.xlu2 %3821 }
 0x55e   : > { %v2168_v37 = vsel %vm6965_vm10, %v3828_v12, %v3829_v11  ;;  %v3814_v49 = vunpack.i.h.bf16 %v3812_v26  ;;  %v3813_v4 = vunpack.i.l.bf16 %v3812_v26  ;;  %v3824_v2 = vunpack.i.h.bf16 %v5725_v57 }
 0x55f   : > { %v4010_v16 = vpack.i.bf16 %v2168_v37, %v3828_v12  ;;  %v3823_v44 = vunpack.i.l.bf16 %v5725_v57  ;;  %v5769_v59 = vsel %vm6972_vm13, %v3829_v11, %v3728_v54  ;;  %vm6981_vm13 = vcmask 1031168  }
 0x560   : > { %v2052_v15 = vsel %vm773_vm2, %v3813_v4, %v3814_v49  ;;  %v2053_v25 = vsel %vm773_vm2, %v3814_v49, %v6879_v9 }
 0x561   : > { %4011 = vrot.lane.b32.xlu1 %v4010_v16, %s6926_s4  ;;  %v3995_v22 = vpack.i.bf16 %v2053_v25, %v2052_v15  ;;  %v2212_v3 = vsel %vm6969_vm3, %v3823_v44, %v3824_v2  ;;  %v3804_v25 = vunpack.i.h.bf16 %v5680_v47  ;;  %vm6979_vm3 = vmmov %vm6974_vm7 }
 0x563   : > { %v5732_v58 = vpop.permute.xlu1 %3851  ;;  %3986 = vrot.lane.b32.xlu0 %v3985_v7, %s6926_s4  ;;  %3991 = vrot.lane.b32.xlu2 %v3990_v8, %s6926_s4 }
 0x564   : > { %v3853_v57 = vunpack.i.l.bf16 %v5732_v58 }
 0x565   : > { %v5738_v21 = vpop.permute.xlu0 %3831  ;;  %v3837_v36 = vpop.permute.xlu2 %3836 }
 0x566   : > { %v3834_v27 = vunpack.i.h.bf16 %v5738_v21  ;;  %v3833_v10 = vunpack.i.l.bf16 %v5738_v21  ;;  %v3839_v56 = vunpack.i.h.bf16 %v3837_v36  ;;  %v3838_v46 = vunpack.i.l.bf16 %v3837_v36 }
 0x568   : > { %v2124_v14 = vsel %vm6967_vm12, %v3833_v10, %v3834_v27  ;;  %v5750_v51 = vpack.i.bf16 %v3839_v56, %v1765_v30  ;;  %v2083_v1 = vsel %vm758_vm1, %v3838_v46, %v3839_v56  ;;  %v4000_v30 = vpack.i.bf16 %v2212_v3, %v3823_v44  ;;  %vm6978_vm12 = vmmov %vm6971_vm0 }
 0x569   : > { %v4020_v62 = vpack.i.bf16 %v2124_v14, %v3833_v10  ;;  %v4025_v11 = vpack.i.bf16 %v2083_v1, %v3838_v46  ;;  %v3803_v10 = vunpack.i.l.bf16 %v5680_v47 }
 0x56b   : > { %v3867_v38 = vpop.permute.xlu1 %3866  ;;  %4021 = vrot.lane.b32.xlu0 %v4020_v62, %s6926_s4  ;;  %3996 = vrot.lane.b32.xlu2 %v3995_v22, %s6926_s4  ;;  %v1964_v62 = vsel %vm803_vm4, %v3749_v60, %v3803_v10  ;;  %v1965_v46 = vsel %vm803_vm4, %v3803_v10, %v3804_v25 }
 0x56c   : > { %v3869_v50 = vunpack.i.h.bf16 %v3867_v38  ;;  %v3868_v52 = vunpack.i.l.bf16 %v3867_v38 }
 0x56d   : > { %v3842_v12 = vpop.permute.xlu0 %3841  ;;  %v5766_v24 = vpop.permute.xlu2 %3861 }
 0x56e   : > { %v5763_v26 = vsel %vm6970_vm6, %v3869_v50, %v3714_v41  ;;  %v2214_v37 = vsel %vm6971_vm0, %v3868_v52, %v3869_v50  ;;  %v3844_v16 = vunpack.i.h.bf16 %v3842_v12  ;;  %v3843_v7 = vunpack.i.l.bf16 %v3842_v12  ;;  %vm6980_vm6 = vmmov %vm6979_vm3 }
 0x56f   : > { %v4040_v8 = vpack.i.bf16 %v2214_v37, %v3868_v52  ;;  %v4015_v52 = vpack.i.bf16 %v1965_v46, %v1964_v62  ;;  %v6977_v37 = vld [vmem:[#allocation18_spill] sm:$0xff] }
 0x570   : > { %v5773_v49 = vsel %vm6973_vm11, %v3843_v7, %v3844_v16  ;;  %v5777_v4 = vpack.i.bf16 %v3789_v20, %v3843_v7  ;;  %v5780_v15 = vsel %vm6974_vm7, %v3844_v16, %v3788_v32  ;;  %v6975_v20 = vld [vmem:[#allocation15_spill] sm:$0xff]  ;;  %v3734_v1 = vunpack.i.h.bf16 %v6977_v37  ;;  %vm6982_vm11 = vmmov %vm6981_vm13 }
 0x571   : > { %4041 = vrot.lane.b32.xlu1 %v4040_v8, %s6926_s4  ;;  %v3724_v14 = vunpack.i.h.bf16 %v6975_v20  ;;  %v3864_v7 = vunpack.i.h.bf16 %v5766_v24  ;;  %vm6984_vm7 = vmmov %vm6966_vm5  ;;  %v3733_v63 = vunpack.i.l.bf16 %v6977_v37 }
 0x573   : > { %v5787_v56 = vpop.permute.xlu1 %3871  ;;  %4026 = vrot.lane.b32.xlu0 %v4025_v11, %s6926_s4  ;;  %4001 = vrot.lane.b32.xlu2 %v4000_v30, %s6926_s4  ;;  %v4030_v30 = vpack.i.bf16 %v5644_v13, %v3864_v7  ;;  %v1756_v13 = vmul.f32 %v6956_v5, %v5251_v23 }
 0x575   : > { %v5793_v22 = vpop.permute.xlu0 %3846  ;;  %v3877_v44 = vpop.permute.xlu2 %3876 }
 0x576   : > { %v3879_v38 = vunpack.i.h.bf16 %v3877_v44  ;;  %v3878_v41 = vunpack.i.l.bf16 %v3877_v44  ;;  %v3713_v44 = vunpack.i.l.bf16 %v6968_v45 }
 0x578   : > { %v2171_v54 = vsel %vm6976_vm15, %v3879_v38, %v3724_v14  ;;  %v2170_v50 = vsel %vm6965_vm10, %v3878_v41, %v3879_v38 }
 0x579   : > { %v5803_v32 = vpack.i.bf16 %v2171_v54, %v3764_v6  ;;  %v4050_v3 = vpack.i.bf16 %v2170_v50, %v3878_v41 }
 0x57b   : > { %v5805_v12 = vpop.permute.xlu1 %3881  ;;  %4051 = vrot.lane.b32.xlu0 %v4050_v3, %s6926_s4  ;;  %4016 = vrot.lane.b32.xlu2 %v4015_v52, %s6926_s4 }
 0x57c   : > { %v3884_v16 = vunpack.i.h.bf16 %v5805_v12 }
 0x57d   : > { %v5812_v8 = vpop.permute.xlu0 %3856  ;;  %v5825_v60 = vpop.permute.xlu2 %3901 }
 0x57e   : > { %v2127_v17 = vsel %vm6966_vm5, %v3884_v16, %v3734_v1  ;;  %v3858_v23 = vunpack.i.l.bf16 %v5812_v8  ;;  %vm6986_vm5 = vmmov %vm6971_vm0 }
 0x57f   : > { %v5819_v6 = vpack.i.bf16 %v2127_v17, %v3758_v40  ;;  %v3863_v17 = vunpack.i.l.bf16 %v5766_v24 }
 0x583   : > { %v3912_v11 = vpop.permute.xlu1 %3911  ;;  %4031 = vrot.lane.b32.xlu2 %v4030_v30, %s6926_s4  ;;  %v3718_v30 = vunpack.i.l.bf16 %v6953_v29  ;;  %v3854_v29 = vunpack.i.h.bf16 %v5732_v58 }
 0x584   : > { %v3914_v24 = vunpack.i.h.bf16 %v3912_v11  ;;  %v3913_v0 = vunpack.i.l.bf16 %v3912_v11 }
 0x585   : > { %v5823_v10 = vpop.permute.xlu0 %3886  ;;  %v5845_v45 = vpop.permute.xlu2 %3906 }
 0x586   : > { %v3889_v53 = vunpack.i.h.bf16 %v5823_v10  ;;  %v3888_v36 = vunpack.i.l.bf16 %v5823_v10 }
 0x58b   : > { %v5827_v14 = vpop.permute.xlu1 %3921 }
 0x58c   : > { %v3924_v62 = vunpack.i.h.bf16 %v5827_v14 }
 0x58d   : > { %v5831_v46 = vpop.permute.xlu0 %3891  ;;  %v5855_v5 = vpop.permute.xlu2 %3941 }
 0x58e   : > { %v5836_v61 = vsel %vm6978_vm12, %v3924_v62, %v3713_v44  ;;  %v3894_v40 = vunpack.i.h.bf16 %v5831_v46  ;;  %vm6988_vm12 = vmmov %vm6984_vm7 }
 0x58f   : > { %v6994_v37 = vpack.i.bf16 %v5763_v26, %v5836_v61  ;;  %v2276_v26 = vld [vmem:[%s6822_s10 + $0x10] sm:$0xff]  ;;  %v6998_v61 = vunpack.i.l.bf16 %v5708_v33  ;;  %v6999_v33 = vunpack.i.l.bf16 %v5655_v55 }
 0x590   : > { %v5843_v41 = vpack.i.bf16 %v3894_v40, %v1756_v13 }
 0x595   : > { %v3897_v54 = vpop.permute.xlu0 %3896 }
 0x596   : > { %v3899_v50 = vunpack.i.h.bf16 %v3897_v54  ;;  %v3898_v52 = vunpack.i.l.bf16 %v3897_v54  ;;  %v2055_v54 = vsel %vm773_vm2, %v3863_v17, %v3864_v7  ;;  %v3873_v7 = vunpack.i.l.bf16 %v5787_v56 }
 0x598   : > { %v5848_v3 = vsel %vm6979_vm3, %v3894_v40, %v3898_v52  ;;  %v5851_v1 = vsel %vm6980_vm6, %v3898_v52, %v3899_v50  ;;  %v2213_v40 = vsel %vm6971_vm0, %v3824_v2, %v3718_v30  ;;  %v3874_v2 = vunpack.i.h.bf16 %v5787_v56  ;;  %v5871_v30 = vpop.permute.xlu2 %3966 }
 0x59a   : > { %v2011_v58 = vsel %vm6981_vm13, %v3873_v7, %v3874_v2  ;;  %vm6997_vm13 = vmmov %vm6965_vm10 }
 0x59d   : > { %v3917_v44 = vpop.permute.xlu0 %3916 }
 0x59e   : > { %v3919_v13 = vunpack.i.h.bf16 %v3917_v44  ;;  %v3918_v39 = vunpack.i.l.bf16 %v3917_v44 }
 0x5a0   : > { %v2054_v50 = vsel %vm773_vm2, %v3919_v13, %v3863_v17  ;;  %v4070_v52 = vpack.i.bf16 %v2213_v40, %v3918_v39  ;;  %v2057_v17 = vsel %vm773_vm2, %v3914_v24, %v3918_v39  ;;  %v1967_v13 = vsel %vm803_vm4, %v3854_v29, %v3858_v23 }
 0x5a1   : > { %v4035_v18 = vpack.i.bf16 %v2055_v54, %v2054_v50  ;;  %v1966_v40 = vsel %vm803_vm4, %v3853_v57, %v3854_v29  ;;  %v3927_v54 = vpop.permute.xlu1 %3926  ;;  %v3883_v39 = vunpack.i.l.bf16 %v5805_v12 }
 0x5a2   : > { %4071 = vrot.lane.b32.xlu0 %v4070_v52, %s6926_s4  ;;  %v4055_v52 = vpack.i.bf16 %v1967_v13, %v1966_v40 }
 0x5a3   : > { %4036 = vrot.lane.b32.xlu2 %v4035_v18, %s6926_s4  ;;  %v2056_v18 = vsel %vm773_vm2, %v3913_v0, %v3914_v24  ;;  %v3929_v0 = vunpack.i.h.bf16 %v3927_v54  ;;  %v3928_v24 = vunpack.i.l.bf16 %v3927_v54  ;;  %vm6983_vm2 = vmmov %vm6982_vm11  ;;  %v3923_v54 = vunpack.i.l.bf16 %v5827_v14 }
 0x5a4   : > { %v4075_v50 = vpack.i.bf16 %v2057_v17, %v2056_v18  ;;  %v2084_v17 = vsel %vm758_vm1, %v3888_v36, %v3889_v53  ;;  %vm6985_vm15 = vmmov %vm6983_vm2 }
 0x5a5   : > { %v3932_v44 = vpop.permute.xlu0 %3931  ;;  %v5888_v57 = vpop.permute.xlu2 %3971  ;;  %v2012_v13 = vsel %vm6985_vm15, %v3928_v24, %v3929_v0  ;;  %v4065_v18 = vpack.i.bf16 %v2084_v17, %v3888_v36  ;;  %v2216_v36 = vsel %vm6986_vm5, %v3923_v54, %v3924_v62  ;;  %v3859_v24 = vunpack.i.h.bf16 %v5812_v8 }
 0x5a6   : > { %v3934_v11 = vunpack.i.h.bf16 %v3932_v44  ;;  %v3933_v9 = vunpack.i.l.bf16 %v3932_v44 }
 0x5a8   : > { %v2010_v56 = vsel %vm6982_vm11, %v3934_v11, %v3873_v7  ;;  %v2013_v29 = vsel %vm6983_vm2, %v3929_v0, %v3933_v9  ;;  %v2126_v7 = vsel %vm6984_vm7, %v3883_v39, %v3884_v16  ;;  %v4105_v0 = vpack.i.bf16 %v5769_v59, %v3933_v9  ;;  %v6987_v59 = vld [vmem:[#allocation16_spill] sm:$0xff] }
 0x5a9   : > { %v4045_v38 = vpack.i.bf16 %v2011_v58, %v2010_v56  ;;  %v4085_v11 = vpack.i.bf16 %v2013_v29, %v2012_v13  ;;  %v3909_v56 = vunpack.i.h.bf16 %v5845_v45  ;;  %v3947_v17 = vpop.permute.xlu1 %3946  ;;  %v3738_v13 = vunpack.i.l.bf16 %v6987_v59 }
 0x5aa   : > { %4076 = vrot.lane.b32.xlu0 %v4075_v50, %s6926_s4  ;;  %v3949_v9 = vunpack.i.h.bf16 %v3947_v17  ;;  %v3739_v21 = vunpack.i.h.bf16 %v6987_v59  ;;  %vm7023_vm2 = vcmask 1043456  }
 0x5ab   : > { %4046 = vrot.lane.b32.xlu1 %v4045_v38, %s6926_s4  ;;  %4056 = vrot.lane.b32.xlu2 %v4055_v52, %s6926_s4  ;;  %v4060_v38 = vpack.i.bf16 %v2126_v7, %v3883_v39  ;;  %v3908_v52 = vunpack.i.l.bf16 %v5845_v45  ;;  %v4080_v39 = vpack.i.bf16 %v2216_v36, %v3923_v54  ;;  %v4110_v45 = vpack.i.bf16 %v5718_v28, %v3874_v2 }
 0x5ac   : > { %v4130_v28 = vpack.i.bf16 %v3949_v9, %v3804_v25  ;;  %v3944_v2 = vunpack.i.h.bf16 %v5855_v5  ;;  %v6993_v36 = vunpack.i.h.bf16 %v5694_v19 }
 0x5ad   : > { %v5896_v44 = vpop.permute.xlu0 %3936  ;;  %v1968_v14 = vsel %vm803_vm4, %v3859_v24, %v3908_v52  ;;  %v1969_v62 = vsel %vm803_vm4, %v3908_v52, %v3909_v56  ;;  %vm6989_vm4 = vmmov %vm6984_vm7 }
 0x5ae   : > { %v3939_v40 = vunpack.i.h.bf16 %v5896_v44  ;;  %v3938_v58 = vunpack.i.l.bf16 %v5896_v44  ;;  %v4095_v7 = vpack.i.bf16 %v1969_v62, %v1968_v14  ;;  %vm6990_vm3 = vmmov %vm6989_vm4  ;;  %v3794_v14 = vunpack.i.h.bf16 %v5655_v55 }
 0x5af   : > { %v2123_v47 = vsel %vm6990_vm3, %v3779_v48, %v3739_v21  ;;  %v6991_v48 = vpack.i.bf16 %v5780_v15, %v5773_v49  ;;  %vm6992_vm6 = vmmov %vm6990_vm3  ;;  %v3723_v49 = vunpack.i.l.bf16 %v6975_v20  ;;  %v3969_v62 = vunpack.i.h.bf16 %v5871_v30 }
 0x5b0   : > { %v2172_v12 = vsel %vm6965_vm10, %v3938_v58, %v3939_v40  ;;  %v4125_v25 = vpack.i.bf16 %v2123_v47, %v3858_v23  ;;  %v2129_v23 = vsel %vm6992_vm6, %v3944_v2, %v3733_v63  ;;  %vm3313_vm10 = vcmask 31744  }
 0x5b1   : > { %v4090_v50 = vpack.i.bf16 %v2172_v12, %v3938_v58  ;;  %v3943_v58 = vunpack.i.l.bf16 %v5855_v5  ;;  %v3948_v5 = vunpack.i.l.bf16 %v3947_v17  ;;  %v7001_v17 = vunpack.i.l.bf16 %v5653_v35 }
 0x5b2   : > { %4086 = vrot.lane.b32.xlu0 %v4085_v11, %s6926_s4  ;;  %v2125_v11 = vsel %vm6988_vm12, %v3834_v27, %v3738_v13  ;;  %v2277_v13 = vld [vmem:[%s6822_s10 + $0x18] sm:$0xff]  ;;  %v7002_v35 = vpack.i.bf16 %v5851_v1, %v5848_v3 }
 0x5b3   : > { %4061 = vrot.lane.b32.xlu1 %v4060_v38, %s6926_s4  ;;  %4066 = vrot.lane.b32.xlu2 %v4065_v18, %s6926_s4  ;;  %v4120_v18 = vpack.i.bf16 %v2125_v11, %v3909_v56  ;;  %v2128_v27 = vsel %vm6989_vm4, %v3943_v58, %v3944_v2  ;;  %v2275_v2 = vld [vmem:[%s6822_s10 + $0x8] sm:$0xff] }
 0x5b5   : > { %v5908_v16 = vpop.permute.xlu2 %3976 }
 0x5ba   : > { %4091 = vrot.lane.b32.xlu0 %v4090_v50, %s6926_s4  ;;  %v4185_v50 = vpack.i.bf16 %v2129_v23, %v6993_v36 }
 0x5bb   : > { %4081 = vrot.lane.b32.xlu1 %v4080_v39, %s6926_s4  ;;  %4106 = vrot.lane.b32.xlu2 %v4105_v0, %s6926_s4 }
 0x5bd   : > { %v5922_v29 = vpop.permute.xlu2 %3991 }
 0x5c2   : > { %4096 = vrot.lane.b32.xlu0 %v4095_v7, %s6926_s4 }
 0x5c3   : > { %4111 = vrot.lane.b32.xlu1 %v4110_v45, %s6926_s4  ;;  %4116 = vrot.lane.b32.xlu2 %v5819_v6, %s6926_s4  ;;  %v4135_v6 = vpack.i.bf16 %v2128_v27, %v3943_v58 }
 0x5c5   : > { %v5933_v38 = vpop.permute.xlu2 %3996 }
 0x5ca   : > { %4101 = vrot.lane.b32.xlu0 %v5803_v32, %s6926_s4  ;;  %v2085_v32 = vsel %vm758_vm1, %v3948_v5, %v3949_v9  ;;  %vm6995_vm1 = vcmask 769024   ;;  %v4155_v9 = vpack.i.bf16 %v3889_v53, %v7001_v17  ;;  %v2274_v53 = vld [vmem:[%s6822_s10] sm:$0xff] }
 0x5cb   : > { %4121 = vrot.lane.b32.xlu1 %v4120_v18, %s6926_s4  ;;  %4131 = vrot.lane.b32.xlu2 %v4130_v28, %s6926_s4  ;;  %v4140_v12 = vpack.i.bf16 %v2085_v32, %v3948_v5  ;;  %vm6996_vm0 = vmmov %vm6995_vm1  ;;  %v7003_v18 = vpack.i.bf16 %v5670_v34, %v5663_v31  ;;  %v3999_v32 = vunpack.i.h.bf16 %v5933_v38 }
 0x5cc   : > { %vm7000_vm11 = vmmov %vm6996_vm0 }
 0x5cd   : > { %v5950_v54 = vpop.permute.xlu2 %4001  ;;  %v5979_v15 = vpop.permute.xlu0 %3961  ;;  %v2255_v7 = vsel %vm7000_vm11, %v6999_v33, %v3794_v14  ;;  %v3973_v14 = vunpack.i.l.bf16 %v5888_v57 }
 0x5ce   : > { %v3963_v36 = vunpack.i.l.bf16 %v5979_v15 }
 0x5d2   : > { %4126 = vrot.lane.b32.xlu0 %v4125_v25, %s6926_s4 }
 0x5d3   : > { %4136 = vrot.lane.b32.xlu1 %v4135_v6, %s6926_s4  ;;  %4161 = vrot.lane.b32.xlu2 %v5750_v51, %s6926_s4  ;;  %v3952_v51 = vpop.permute.xlu1 %3951 }
 0x5d4   : > { %v3954_v56 = vunpack.i.h.bf16 %v3952_v51  ;;  %v3953_v52 = vunpack.i.l.bf16 %v3952_v51  ;;  %v3964_v51 = vunpack.i.h.bf16 %v5979_v15 }
 0x5d5   : > { %v5965_v8 = vpop.permute.xlu2 %4016 }
 0x5d6   : > { %v2260_v39 = vsel %vm6996_vm0, %v3953_v52, %v3954_v56  ;;  %v4195_v45 = vpack.i.bf16 %v3953_v52, %v2255_v7 }
 0x5da   : > { %4171 = vrot.lane.b32.xlu0 %v5692_v42, %s6926_s4  ;;  %v3893_v42 = vunpack.i.l.bf16 %v5831_v46  ;;  %v2173_v46 = vsel %vm6997_vm13, %v3939_v40, %v3723_v49  ;;  %v6000_v40 = vpop.permute.xlu0 %3986  ;;  %v2550_v49 = vsel %vm874_vm8, %v3963_v36, %v3964_v51 }
 0x5db   : > { %4141 = vrot.lane.b32.xlu1 %v4140_v12, %s6926_s4  ;;  %4176 = vrot.lane.b32.xlu2 %v6991_v48, %s6926_s4  ;;  %v6010_v59 = vpop.permute.xlu1 %3956  ;;  %v3998_v12 = vunpack.i.l.bf16 %v5933_v38 }
 0x5dc   : > { %v2261_v19 = vsel %vm6995_vm1, %v3954_v56, %v3893_v42 }
 0x5dd   : > { %v4032_v0 = vpop.permute.xlu2 %4031  ;;  %v4190_v24 = vpack.i.bf16 %v2261_v19, %v2260_v39  ;;  %v2552_v52 = vsel %vm874_vm8, %v3998_v12, %v3999_v32 }
 0x5de   : > { %v4034_v20 = vunpack.i.h.bf16 %v4032_v0  ;;  %v4033_v63 = vunpack.i.l.bf16 %v4032_v0 }
 0x5e0   : > { %v5998_v44 = vsel %vm874_vm8, %v3969_v62, %v4034_v20  ;;  %v6891_v20 = vunpack.i.h.bf16 %v5888_v57 }
 0x5e2   : > { %4186 = vrot.lane.b32.xlu0 %v4185_v50, %s6926_s4  ;;  %v6016_v11 = vpop.permute.xlu0 %4021 }
 0x5e3   : > { %4146 = vrot.lane.b32.xlu1 %v6994_v37, %s6926_s4  ;;  %4201 = vrot.lane.b32.xlu2 %v5843_v41, %s6926_s4  ;;  %v4150_v41 = vpack.i.bf16 %v2173_v46, %v6998_v61  ;;  %v6022_v55 = vpop.permute.xlu1 %3981 }
 0x5ea   : > { %4191 = vrot.lane.b32.xlu0 %v4190_v24, %s6926_s4  ;;  %v6027_v10 = vpop.permute.xlu0 %4026 }
 0x5eb   : > { %4151 = vrot.lane.b32.xlu1 %v4150_v41, %s6926_s4  ;;  %2290 = vperm.xlu2 %3709, %v2276_v26   ;;  %v6033_v28 = vpop.permute.xlu1 %4006 }
 0x5ec   : > { %v6894_v26 = vunpack.i.h.bf16 %v6033_v28  ;;  %v4008_v61 = vunpack.i.l.bf16 %v6033_v28 }
 0x5ee   : > { %v2544_v7 = vsel %vm874_vm8, %v4008_v61, %v6894_v26  ;;  %v4018_v61 = vunpack.i.l.bf16 %v5965_v8 }
 0x5f2   : > { %4196 = vrot.lane.b32.xlu0 %v4195_v45, %s6926_s4  ;;  %v6037_v3 = vpop.permute.xlu0 %4051 }
 0x5f3   : > { %4156 = vrot.lane.b32.xlu1 %v4155_v9, %s6926_s4  ;;  %v6039_v1 = vpop.permute.xlu1 %4011  ;;  %v2542_v9 = vsel %vm874_vm8, %v3973_v14, %v6891_v20  ;;  %v4028_v20 = vunpack.i.l.bf16 %v6027_v10 }
 0x5f4   : > { %v4014_v14 = vunpack.i.h.bf16 %v6039_v1 }
 0x5fa   : > { %2295 = vperm.xlu0 %3707, %v2277_v13  }
 0x5fb   : > { %4166 = vrot.lane.b32.xlu1 %v7002_v35, %s6926_s4  ;;  %v6046_v21 = vpop.permute.xlu1 %4041 }
 0x5fc   : > { %v4044_v13 = vunpack.i.h.bf16 %v6046_v21  ;;  %v4043_v35 = vunpack.i.l.bf16 %v6046_v21  ;;  %v6284_v21 = vld [vmem:[%s6821_s9 + $0x20] sm:$0xff] }
 0x5fd   : > { %v4037_v31 = vpop.permute.xlu2 %4036 }
 0x5fe   : > { %v4039_v34 = vunpack.i.h.bf16 %v4037_v31  ;;  %v4038_v47 = vunpack.i.l.bf16 %v4037_v31  ;;  %v4004_v31 = vunpack.i.h.bf16 %v5950_v54 }
 0x600   : > { %v2554_v50 = vsel %vm874_vm8, %v4038_v47, %v4039_v34  ;;  %v2555_v56 = vsel %vm874_vm8, %v4039_v34, %v4033_v63  ;;  %v4003_v34 = vunpack.i.l.bf16 %v5950_v54  ;;  %v3968_v47 = vunpack.i.l.bf16 %v5871_v30 }
 0x602   : > { %2280 = vperm.xlu0 %3707, %v2274_v53   ;;  %v2584_v63 = vsel %vm874_vm8, %v4003_v34, %v4004_v31  ;;  %v3978_v34 = vunpack.i.l.bf16 %v5908_v16 }
 0x603   : > { %4181 = vrot.lane.b32.xlu1 %v7003_v18, %s6926_s4 }
 0x605   : > { %v6062_v42 = vpop.permute.xlu2 %4056 }
 0x60b   : > { %4206 = vrot.lane.b32.xlu1 %v5777_v4, %s6926_s4  ;;  %s554_s4 = sand.u32 1, %s4356_s25  }
 0x60c   : > { %s3498_s21 = sshll.u32 %s554_s4, 6  ;;  %s3405_s3 = scalar_lea.sflag [#allocation5], %s554_s4 }
 0x60d   : > { %v6097_v53 = vpop.permute.xlu2 %4066  ;;  %s6643_s23 = scalar_lea.vmem [#allocation4], %s3498_s21 }
 0x60e   : > { %s3417_s20 = sshll.u32 %s6643_s23, 4  ;;  %s3418_s20 = int_to_ptr.vmem [resolvable:$true] %s3417_s20 }
 0x613   : > { %2285 = vperm.xlu1 %3708, %v2275_v2  }
 0x614   : > { %v6044_v58 = vpop.permute.xlu0 %4071 }
 0x615   : > { %v4073_v25 = vunpack.i.l.bf16 %v6044_v58 }
 0x61c   : > { %v4077_v27 = vpop.permute.xlu0 %4076 }
 0x61d   : > { %v4079_v4 = vunpack.i.h.bf16 %v4077_v27  ;;  %v4078_v6 = vunpack.i.l.bf16 %v4077_v27  ;;  %v6049_v5 = vpop.permute.xlu1 %4046 }
 0x61e   : > { %v4049_v19 = vunpack.i.h.bf16 %v6049_v5  ;;  %v4048_v39 = vunpack.i.l.bf16 %v6049_v5 }
 0x61f   : > { %v2556_v48 = vsel %vm874_vm8, %v4078_v6, %v4079_v4  ;;  %v2557_v23 = vsel %vm874_vm8, %v4079_v4, %v4073_v25  ;;  %v2586_v25 = vsel %vm874_vm8, %v4043_v35, %v4044_v13 }
 0x620   : > { %2682 = vmatpush.msrb.mxu2 %v2556_v48  ;;  %2769 = vmatpush.msra.mxu1 %v2557_v23  ;;  %v2546_v33 = vsel %vm874_vm8, %v4048_v39, %v4049_v19  ;;  %v6887_v48 = vunpack.i.h.bf16 %v6062_v42  ;;  %v4058_v23 = vunpack.i.l.bf16 %v6062_v42  ;;  %v2582_v39 = vsel %vm874_vm8, %v3968_v47, %v3969_v62 }
 0x621   : > { %v6885_v62 = vunpack.i.h.bf16 %v6022_v55  ;;  %v6883_v47 = vunpack.i.h.bf16 %v6010_v59 }
 0x622   : > { %2683 = vmatpush.msrb.mxu2 %v2554_v50  ;;  %2770 = vmatpush.msra.mxu1 %v2555_v56  ;;  %v2538_v35 = vsel %vm874_vm8, %v4058_v23, %v6887_v48 }
 0x624   : > { %v6064_v37 = vpop.permute.xlu0 %4086  ;;  %2684 = vmatpush.msrb.mxu2 %v2552_v52  ;;  %v4054_v52 = vunpack.i.h.bf16 %v6037_v3 }
 0x625   : > { %v4089_v46 = vunpack.i.h.bf16 %v6064_v37  ;;  %v4088_v0 = vunpack.i.l.bf16 %v6064_v37  ;;  %v6073_v24 = vpop.permute.xlu1 %4061 }
 0x626   : > { %2685 = vmatpush.msrb.mxu2 %v2550_v49  ;;  %v4053_v49 = vunpack.i.l.bf16 %v6037_v3 }
 0x627   : > { %v2548_v41 = vsel %vm874_vm8, %v4088_v0, %v4089_v46  ;;  %v6886_v0 = vunpack.i.h.bf16 %v5965_v8 }
 0x628   : > { %2686 = vmatpush.msrb.mxu2 %v2548_v41 }
 0x62a   : > { %2687 = vmatpush.msrb.mxu2 %v2546_v33  ;;  %v4013_v33 = vunpack.i.l.bf16 %v6039_v1 }
 0x62c   : > { %v6088_v45 = vpop.permute.xlu0 %4091  ;;  %2688 = vmatpush.msrb.mxu2 %v2544_v7  ;;  %v6135_v7 = vpop.permute.xlu2 %4106  ;;  %v2576_v23 = vsel %vm874_vm8, %v4013_v33, %v4014_v14  ;;  %v3848_v33 = vunpack.i.l.bf16 %v5793_v22 }
 0x62d   : > { %v6090_v17 = vpop.permute.xlu1 %4081  ;;  %v4094_v4 = vunpack.i.h.bf16 %v6088_v45  ;;  %v4093_v6 = vunpack.i.l.bf16 %v6088_v45 }
 0x62e   : > { %v4084_v18 = vunpack.i.h.bf16 %v6090_v17  ;;  %v4083_v2 = vunpack.i.l.bf16 %v6090_v17  ;;  %2689 = vmatpush.msrb.mxu2 %v2542_v9  ;;  %v3983_v9 = vunpack.i.l.bf16 %v6022_v55 }
 0x62f   : > { %v2580_v30 = vsel %vm874_vm8, %v4093_v6, %v4094_v4  ;;  %v2536_v6 = vsel %vm874_vm8, %v4018_v61, %v6886_v0 }
 0x630   : > { %v2588_v27 = vsel %vm874_vm8, %v4083_v2, %v4084_v18  ;;  %v6898_v2 = vunpack.i.h.bf16 %v5908_v16 }
 0x631   : > { %2711 = vmatpush.msrb.mxu3 %v2588_v27  ;;  %v2578_v27 = vsel %vm874_vm8, %v4053_v49, %v4054_v52  ;;  %v3903_v49 = vunpack.i.l.bf16 %v5825_v60 }
 0x632   : > { %v2574_v61 = vsel %vm874_vm8, %v3978_v34, %v6898_v2 }
 0x633   : > { %2712 = vmatpush.msrb.mxu3 %v2586_v25  ;;  %v3958_v25 = vunpack.i.l.bf16 %v6010_v59 }
 0x634   : > { %v6112_v12 = vpop.permute.xlu0 %4096 }
 0x635   : > { %v6888_v36 = vunpack.i.h.bf16 %v6112_v12  ;;  %v4098_v50 = vunpack.i.l.bf16 %v6112_v12  ;;  %v6121_v56 = vpop.permute.xlu1 %4111  ;;  %2713 = vmatpush.msrb.mxu3 %v2584_v63 }
 0x636   : > { %v4114_v38 = vunpack.i.h.bf16 %v6121_v56 }
 0x637   : > { %2714 = vmatpush.msrb.mxu3 %v2582_v39  ;;  %v2540_v41 = vsel %vm874_vm8, %v4098_v50, %v6888_v36  ;;  %v6882_v50 = vunpack.i.h.bf16 %v5825_v60 }
 0x638   : > { %2690 = vmatpush.msrb.mxu2 %v2540_v41  ;;  %v2534_v41 = vsel %vm874_vm8, %v3983_v9, %v6885_v62 }
 0x639   : > { %2715 = vmatpush.msrb.mxu3 %v2580_v30  ;;  %v6881_v30 = vunpack.i.h.bf16 %v5793_v22  ;;  %v2530_v9 = vsel %vm874_vm8, %v3903_v49, %v6882_v50  ;;  %v4023_v50 = vunpack.i.l.bf16 %v6016_v11 }
 0x63a   : > { %2691 = vmatpush.msrb.mxu2 %v2538_v35  ;;  %v2532_v35 = vsel %vm874_vm8, %v3958_v25, %v6883_v47  ;;  %v6190_v25 = vld [vmem:[%s6821_s9] sm:$0xff] }
 0x63b   : > { %2716 = vmatpush.msrb.mxu3 %v2578_v27  ;;  %v6884_v27 = vunpack.i.h.bf16 %v5703_v43  ;;  %v2528_v34 = vsel %vm874_vm8, %v3848_v33, %v6881_v30 }
 0x63c   : > { %v6155_v63 = vpop.permute.xlu0 %4101  ;;  %2692 = vmatpush.msrb.mxu2 %v2536_v6  ;;  %v3798_v6 = vunpack.i.l.bf16 %v5703_v43 }
 0x63d   : > { %v6162_v39 = vpop.permute.xlu1 %4121  ;;  %2717 = vmatpush.msrb.mxu3 %v2576_v23  ;;  %v6180_v23 = vpop.permute.xlu2 %4116 }
 0x63e   : > { %2693 = vmatpush.msrb.mxu2 %v2534_v41  ;;  %v2526_v49 = vsel %vm874_vm8, %v3798_v6, %v6884_v27  ;;  %v6892_v6 = vunpack.i.h.bf16 %v6000_v40  ;;  %v3988_v27 = vunpack.i.l.bf16 %v6000_v40  ;;  %v4118_v37 = vunpack.i.l.bf16 %v6180_v23 }
 0x63f   : > { %2718 = vmatpush.msrb.mxu3 %v2574_v61  ;;  %v4119_v5 = vunpack.i.h.bf16 %v6180_v23 }
 0x640   : > { %2694 = vmatpush.msrb.mxu2 %v2532_v35  ;;  %v6889_v35 = vunpack.i.h.bf16 %v6073_v24 }
 0x642   : > { %2695 = vmatpush.msrb.mxu2 %v2530_v9  ;;  %v4063_v9 = vunpack.i.l.bf16 %v6073_v24 }
 0x644   : > { %v6185_v41 = vpop.permute.xlu0 %4126  ;;  %2696 = vmatpush.msrb.mxu2 %v2528_v34  ;;  %v6890_v34 = vunpack.i.h.bf16 %v6016_v11  ;;  %v2570_v62 = vsel %vm874_vm8, %v4063_v9, %v6889_v35  ;;  %v4068_v9 = vunpack.i.l.bf16 %v6097_v53 }
 0x645   : > { %v6192_v61 = vpop.permute.xlu1 %4136 }
 0x646   : > { %v6893_v33 = vunpack.i.h.bf16 %v6192_v61  ;;  %v4138_v30 = vunpack.i.l.bf16 %v6192_v61  ;;  %2697 = vmatpush.msrb.mxu2 %v2526_v49  ;;  %v6212_v49 = vpop.permute.xlu2 %4131  ;;  %v2568_v48 = vsel %vm874_vm8, %v4023_v50, %v6890_v34  ;;  %v6897_v34 = vunpack.i.h.bf16 %v6027_v10 }
 0x647   : > { %2698 = vmatmul.f32.vlgmr.msrb.gmra.mxu2 %v6190_v25 }
 0x648   : > { %v2572_v47 = vsel %vm874_vm8, %v4138_v30, %v6893_v33  ;;  %v6222_v30 = vld [vmem:[%s6821_s9 + $0x18] sm:$0xff] }
 0x649   : > { %2719 = vmatpush.msrb.mxu3 %v2572_v47  ;;  %v6896_v47 = vunpack.i.h.bf16 %v6097_v53 }
 0x64b   : > { %2720 = vmatpush.msrb.mxu3 %v2570_v62  ;;  %v2566_v62 = vsel %vm874_vm8, %v3988_v27, %v6892_v6  ;;  %v6899_v27 = vunpack.i.h.bf16 %v5922_v29  ;;  %v3993_v6 = vunpack.i.l.bf16 %v5922_v29  ;;  %v2562_v33 = vsel %vm874_vm8, %v4068_v9, %v6896_v47 }
 0x64c   : > { %v6214_v0 = vpop.permute.xlu0 %4171 }
 0x64d   : > { %v6224_v36 = vpop.permute.xlu1 %4141  ;;  %2721 = vmatpush.msrb.mxu3 %v2568_v48 }
 0x64e   : > { %v6895_v35 = vunpack.i.h.bf16 %v6224_v36  ;;  %v4143_v50 = vunpack.i.l.bf16 %v6224_v36  ;;  %v6259_v9 = vpop.permute.xlu2 %4161 }
 0x64f   : > { %2701 = vmatmul.f32.gmra.mxu2 %v6222_v30  ;;  %2722 = vmatpush.msrb.mxu3 %v2566_v62  ;;  %v2560_v62 = vsel %vm874_vm8, %v4028_v20, %v6897_v34  ;;  %v2558_v20 = vsel %vm874_vm8, %v3993_v6, %v6899_v27  ;;  %v4074_v34 = vunpack.i.h.bf16 %v6044_v58  ;;  %v6279_v58 = vld [vmem:[%s6821_s9 + $0x48] sm:$0xff] }
 0x650   : > { %v2564_v48 = vsel %vm874_vm8, %v4143_v50, %v6895_v35  ;;  %v6252_v50 = vld [vmem:[%s6821_s9 + $0x30] sm:$0xff]  ;;  %v6257_v35 = vld [vmem:[%s6821_s9 + $0x8] sm:$0xff] }
 0x651   : > { %2723 = vmatpush.msrb.mxu3 %v2564_v48  ;;  %v2585_v6 = vsel %vm874_vm8, %v4004_v31, %v4074_v34  ;;  %v4104_v31 = vunpack.i.h.bf16 %v6155_v63 }
 0x653   : > { %2724 = vmatpush.msrb.mxu3 %v2562_v33 }
 0x654   : > { %v6244_v26 = vpop.permute.xlu0 %4186 }
 0x655   : > { %v4147_v48 = vpop.permute.xlu1 %4146  ;;  %2725 = vmatpush.msrb.mxu3 %v2560_v62  ;;  %v4188_v45 = vunpack.i.l.bf16 %v6244_v26  ;;  %v4189_v15 = vunpack.i.h.bf16 %v6244_v26  ;;  %v7004_v26 = vunpack.i.h.bf16 %v5908_v16  ;;  %v7006_v16 = vunpack.i.h.bf16 %v6192_v61 }
 0x656   : > { %v4149_v33 = vunpack.i.h.bf16 %v4147_v48  ;;  %v4148_v47 = vunpack.i.l.bf16 %v4147_v48  ;;  %v4133_v61 = vunpack.i.l.bf16 %v6212_v49 }
 0x657   : > { %2704 = vmatmul.f32.gmra.mxu2 %v6252_v50  ;;  %2726 = vmatpush.msrb.mxu3 %v2558_v20 }
 0x658   : > { %2727 = vmatmul.f32.vlgmr.msrb.gmra.mxu3 %v6257_v35  ;;  %v2589_v62 = vsel %vm874_vm8, %v4084_v18, %v4148_v47  ;;  %v2587_v48 = vsel %vm874_vm8, %v4044_v13, %v4149_v33  ;;  %v4103_v13 = vunpack.i.l.bf16 %v6155_v63  ;;  %v6290_v47 = vpop.permute.xlu2 %4176  ;;  %v4109_v63 = vunpack.i.h.bf16 %v6135_v7 }
 0x659   : > { %2798 = vmatpush.msra.mxu2 %v2589_v62  ;;  %v4108_v33 = vunpack.i.l.bf16 %v6135_v7  ;;  %v4113_v62 = vunpack.i.l.bf16 %v6121_v56  ;;  %v6326_v56 = vld [vmem:[%s6821_s9 + $0x38] sm:$0xff] }
 0x65a   : > { %v2577_v3 = vsel %vm874_vm8, %v4014_v14, %v4109_v63  ;;  %v4123_v14 = vunpack.i.l.bf16 %v6162_v39 }
 0x65b   : > { %2799 = vmatpush.msra.mxu2 %v2587_v48  ;;  %v2549_v7 = vsel %vm874_vm8, %v4089_v46, %v4108_v33  ;;  %v2547_v46 = vsel %vm874_vm8, %v4049_v19, %v4113_v62  ;;  %v4124_v19 = vunpack.i.h.bf16 %v6162_v39  ;;  %v7008_v39 = vunpack.i.h.bf16 %v6073_v24  ;;  %v6368_v24 = vld [vmem:[%s6821_s9 + $0x50] sm:$0xff] }
 0x65c   : > { %v4192_v2 = vpop.permute.xlu0 %4191 }
 0x65d   : > { %v4194_v20 = vunpack.i.h.bf16 %v4192_v2  ;;  %v4193_v17 = vunpack.i.l.bf16 %v4192_v2  ;;  %v4152_v27 = vpop.permute.xlu1 %4151  ;;  %2800 = vmatpush.msra.mxu2 %v2585_v6  ;;  %v7005_v6 = vunpack.i.h.bf16 %v6033_v28  ;;  %v2571_v23 = vsel %vm874_vm8, %v7008_v39, %v4119_v5  ;;  %v3312_v39 = vld.sshfl [vmem:[#allocation1 + $0x8] sm:$0xff pattern:$0x75316420] }
 0x65e   : > { %v4154_v18 = vunpack.i.h.bf16 %v4152_v27  ;;  %v4153_v54 = vunpack.i.l.bf16 %v4152_v27 }
 0x65f   : > { %2707 = vmatmul.f32.gmra.mxu2 %v6279_v58  ;;  %v2597_v34 = vsel %vm874_vm8, %v4193_v17, %v4194_v20  ;;  %v2545_v20 = vsel %vm874_vm8, %v7005_v6, %v4188_v45 }
 0x660   : > { %2801 = vmatpush.msra.mxu2 %v5998_v44  ;;  %2730 = vmatmul.f32.gmra.mxu3 %v6284_v21  ;;  %v2553_v2 = vsel %vm874_vm8, %v3999_v32, %v4153_v54  ;;  %v2581_v27 = vsel %vm874_vm8, %v4094_v4, %v4154_v18  ;;  %v2551_v44 = vsel %vm874_vm8, %v3964_v51, %v4103_v13  ;;  %v4128_v18 = vunpack.i.l.bf16 %v6185_v41 }
 0x661   : > { %2839 = vmatpush.msra.mxu3 %v2597_v34  ;;  %2771 = vmatpush.msra.mxu1 %v2553_v2  ;;  %v2579_v32 = vsel %vm874_vm8, %v4054_v52, %v4104_v31  ;;  %v2575_v52 = vsel %vm874_vm8, %v7004_v26, %v4114_v38  ;;  %v2573_v13 = vsel %vm874_vm8, %v7006_v16, %v4189_v15  ;;  %v7007_v54 = vunpack.i.h.bf16 %v5888_v57 }
 0x662   : > { %2802 = vmatpush.msra.mxu2 %v2581_v27  ;;  %v4129_v31 = vunpack.i.h.bf16 %v6185_v41  ;;  %v7009_v34 = vunpack.i.h.bf16 %v6112_v12  ;;  %v4134_v27 = vunpack.i.h.bf16 %v6212_v49  ;;  %v7010_v41 = vunpack.i.h.bf16 %v6016_v11 }
 0x663   : > { %2772 = vmatpush.msra.mxu1 %v2551_v44  ;;  %v2543_v28 = vsel %vm874_vm8, %v7007_v54, %v4118_v37  ;;  %v7011_v49 = vunpack.i.h.bf16 %v6062_v42  ;;  %v4178_v11 = vunpack.i.l.bf16 %v6290_v47  ;;  %v4173_v26 = vunpack.i.l.bf16 %v6214_v0 }
 0x664   : > { %2803 = vmatpush.msra.mxu2 %v2579_v32  ;;  %v6311_v4 = vpop.permute.xlu0 %4196  ;;  %v2541_v2 = vsel %vm874_vm8, %v7009_v34, %v4123_v14  ;;  %v2569_v33 = vsel %vm874_vm8, %v7010_v41, %v4124_v19  ;;  %v4179_v32 = vunpack.i.h.bf16 %v6290_v47  ;;  %v7016_v14 = vunpack.i.h.bf16 %v6097_v53 }
 0x665   : > { %v4199_v51 = vunpack.i.h.bf16 %v6311_v4  ;;  %v6318_v48 = vpop.permute.xlu1 %4156  ;;  %2773 = vmatpush.msra.mxu1 %v2549_v7  ;;  %v2539_v38 = vsel %vm874_vm8, %v7011_v49, %v4128_v18  ;;  %v7012_v7 = vunpack.i.h.bf16 %v6000_v40  ;;  %v7014_v40 = vunpack.i.h.bf16 %v6224_v36 }
 0x666   : > { %2804 = vmatpush.msra.mxu2 %v2577_v3  ;;  %v4158_v62 = vunpack.i.l.bf16 %v6318_v48  ;;  %v4159_v45 = vunpack.i.h.bf16 %v6318_v48  ;;  %v7013_v3 = vunpack.i.h.bf16 %v5965_v8  ;;  %v4164_v48 = vunpack.i.h.bf16 %v6259_v9 }
 0x667   : > { %2774 = vmatpush.msra.mxu1 %v2547_v46  ;;  %v2596_v1 = vsel %vm874_vm8, %v4199_v51, %v4193_v17  ;;  %v6346_v17 = vpop.permute.xlu2 %4201  ;;  %v2567_v15 = vsel %vm874_vm8, %v7012_v7, %v4129_v31  ;;  %v4163_v51 = vunpack.i.l.bf16 %v6259_v9  ;;  %v2565_v46 = vsel %vm874_vm8, %v7014_v40, %v4134_v27 }
 0x668   : > { %2805 = vmatpush.msra.mxu2 %v2575_v52  ;;  %2733 = vmatmul.f32.gmra.mxu3 %v6326_v56  ;;  %v4204_v57 = vunpack.i.h.bf16 %v6346_v17  ;;  %v2537_v37 = vsel %vm874_vm8, %v7013_v3, %v4133_v61  ;;  %v7015_v52 = vunpack.i.h.bf16 %v6022_v55  ;;  %v2563_v9 = vsel %vm874_vm8, %v7016_v14, %v4159_v45 }
 0x669   : > { %2752 = vmatpush.msrb.mxu0 %v2596_v1  ;;  %2775 = vmatpush.msra.mxu1 %v2545_v20  ;;  %v4174_v1 = vunpack.i.h.bf16 %v6214_v0  ;;  %v2593_v6 = vsel %vm874_vm8, %v4178_v11, %v4179_v32  ;;  %v7017_v36 = vunpack.i.h.bf16 %v6010_v59  ;;  %v4203_v5 = vunpack.i.l.bf16 %v6346_v17 }
 0x66a   : > { %2806 = vmatpush.msra.mxu2 %v2573_v13  ;;  %v2535_v8 = vsel %vm874_vm8, %v7015_v52, %v4158_v62  ;;  %v7018_v19 = vunpack.i.h.bf16 %v6027_v10  ;;  %v4198_v53 = vunpack.i.l.bf16 %v6311_v4  ;;  %v7019_v18 = vunpack.i.h.bf16 %v5825_v60  ;;  %v2264_v4 = vld [vmem:[%s6821_s9 + $0x10] sm:$0xff] }
 0x66b   : > { %2776 = vmatpush.msra.mxu1 %v2543_v28  ;;  %v2533_v20 = vsel %vm874_vm8, %v7017_v36, %v4163_v51  ;;  %v7020_v59 = vunpack.i.h.bf16 %v5922_v29  ;;  %v7021_v28 = vunpack.i.h.bf16 %v5793_v22  ;;  %v7022_v60 = vunpack.i.h.bf16 %v5703_v43 }
 0x66c   : > { %2807 = vmatpush.msra.mxu2 %v2571_v23  ;;  %v2561_v0 = vsel %vm874_vm8, %v7018_v19, %v4164_v48  ;;  %v2531_v54 = vsel %vm874_vm8, %v7019_v18, %v4173_v26  ;;  %v2296_v48 = vpop.permute.xlu0 %2295 }
 0x66d   : > { %v4167_v63 = vpop.permute.xlu1 %4166  ;;  %2777 = vmatpush.msra.mxu1 %v2541_v2  ;;  %v2559_v17 = vsel %vm874_vm8, %v7020_v59, %v4174_v1  ;;  %v2527_v29 = vsel %vm874_vm8, %v7022_v60, %v4203_v5 }
 0x66e   : > { %v4169_v12 = vunpack.i.h.bf16 %v4167_v63  ;;  %v4168_v44 = vunpack.i.l.bf16 %v4167_v63  ;;  %2808 = vmatpush.msra.mxu2 %v2569_v33 }
 0x66f   : > { %2778 = vmatpush.msra.mxu1 %v2539_v38  ;;  %v2291_v7 = vpop.permute.xlu2 %2290 }
 0x670   : > { %2809 = vmatpush.msra.mxu2 %v2567_v15  ;;  %2736 = vmatmul.f32.gmra.mxu3 %v6368_v24  ;;  %v2594_v42 = vsel %vm874_vm8, %v4204_v57, %v4168_v44  ;;  %v2595_v47 = vsel %vm874_vm8, %v4168_v44, %v4169_v12 }
 0x671   : > { %2753 = vmatpush.msrb.mxu0 %v2594_v42  ;;  %2779 = vmatpush.msra.mxu1 %v2537_v37 }
 0x672   : > { %2810 = vmatpush.msra.mxu2 %v2565_v46  ;;  %2840 = vmatpush.msra.mxu3 %v2595_v47 }
 0x673   : > { %2780 = vmatpush.msra.mxu1 %v2535_v8 }
 0x674   : > { %2811 = vmatpush.msra.mxu2 %v2563_v9  ;;  %2841 = vmatpush.msra.mxu3 %v2593_v6  ;;  %v2281_v19 = vpop.permute.xlu0 %2280 }
 0x675   : > { %v4182_v55 = vpop.permute.xlu1 %4181  ;;  %2781 = vmatpush.msra.mxu1 %v2533_v20 }
 0x676   : > { %v4184_v16 = vunpack.i.h.bf16 %v4182_v55  ;;  %v4183_v13 = vunpack.i.l.bf16 %v4182_v55  ;;  %2812 = vmatpush.msra.mxu2 %v2561_v0 }
 0x677   : > { %2782 = vmatpush.msra.mxu1 %v2531_v54 }
 0x678   : > { %2813 = vmatpush.msra.mxu2 %v2559_v17  ;;  %v2529_v10 = vsel %vm874_vm8, %v7021_v28, %v4183_v13  ;;  %v2591_v31 = vsel %vm874_vm8, %v4184_v16, %v4198_v53 }
 0x679   : > { %2814 = vmatmul.f32.vlgmr.msra.gmra.mxu2 %v6257_v35  ;;  %2783 = vmatpush.msra.mxu1 %v2529_v10  ;;  %v2267_v35 = vld [vmem:[%s6821_s9 + $0x28] sm:$0xff] }
 0x67a   : > { %2842 = vmatpush.msra.mxu3 %v2591_v31 }
 0x67b   : > { %3547 = vmatmul.msk.f32.vlgmr.msra.gmra.mxu3 %vm676_vm9, %v2264_v4  ;;  %2784 = vmatpush.msra.mxu1 %v2527_v29 }
 0x67c   : > { %3574 = vmatpush.msk.msrb.mxu3 %vm7023_vm2, %v3312_v39  ;;  %2785 = vmatmul.f32.vlgmr.msra.gmra.mxu1 %v6190_v25  ;;  %v2270_v25 = vld [vmem:[%s6821_s9 + $0x40] sm:$0xff] }
 0x67d   : > { %v4207_v22 = vpop.permute.xlu1 %4206 }
 0x67e   : > { %v4209_v23 = vunpack.i.h.bf16 %v4207_v22  ;;  %v4208_v61 = vunpack.i.l.bf16 %v4207_v22 }
 0x680   : > { %v2592_v34 = vsel %vm874_vm8, %v4208_v61, %v4178_v11  ;;  %v2590_v43 = vsel %vm874_vm8, %v4209_v23, %v4184_v16  ;;  %vm7024_vm8 = vmmov %vm7023_vm2 }
 0x681   : > { %2817 = vmatmul.f32.gmra.mxu2 %v6284_v21  ;;  %2754 = vmatpush.msrb.mxu0 %v2592_v34  ;;  %v2273_v21 = vld [vmem:[%s6821_s9 + $0x58] sm:$0xff] }
 0x683   : > { %3548 = vmatmul.msk.f32.gmra.mxu3 %vm676_vm9, %v2267_v35  ;;  %2755 = vmatpush.msrb.mxu0 %v2590_v43 }
 0x684   : > { %3543 = vmatmul.msk.f32.vlgmr.msrb.gmra.mxu0 %vm676_vm9, %v2264_v4  ;;  %2788 = vmatmul.f32.gmra.mxu1 %v6222_v30 }
 0x689   : > { %2820 = vmatmul.f32.gmra.mxu2 %v6326_v56 }
 0x68b   : > { %3549 = vmatmul.msk.f32.gmra.mxu3 %vm676_vm9, %v2270_v25 }
 0x68c   : > { %3544 = vmatmul.msk.f32.gmra.mxu0 %vm676_vm9, %v2267_v35  ;;  %2791 = vmatmul.f32.gmra.mxu1 %v6252_v50 }
 0x691   : > { %2823 = vmatmul.f32.gmra.mxu2 %v6368_v24  ;;  %v2286_v24 = vpop.permute.xlu1 %2285 }
 0x693   : > { %3550 = vmatmul.msk.f32.gmra.mxu3 %vm676_vm9, %v2273_v21 }
 0x694   : > { %3545 = vmatmul.msk.f32.gmra.mxu0 %vm676_vm9, %v2270_v25  ;;  %2794 = vmatmul.f32.gmra.mxu1 %v6279_v58 }
 0x69c   : > { %3546 = vmatmul.msk.f32.gmra.mxu0 %vm676_vm9, %v2273_v21 }
 0x6ca   : > { %v2699_v30 = vpop.f32.mrf.mxu2 }
 0x6cb   : > { %v2700_v18 = vadd.f32 %v2699_v30, %v2281_v19 }
 0x6d2   : > { %v2702_v2 = vpop.f32.mrf.mxu2 }
 0x6d3   : > { %v2703_v11 = vadd.f32 %v2702_v2, %v2286_v24 }
 0x6da   : > { %v2705_v57 = vpop.f32.mrf.mxu2 }
 0x6db   : > { %v2728_v56 = vpop.f32.mrf.mxu3  ;;  %v2706_v26 = vadd.f32 %v2705_v57, %v2291_v7  ;;  %v2856_v57 = vld [vmem:[%s6823_s11] sm:$0xff] }
 0x6dc   : > { %v2729_v28 = vadd.f32 %v2728_v56, %v2700_v18 }
 0x6e2   : > { %v2708_v63 = vpop.f32.mrf.mxu2 }
 0x6e3   : > { %v2731_v27 = vpop.f32.mrf.mxu3  ;;  %v2709_v53 = vadd.f32 %v2708_v63, %v2296_v48  ;;  %v2857_v63 = vld [vmem:[%s6823_s11 + $0x8] sm:$0xff] }
 0x6e4   : > { %v2732_v15 = vadd.f32 %v2731_v27, %v2703_v11 }
 0x6eb   : > { %v2734_v50 = vpop.f32.mrf.mxu3 }
 0x6ec   : > { %v2735_v1 = vadd.f32 %v2734_v50, %v2706_v26  ;;  %v2858_v50 = vld [vmem:[%s6823_s11 + $0x10] sm:$0xff]  ;;  %v4299_v26 = vld [vmem:[%s6828_s16 + $0x8] sm:$0xff] }
 0x6f3   : > { %v2737_v41 = vpop.f32.mrf.mxu3 }
 0x6f4   : > { %v2738_v54 = vadd.f32 %v2737_v41, %v2709_v53  ;;  %v2859_v41 = vld [vmem:[%s6823_s11 + $0x18] sm:$0xff]  ;;  %v3282_v53 = vld [vmem:[%s6825_s13 + $0x8] sm:$0xff] }
 0x6f9   : > { %v2786_v33 = vpop.f32.mrf.mxu1 }
 0x6fa   : > { %v2787_v16 = vadd.f32 %v2786_v33, %v2281_v19  ;;  %v2860_v33 = vld [vmem:[%s6824_s12] sm:$0xff]  ;;  %v4301_v19 = vld [vmem:[%s6828_s16 + $0x18] sm:$0xff] }
 0x6fc   : > { %v2815_v62 = vpop.f32.mrf.mxu2 }
 0x6fd   : > { %v2816_v31 = vadd.f32 %v2815_v62, %v2787_v16  ;;  %v3283_v16 = vld [vmem:[%s6825_s13 + $0x10] sm:$0xff] }
 0x6fe   : > { %v2844_v12 = vpop.f32.mrf.mxu3 }
 0x6ff   : > { %v6480_v34 = vadd.f32 %v2844_v12, %v2816_v31 }
 0x701   : > { %v2757_v44 = vpop.f32.mrf.mxu0  ;;  %v2789_v49 = vpop.f32.mrf.mxu1  ;;  %v2877_v21 = vmul.f32 %v6480_v34, %v6480_v34 }
 0x702   : > { %v2790_v38 = vadd.f32 %v2789_v49, %v2286_v24  ;;  %v6472_v29 = vadd.f32 %v2757_v44, %v2729_v28 }
 0x704   : > { %v2818_v32 = vpop.f32.mrf.mxu2  ;;  %v2876_v43 = vmul.f32 %v6472_v29, %v6472_v29  ;;  %v2864_v27 = vadd.f32 %v6480_v34, %v6472_v29 }
 0x705   : > { %v2819_v58 = vadd.f32 %v2818_v32, %v2790_v38 }
 0x706   : > { %v2847_v45 = vpop.f32.mrf.mxu3  ;;  %v2884_v2 = vadd.f32 %v2877_v21, %v2876_v43  ;;  %v2861_v43 = vld [vmem:[%s6824_s12 + $0x8] sm:$0xff]  ;;  %v3288_v21 = vld [vmem:[%s6826_s14 + $0x18] sm:$0xff] }
 0x707   : > { %v6452_v3 = vadd.f32 %v2847_v45, %v2819_v58  ;;  %v3311_v58 = vld.sshfl [vmem:[#allocation1] sm:$0xff pattern:$0x75316420] }
 0x708   : > { %v4297_v45 = vld [vmem:[%s6827_s15] sm:$0xff] }
 0x709   : > { %v2760_v51 = vpop.f32.mrf.mxu0  ;;  %v2792_v42 = vpop.f32.mrf.mxu1  ;;  %v2879_v30 = vmul.f32 %v6452_v3, %v6452_v3 }
 0x70a   : > { %v6454_v37 = vadd.f32 %v2760_v51, %v2732_v15  ;;  %v2793_v47 = vadd.f32 %v2792_v42, %v2291_v7 }
 0x70c   : > { %v2821_v40 = vpop.f32.mrf.mxu2  ;;  %v2867_v46 = vadd.f32 %v6452_v3, %v6454_v37  ;;  %v2878_v25 = vmul.f32 %v6454_v37, %v6454_v37 }
 0x70d   : > { %v2822_v52 = vadd.f32 %v2821_v40, %v2793_v47 }
 0x70e   : > { %v2850_v8 = vpop.f32.mrf.mxu3  ;;  %2868 = vadd.xlane.f32.xlu2 %v2867_v46  ;;  %v2887_v56 = vadd.f32 %v2879_v30, %v2878_v25  ;;  %v3285_v25 = vld [vmem:[%s6826_s14] sm:$0xff] }
 0x70f   : > { %v6458_v6 = vadd.f32 %v2850_v8, %v2822_v52 }
 0x711   : > { %v2763_v14 = vpop.f32.mrf.mxu0  ;;  %v2795_v9 = vpop.f32.mrf.mxu1  ;;  %v2881_v4 = vmul.f32 %v6458_v6, %v6458_v6 }
 0x712   : > { %v6460_v36 = vadd.f32 %v2763_v14, %v2735_v1  ;;  %v2796_v20 = vadd.f32 %v2795_v9, %v2296_v48  ;;  %v4298_v48 = vld [vmem:[%s6828_s16] sm:$0xff]  ;;  %v4300_v9 = vld [vmem:[%s6828_s16 + $0x10] sm:$0xff] }
 0x714   : > { %v2824_v5 = vpop.f32.mrf.mxu2  ;;  %v2870_v55 = vadd.f32 %v6458_v6, %v6460_v36  ;;  %v2880_v59 = vmul.f32 %v6460_v36, %v6460_v36 }
 0x715   : > { %v2825_v0 = vadd.f32 %v2824_v5, %v2796_v20 }
 0x716   : > { %v2853_v13 = vpop.f32.mrf.mxu3  ;;  %2871 = vadd.xlane.f32.xlu1 %v2870_v55  ;;  %v2890_v23 = vadd.f32 %v2881_v4, %v2880_v59 }
 0x717   : > { %v6466_v17 = vadd.f32 %v2853_v13, %v2825_v0  ;;  %v3281_v0 = vld [vmem:[%s6825_s13] sm:$0xff]  ;;  %v3284_v13 = vld [vmem:[%s6825_s13 + $0x18] sm:$0xff] }
 0x718   : > { %3575 = vmatmul.msk.f32.vlgmr.msrb.gmra.mxu3 %vm3313_vm10, %v3281_v0 }
 0x719   : > { %v2766_v10 = vpop.f32.mrf.mxu0  ;;  %v2883_v39 = vmul.f32 %v6466_v17, %v6466_v17 }
 0x71a   : > { %v6470_v60 = vadd.f32 %v2766_v10, %v2738_v54 }
 0x71c   : > { %v2882_v22 = vmul.f32 %v6470_v60, %v6470_v60  ;;  %v2873_v61 = vadd.f32 %v6466_v17, %v6470_v60 }
 0x71e   : > { %2891 = vadd.xlane.f32.xlu1 %v2890_v23  ;;  %2874 = vadd.xlane.f32.xlu2 %v2873_v61  ;;  %v2893_v35 = vadd.f32 %v2883_v39, %v2882_v22  ;;  %v2862_v39 = vld [vmem:[%s6824_s12 + $0x10] sm:$0xff]  ;;  %v2863_v22 = vld [vmem:[%s6824_s12 + $0x18] sm:$0xff]  ;;  %v3286_v61 = vld [vmem:[%s6826_s14 + $0x8] sm:$0xff] }
 0x720   : > { %2894 = vadd.xlane.f32.xlu0 %v2893_v35  ;;  %3576 = vmatmul.msk.f32.gmra.mxu3 %vm3313_vm10, %v3282_v53  ;;  %v3287_v35 = vld [vmem:[%s6826_s14 + $0x10] sm:$0xff] }
 0x726   : > { %2888 = vadd.xlane.f32.xlu2 %v2887_v56  ;;  %2885 = vadd.xlane.f32.xlu1 %v2884_v2 }
 0x728   : > { %2865 = vadd.xlane.f32.xlu0 %v2864_v27  ;;  %3577 = vmatmul.msk.f32.gmra.mxu3 %vm3313_vm10, %v3283_v16 }
 0x730   : > { %3578 = vmatmul.msk.f32.gmra.mxu3 %vm3313_vm10, %v3284_v13 }
 0x73c   : > { %3067 = vperm.xlu0 %3707, %v2856_v57  }
 0x73e   : > { %3077 = vperm.xlu2 %3709, %v2858_v50  }
 0x73f   : > { %3072 = vperm.xlu1 %3708, %v2857_v63  }
 0x744   : > { %3082 = vperm.xlu0 %3707, %v2859_v41  }
 0x747   : > { %3095 = vperm.xlu1 %3708, %v2860_v33  }
 0x781   : > { %v2869_v62 = vpop.xlane.xlu2 %2868 }
 0x789   : > { %v2872_v12 = vpop.xlane.xlu1 %2871 }
 0x791   : > { %v2892_v24 = vpop.xlane.xlu1 %2891  ;;  %v2875_v44 = vpop.xlane.xlu2 %2874 }
 0x792   : > { %2908 = vmatpush.msra.mxu0 %v2875_v44 }
 0x793   : > { %v2895_v49 = vpop.xlane.xlu0 %2894 }
 0x794   : > { %2909 = vmatpush.msra.mxu0 %v2872_v12  ;;  %2929 = vmatpush.msrb.mxu1 %v2895_v49 }
 0x796   : > { %2910 = vmatpush.msra.mxu0 %v2869_v62  ;;  %2930 = vmatpush.msrb.mxu1 %v2892_v24 }
 0x799   : > { %v2889_v38 = vpop.xlane.xlu2 %2888  ;;  %v2886_v32 = vpop.xlane.xlu1 %2885 }
 0x79a   : > { %2931 = vmatpush.msrb.mxu1 %v2889_v38 }
 0x79b   : > { %v2866_v11 = vpop.xlane.xlu0 %2865 }
 0x79c   : > { %2911 = vmatpush.msra.mxu0 %v2866_v11  ;;  %2932 = vmatpush.msrb.mxu1 %v2886_v32 }
 0x79d   : > { %3551 = vmatmul.msk.f32.vlgmr.msra.gmra.mxu0 %vm676_vm9, %v4297_v45  ;;  %3552 = vmatmul.msk.f32.vlgmr.msrb.gmra.mxu1 %vm676_vm9, %v4297_v45 }
 0x79e   : > { %3569 = vmatpush.msk.msra.mxu1 %vm7024_vm8, %v3311_v58 }
 0x7a1   : > { %v3078_v56 = vpop.permute.xlu2 %3077 }
 0x7a5   : > { %3570 = vmatmul.msk.f32.vlgmr.msra.gmra.mxu1 %vm3313_vm10, %v3281_v0 }
 0x7ad   : > { %3571 = vmatmul.msk.f32.gmra.mxu1 %vm3313_vm10, %v3282_v53 }
 0x7ae   : > { %v3068_v30 = vpop.permute.xlu0 %3067 }
 0x7b1   : > { %v3073_v41 = vpop.permute.xlu1 %3072 }
 0x7b5   : > { %3572 = vmatmul.msk.f32.gmra.mxu1 %vm3313_vm10, %v3283_v16 }
 0x7b6   : > { %v6566_v2 = vpop.permute.xlu0 %3082 }
 0x7b9   : > { %v3096_v49 = vpop.permute.xlu1 %3095 }
 0x7bd   : > { %3573 = vmatmul.msk.f32.gmra.mxu1 %vm3313_vm10, %v3284_v13 }
 0x81a   : > { %v2913_v7 = vpop.f32.mrf.mxu0  ;;  %v2934_v51 = vpop.f32.mrf.mxu1 }
 0x81b   : > { %v2916_v15 = vmul.f32 0.0009765625, %v2913_v7  ;;  %v2937_v42 = vmul.f32 0.0009765625, %v2934_v51 }
 0x81d   : > { %v2938_v47 = vmul.f32 %v2916_v15, %v2916_v15  ;;  %2966 = vmatpush.msrb.mxu2 %v2916_v15 }
 0x81e   : > { %3553 = vmatmul.msk.f32.vlgmr.msrb.gmra.mxu2 %vm1315_vm14, %v4298_v48 }
 0x81f   : > { %v2939_v40 = vsub.f32 %v2937_v42, %v2938_v47 }
 0x821   : > { %v2940_v46 = vadd.f32 1e-05, %v2939_v40 }
 0x823   : > { %4262 = vrsqrt.f32 %v2940_v46  ;;  %vm2947_vm7 = vweird.f32 %v2940_v46 }
 0x826   : > { %3554 = vmatmul.msk.f32.gmra.mxu2 %vm1315_vm14, %v4299_v26 }
 0x829   : > { %v4263_v52 = vpop.eup %4262 }
 0x82a   : > { %v2942_v8 = vmul.f32 %v4263_v52, %v2940_v46  ;;  %vm2948_vm9 = vweird.f32 %v4263_v52 }
 0x82b   : > { %vm2949_vm15 = vmor %vm2947_vm7, %vm2948_vm9 }
 0x82c   : > { %v2943_v1 = vmul.f32 %v4263_v52, %v2942_v8 }
 0x82e   : > { %v2944_v14 = vmul.f32 0.5, %v2943_v1  ;;  %3555 = vmatmul.msk.f32.gmra.mxu2 %vm1315_vm14, %v4300_v9 }
 0x830   : > { %v2945_v20 = vsub.f32 1.5, %v2944_v14 }
 0x832   : > { %v2946_v5 = vmul.f32 %v4263_v52, %v2945_v20 }
 0x834   : > { %v2950_v55 = vsel %vm2949_vm15, %v4263_v52, %v2946_v5 }
 0x835   : > { %2995 = vmatpush.msrb.mxu0 %v2950_v55 }
 0x836   : > { %3556 = vmatmul.msk.f32.gmra.mxu2 %vm1315_vm14, %v4301_v19  ;;  %3557 = vmatmul.msk.f32.vlgmr.msrb.gmra.mxu0 %vm1315_vm14, %v4298_v48 }
 0x83e   : > { %3558 = vmatmul.msk.f32.gmra.mxu0 %vm1315_vm14, %v4299_v26 }
 0x846   : > { %3559 = vmatmul.msk.f32.gmra.mxu0 %vm1315_vm14, %v4300_v9 }
 0x84e   : > { %3560 = vmatmul.msk.f32.gmra.mxu0 %vm1315_vm14, %v4301_v19 }
 0x8a1   : > { %v2968_v18 = vpop.f32.mrf.mxu2 }
 0x8a2   : > { %3011 = vperm.xlu0 %3707, %v2968_v18  }
 0x8a9   : > { %v2971_v54 = vpop.f32.mrf.mxu2 }
 0x8aa   : > { %3016 = vperm.xlu2 %3709, %v2971_v54  }
 0x8b1   : > { %v2974_v59 = vpop.f32.mrf.mxu2 }
 0x8b2   : > { %3021 = vperm.xlu1 %3708, %v2974_v59  }
 0x8b3   : > { %v2997_v28 = vpop.f32.mrf.mxu0 }
 0x8b4   : > { %3039 = vperm.xlu2 %3709, %v2997_v28  }
 0x8b9   : > { %v2977_v10 = vpop.f32.mrf.mxu2 }
 0x8ba   : > { %3026 = vperm.xlu0 %3707, %v2977_v10  }
 0x8bb   : > { %v3000_v31 = vpop.f32.mrf.mxu0 }
 0x8c2   : > { %3044 = vperm.xlu0 %3707, %v3000_v31  }
 0x8c3   : > { %v3003_v4 = vpop.f32.mrf.mxu0 }
 0x8c4   : > { %3049 = vperm.xlu1 %3708, %v3003_v4  }
 0x8ca   : > { %3105 = vperm.xlu0 %3707, %v2862_v39  }
 0x8cb   : > { %v3006_v23 = vpop.f32.mrf.mxu0 }
 0x8cc   : > { %3110 = vperm.xlu1 %3708, %v2863_v22   ;;  %3054 = vperm.xlu2 %3709, %v3006_v23  }
 0x8d2   : > { %3296 = vperm.xlu0 %3707, %v3286_v61  }
 0x8d4   : > { %3301 = vperm.xlu1 %3708, %v3287_v35   ;;  %3100 = vperm.xlu2 %3709, %v2861_v43   ;;  %v3347_v43 = vpop.f32.mrf.mxu1 }
 0x8dc   : > { %3291 = vperm.xlu2 %3709, %v3285_v25  }
 0x8e4   : > { %3306 = vperm.xlu2 %3709, %v3288_v21  }
 0x904   : > { %v3017_v27 = vpop.permute.xlu2 %3016 }
 0x905   : > { %v3031_v42 = vsub.f32 %v6454_v37, %v3017_v27  ;;  %v3032_v47 = vsub.f32 %v6452_v3, %v3017_v27 }
 0x90e   : > { %v3040_v33 = vpop.permute.xlu2 %3039 }
 0x914   : > { %v3012_v57 = vpop.permute.xlu0 %3011 }
 0x915   : > { %v3029_v50 = vsub.f32 %v6472_v29, %v3012_v57  ;;  %v3030_v63 = vsub.f32 %v6480_v34, %v3012_v57 }
 0x917   : > { %v3057_v62 = vmul.f32 %v3040_v33, %v3029_v50  ;;  %v3058_v12 = vmul.f32 %v3040_v33, %v3030_v63 }
 0x919   : > { %v3085_v24 = vmul.f32 %v3068_v30, %v3057_v62  ;;  %v3086_v44 = vmul.f32 %v3068_v30, %v3058_v12 }
 0x91b   : > { %v6570_v38 = vadd.f32 %v3096_v49, %v3085_v24  ;;  %v6572_v32 = vadd.f32 %v3096_v49, %v3086_v44 }
 0x91d   : > { %v3561_v11 = vmul.f32 -1.442695, %v6570_v38  ;;  %v3562_v58 = vmul.f32 -1.442695, %v6572_v32 }
 0x91f   : > { %4264 = vpow2.f32 %v3561_v11 }
 0x920   : > { %4266 = vpow2.f32 %v3562_v58 }
 0x924   : > { %v3022_v29 = vpop.permute.xlu1 %3021 }
 0x925   : > { %v4265_v7 = vpop.eup %4264  ;;  %v3033_v40 = vsub.f32 %v6460_v36, %v3022_v29  ;;  %v3034_v46 = vsub.f32 %v6458_v6, %v3022_v29 }
 0x926   : > { %v3055_v34 = vpop.permute.xlu2 %3054  ;;  %v4267_v15 = vpop.eup %4266  ;;  %v6576_v51 = vadd.f32 1.0, %v4265_v7 }
 0x927   : > { %v6580_v48 = vadd.f32 1.0, %v4267_v15 }
 0x928   : > { %4268 = vrcp.f32 %v6576_v51  ;;  %vm3158_vm14 = vweird.f32 %v6576_v51  ;;  %v3164_v53 = vand.u32 2147483648, %v6576_v51 }
 0x929   : > { %4270 = vrcp.f32 %v6580_v48  ;;  %v3177_v31 = vand.u32 2147483647, %v6580_v48  ;;  %v3179_v4 = vand.u32 2147483648, %v6580_v48  ;;  %vm3173_vm12 = vweird.f32 %v6580_v48 }
 0x92a   : > { %v3165_v44 = vor.u32 1.1754944e-38, %v3164_v53 }
 0x92b   : > { %vm3178_vm0 = vcmp.eq.f32.partialorder %v3177_v31, 8.507059e+37  ;;  %v3180_v29 = vor.u32 1.1754944e-38, %v3179_v4 }
 0x92c   : > { %v3027_v45 = vpop.permute.xlu0 %3026 }
 0x92d   : > { %v3035_v26 = vsub.f32 %v6470_v60, %v3027_v45  ;;  %v3036_v8 = vsub.f32 %v6466_v17, %v3027_v45  ;;  %v3162_v17 = vand.u32 2147483647, %v6576_v51 }
 0x92e   : > { %v3101_v36 = vpop.permute.xlu2 %3100  ;;  %v4269_v0 = vpop.eup %4268 }
 0x92f   : > { %v3063_v55 = vmul.f32 %v3055_v34, %v3035_v26  ;;  %v3064_v19 = vmul.f32 %v3055_v34, %v3036_v8  ;;  %v4271_v13 = vpop.eup %4270  ;;  %v3154_v59 = vmul.f32 %v4269_v0, %v6576_v51  ;;  %vm3159_vm5 = vweird.f32 %v4269_v0 }
 0x930   : > { %v3169_v10 = vmul.f32 %v4271_v13, %v6580_v48  ;;  %vm3174_vm4 = vweird.f32 %v4271_v13  ;;  %vm6615_vm3 = vcmp.eq.f32.partialorder %v3162_v17, 8.507059e+37  ;;  %vm3160_vm6 = vmor %vm3158_vm14, %vm3159_vm5 }
 0x931   : > { %v3091_v22 = vmul.f32 %v6566_v2, %v3063_v55  ;;  %v3155_v23 = vsub.f32 1.0, %v3154_v59  ;;  %v3092_v30 = vmul.f32 %v6566_v2, %v3064_v19  ;;  %vm3175_vm1 = vmor %vm3173_vm12, %vm3174_vm4 }
 0x932   : > { %v3170_v25 = vsub.f32 1.0, %v3169_v10 }
 0x933   : > { %v3156_v27 = vmul.f32 %v4269_v0, %v3155_v23 }
 0x934   : > { %v3045_v52 = vpop.permute.xlu0 %3044 }
 0x935   : > { %v3059_v1 = vmul.f32 %v3045_v52, %v3031_v42  ;;  %v3060_v14 = vmul.f32 %v3045_v52, %v3032_v47  ;;  %v3157_v62 = vadd.f32 %v4269_v0, %v3156_v27 }
 0x936   : > { %v3050_v37 = vpop.permute.xlu1 %3049  ;;  %v3292_v24 = vpop.permute.xlu2 %3291 }
 0x937   : > { %v3087_v9 = vmul.f32 %v3073_v41, %v3059_v1  ;;  %v3088_v3 = vmul.f32 %v3073_v41, %v3060_v14  ;;  %v3061_v20 = vmul.f32 %v3050_v37, %v3033_v40  ;;  %v3062_v5 = vmul.f32 %v3050_v37, %v3034_v46  ;;  %v3350_v14 = vpop.f32.mrf.mxu1 }
 0x938   : > { %v3171_v41 = vmul.f32 %v4271_v13, %v3170_v25  ;;  %v3161_v45 = vsel %vm3160_vm6, %v4269_v0, %v3157_v62  ;;  %v3348_v46 = vadd.f32 %v3347_v43, %v3292_v24 }
 0x939   : > { %v6588_v6 = vadd.f32 %v3101_v36, %v3087_v9  ;;  %v6590_v60 = vadd.f32 %v3101_v36, %v3088_v3  ;;  %v3089_v16 = vmul.f32 %v3078_v56, %v3061_v20  ;;  %v3090_v28 = vmul.f32 %v3078_v56, %v3062_v5  ;;  %v3376_v56 = vpop.f32.mrf.mxu3 }
 0x93a   : > { %v3172_v49 = vadd.f32 %v4271_v13, %v3171_v41  ;;  %v3166_v15 = vsel %vm6615_vm3, %v3165_v44, %v3161_v45  ;;  %v3377_v26 = vadd.f32 %v3376_v56, %v3292_v24 }
 0x93b   : > { %v3563_v18 = vmul.f32 -1.442695, %v6588_v6  ;;  %v3564_v54 = vmul.f32 -1.442695, %v6590_v60  ;;  %v3273_v40 = vmul.f32 %v3166_v15, %v6570_v38 }
 0x93c   : > { %v3106_v39 = vpop.permute.xlu0 %3105  ;;  %v3176_v51 = vsel %vm3175_vm1, %v4271_v13, %v3172_v49 }
 0x93d   : > { %4272 = vpow2.f32 %v3563_v18  ;;  %v6602_v61 = vadd.f32 %v3106_v39, %v3089_v16  ;;  %v6604_v35 = vadd.f32 %v3106_v39, %v3090_v28  ;;  %v3181_v47 = vsel %vm3178_vm0, %v3180_v29, %v3176_v51 }
 0x93e   : > { %4274 = vpow2.f32 %v3564_v54  ;;  %v3111_v21 = vpop.permute.xlu1 %3110  ;;  %v3274_v48 = vmul.f32 %v3181_v47, %v6572_v32  ;;  %v3388_v8 = vadd.f32 %v3348_v46, %v3273_v40 }
 0x93f   : > { %v3565_v57 = vmul.f32 -1.442695, %v6602_v61  ;;  %v3566_v50 = vmul.f32 -1.442695, %v6604_v35  ;;  %v6609_v63 = vadd.f32 %v3111_v21, %v3091_v22  ;;  %v6613_v33 = vadd.f32 %v3111_v21, %v3092_v30  ;;  %v3353_v12 = vpop.f32.mrf.mxu1 }
 0x940   : > { %v3389_v37 = vadd.f32 %v3377_v26, %v3274_v48  ;;  %3396 = vst [vmem:[%s6643_s23] sm:$0xff] %v3388_v8 }
 0x941   : > { %4276 = vpow2.f32 %v3565_v57  ;;  %v3567_v2 = vmul.f32 -1.442695, %v6609_v63  ;;  %v3568_v11 = vmul.f32 -1.442695, %v6613_v33  ;;  %v6641_v20 = vpop.f32.mrf.mxu3 }
 0x942   : > { %4278 = vpow2.f32 %v3566_v50  ;;  %3397 = vst [vmem:[%s6643_s23 + $0x8] sm:$0xff] %v3389_v37 }
 0x943   : > { %v4273_v58 = vpop.eup %4272  ;;  %4280 = vpow2.f32 %v3567_v2 }
 0x944   : > { %v4275_v34 = vpop.eup %4274  ;;  %v6629_v7 = vadd.f32 1.0, %v4273_v58  ;;  %4282 = vpow2.f32 %v3568_v11  ;;  %v3297_v16 = vpop.permute.xlu0 %3296 }
 0x945   : > { %v6633_v42 = vadd.f32 1.0, %v4275_v34  ;;  %v6681_v23 = vadd.f32 %v3350_v14, %v3297_v16  ;;  %v3380_v8 = vadd.f32 %v6641_v20, %v3297_v16 }
 0x946   : > { %4284 = vrcp.f32 %v6629_v7  ;;  %v3194_v32 = vand.u32 2147483648, %v6629_v7  ;;  %v3192_v55 = vand.u32 2147483647, %v6629_v7  ;;  %vm3188_vm13 = vweird.f32 %v6629_v7 }
 0x947   : > { %v4277_v52 = vpop.eup %4276  ;;  %4286 = vrcp.f32 %v6633_v42  ;;  %v3207_v28 = vand.u32 2147483647, %v6633_v42  ;;  %v3209_v39 = vand.u32 2147483648, %v6633_v42  ;;  %vm3203_vm8 = vweird.f32 %v6633_v42 }
 0x948   : > { %v4279_v1 = vpop.eup %4278  ;;  %v6639_v9 = vadd.f32 1.0, %v4277_v52  ;;  %v3195_v59 = vor.u32 1.1754944e-38, %v3194_v32  ;;  %vm6671_vm11 = vcmp.eq.f32.partialorder %v3192_v55, 8.507059e+37 }
 0x949   : > { %v4281_v3 = vpop.eup %4280  ;;  %v6646_v38 = vadd.f32 1.0, %v4279_v1  ;;  %v3382_v58 = vpop.f32.mrf.mxu3  ;;  %vm6708_vm6 = vcmp.eq.f32.partialorder %v3207_v28, 8.507059e+37  ;;  %v3210_v52 = vor.u32 1.1754944e-38, %v3209_v39 }
 0x94a   : > { %v4283_v5 = vpop.eup %4282  ;;  %4288 = vrcp.f32 %v6639_v9  ;;  %v3224_v36 = vand.u32 2147483648, %v6639_v9  ;;  %v6657_v17 = vadd.f32 1.0, %v4281_v3  ;;  %v3222_v18 = vand.u32 2147483647, %v6639_v9  ;;  %v3302_v1 = vpop.permute.xlu1 %3301 }
 0x94b   : > { %4290 = vrcp.f32 %v6646_v38  ;;  %v3239_v0 = vand.u32 2147483648, %v6646_v38  ;;  %v6659_v53 = vadd.f32 1.0, %v4283_v5  ;;  %v3237_v10 = vand.u32 2147483647, %v6646_v38 }
 0x94c   : > { %v6654_v19 = vpop.eup %4284  ;;  %4292 = vrcp.f32 %v6657_v17  ;;  %v3254_v31 = vand.u32 2147483648, %v6657_v17  ;;  %vm3218_vm2 = vweird.f32 %v6639_v9  ;;  %v6677_v22 = vor.u32 1.1754944e-38, %v3224_v36 }
 0x94d   : > { %v6662_v13 = vpop.eup %4286  ;;  %v3184_v54 = vmul.f32 %v6654_v19, %v6629_v7  ;;  %4294 = vrcp.f32 %v6659_v53  ;;  %vm3233_vm9 = vweird.f32 %v6646_v38  ;;  %v3240_v25 = vor.u32 1.1754944e-38, %v3239_v0 }
 0x94e   : > { %vm3189_vm7 = vweird.f32 %v6654_v19  ;;  %v3199_v30 = vmul.f32 %v6662_v13, %v6633_v42  ;;  %vm6688_vm15 = vcmp.eq.f32.partialorder %v3222_v18, 8.507059e+37  ;;  %v3252_v50 = vand.u32 2147483647, %v6657_v17 }
 0x94f   : > { %v3185_v21 = vsub.f32 1.0, %v3184_v54  ;;  %v3267_v41 = vand.u32 2147483647, %v6659_v53  ;;  %v3269_v62 = vand.u32 2147483648, %v6659_v53  ;;  %vm6696_vm10 = vcmp.eq.f32.partialorder %v3237_v10, 8.507059e+37  ;;  %vm3190_vm0 = vmor %vm3188_vm13, %vm3189_vm7 }
 0x950   : > { %v4289_v43 = vpop.eup %4288  ;;  %v6700_v44 = vor.u32 1.1754944e-38, %v3254_v31  ;;  %v3200_v11 = vsub.f32 1.0, %v3199_v30  ;;  %vm3204_vm4 = vweird.f32 %v6662_v13  ;;  %vm6713_vm1 = vcmp.eq.f32.partialorder %v3252_v50, 8.507059e+37 }
 0x951   : > { %v4291_v56 = vpop.eup %4290  ;;  %v3214_v27 = vmul.f32 %v4289_v43, %v6639_v9  ;;  %v3186_v49 = vmul.f32 %v6654_v19, %v3185_v21  ;;  %vm3219_vm14 = vweird.f32 %v4289_v43  ;;  %vm3205_vm13 = vmor %vm3203_vm8, %vm3204_vm4  ;;  %v3354_v9 = vadd.f32 %v3353_v12, %v3302_v1 }
 0x952   : > { %v3229_v2 = vmul.f32 %v4291_v56, %v6646_v38  ;;  %vm3234_vm5 = vweird.f32 %v4291_v56  ;;  %v4293_v29 = vpop.eup %4292  ;;  %v3201_v51 = vmul.f32 %v6662_v13, %v3200_v11  ;;  %vm6727_vm12 = vmor %vm3218_vm2, %vm3219_vm14  ;;  %vm7039_vm8 = vweird.f32 %v6657_v17 }
 0x953   : > { %v3215_v45 = vsub.f32 1.0, %v3214_v27  ;;  %v3187_v15 = vadd.f32 %v6654_v19, %v3186_v49  ;;  %v4295_v40 = vpop.eup %4294  ;;  %v3244_v48 = vmul.f32 %v4293_v29, %v6657_v17  ;;  %vm3249_vm3 = vweird.f32 %v4293_v29  ;;  %vm3235_vm2 = vmor %vm3233_vm9, %vm3234_vm5 }
 0x954   : > { %v3230_v34 = vsub.f32 1.0, %v3229_v2  ;;  %v3259_v37 = vmul.f32 %v4295_v40, %v6659_v53  ;;  %v3202_v55 = vadd.f32 %v6662_v13, %v3201_v51  ;;  %vm3250_vm9 = vmor %vm7039_vm8, %vm3249_vm3  ;;  %v3383_v30 = vadd.f32 %v3382_v58, %v3302_v1 }
 0x955   : > { %v3216_v46 = vmul.f32 %v4289_v43, %v3215_v45  ;;  %v3191_v3 = vsel %vm3190_vm0, %v6654_v19, %v3187_v15  ;;  %v3245_v7 = vsub.f32 1.0, %v3244_v48  ;;  %vm7040_vm7 = vweird.f32 %v6659_v53 }
 0x956   : > { %v3231_v14 = vmul.f32 %v4291_v56, %v3230_v34  ;;  %v3196_v20 = vsel %vm6671_vm11, %v3195_v59, %v3191_v3  ;;  %v3260_v0 = vsub.f32 1.0, %v3259_v37  ;;  %vm3264_vm11 = vweird.f32 %v4295_v40 }
 0x957   : > { %v3217_v32 = vadd.f32 %v4289_v43, %v3216_v46  ;;  %v3275_v19 = vmul.f32 %v3196_v20, %v6588_v6  ;;  %v3246_v18 = vmul.f32 %v4293_v29, %v3245_v7  ;;  %v3206_v54 = vsel %vm3205_vm13, %v6662_v13, %v3202_v55 }
 0x958   : > { %v3232_v36 = vadd.f32 %v4291_v56, %v3231_v14  ;;  %v3261_v28 = vmul.f32 %v4295_v40, %v3260_v0  ;;  %v3211_v6 = vsel %vm6708_vm6, %v3210_v52, %v3206_v54 }
 0x959   : > { %v3221_v16 = vsel %vm6727_vm12, %v4289_v43, %v3217_v32  ;;  %v3247_v31 = vadd.f32 %v4293_v29, %v3246_v18  ;;  %v3276_v4 = vmul.f32 %v3211_v6, %v6590_v60  ;;  %v3356_v43 = vpop.f32.mrf.mxu1  ;;  %v3390_v21 = vadd.f32 %v6681_v23, %v3275_v19 }
 0x95a   : > { %v3226_v42 = vsel %vm6688_vm15, %v6677_v22, %v3221_v16  ;;  %v3236_v59 = vsel %vm3235_vm2, %v4291_v56, %v3232_v36  ;;  %v3262_v39 = vadd.f32 %v4295_v40, %v3261_v28  ;;  %v3307_v22 = vpop.permute.xlu2 %3306  ;;  %vm3265_vm15 = vmor %vm7040_vm7, %vm3264_vm11 }
 0x95b   : > { %v3241_v10 = vsel %vm6696_vm10, %v3240_v25, %v3236_v59  ;;  %v3277_v38 = vmul.f32 %v3226_v42, %v6602_v61  ;;  %v3251_v60 = vsel %vm3250_vm9, %v4293_v29, %v3247_v31  ;;  %v3270_v61 = vor.u32 1.1754944e-38, %v3269_v62  ;;  %3398 = vst [vmem:[%s6643_s23 + $0x10] sm:$0xff] %v3390_v21 }
 0x95c   : > { %v3278_v13 = vmul.f32 %v3241_v10, %v6604_v35  ;;  %v3385_v35 = vpop.f32.mrf.mxu3  ;;  %v3391_v17 = vadd.f32 %v3380_v8, %v3276_v4  ;;  %v3256_v23 = vsel %vm6713_vm1, %v6700_v44, %v3251_v60  ;;  %v3266_v56 = vsel %vm3265_vm15, %v4295_v40, %v3262_v39 }
 0x95d   : > { %v3392_v25 = vadd.f32 %v3354_v9, %v3277_v38  ;;  %vm3268_vm10 = vcmp.eq.f32.partialorder %v3267_v41, 8.507059e+37  ;;  %v3279_v50 = vmul.f32 %v3256_v23, %v6609_v63  ;;  %v3357_v62 = vadd.f32 %v3356_v43, %v3307_v22 }
 0x95e   : > { %v3393_v27 = vadd.f32 %v3383_v30, %v3278_v13  ;;  %v3271_v57 = vsel %vm3268_vm10, %v3270_v61, %v3266_v56  ;;  %3399 = vst [vmem:[%s6643_s23 + $0x18] sm:$0xff] %v3391_v17  ;;  %v3386_v2 = vadd.f32 %v3385_v35, %v3307_v22 }
 0x95f   : > { %v3280_v12 = vmul.f32 %v3271_v57, %v6613_v33  ;;  %3400 = vst [vmem:[%s6643_s23 + $0x20] sm:$0xff] %v3392_v25  ;;  %v3394_v24 = vadd.f32 %v3357_v62, %v3279_v50 }
 0x960   : > { %3401 = vst [vmem:[%s6643_s23 + $0x28] sm:$0xff] %v3393_v27 }
 0x961   : > { %v3395_v53 = vadd.f32 %v3386_v2, %v3280_v12  ;;  %3402 = vst [vmem:[%s6643_s23 + $0x30] sm:$0xff] %v3394_v24 }
 0x963   : > { %3403 = vst [vmem:[%s6643_s23 + $0x38] sm:$0xff] %v3395_v53 }
 0x964   : > { %4329 = shalt.err (!%p4326_p3)
}
 0x965   : > { %s4381_s4 = smov 256  }
 0x966   : > { %3587 = dma.vmem_to_hbm [thread:$0]  (%p4510_p5), %s3418_s20, 1024, %s3420_s26, %s3405_s3, %s4381_s4, %s4381_s4, %s6925_s29  }
 0x967 PF: > { %p3593_p4 = scmp.ge.s32.totalorder %s4364_s27, 2  ;;  %s3434_s21 = sand.u32 1, %s4352_s24  }
 0x968   : > { %s3435_s18 = scalar_lea.sflag [#allocation5], %s3434_s21 }
 0x969   : > { %p3590_p7 = pnand %p3593_p4, %p4514_p6 }
 0x96b   : > { %p3591_p8 = pneg %p3590_p7 }
 0x96d   : > { %4347 = dma.done.wait (%p3591_p8), %s3435_s18, 1024  }
 0x96e   : > { %4349 = vsyncadd (%p3591_p8), %s3435_s18, 4294966272  ;;  %s7042_s27 = sld [smem:[#allocation8_spill]]  ;;  %s7045_s24 = smov %s4356_s25 }
 0x96f   : > { %s7043_s30 = sld [smem:[#allocation7_spill]] }
 0x970   : > { %s7044_s26 = sld [smem:[#allocation9_spill]] }
 0x974   : > { %p27_p9 = scmp.ge.s32.totalorder %s7042_s27, 4  }
 0x975   : > { %s7046_s25 = smov %s7043_s30 }
 0x976   :  { %29 = sbr.rel (!%p27_p9) target bundleno = 8 (0x8), region = 138 }
 0x97b   :  { %3441 = vsyncpa [#allocation5], 1 }
 0x97c   :  { %3443 = vsyncpa [#allocation5 + $0x1], 1 }

</bundles_post_ra>
